<compile_context>
chip_gen: v7x
topology: tpu7x:2x2x1
jax: 0.10.0
libtpu: 0.0.40
codegen_flags: <defaults>
</compile_context>

<pallas_src>
import functools
import math

import jax
import jax.numpy as jnp
from jax.experimental import pallas as pl
from jax.experimental.pallas import tpu as pltpu


C_PAD = 128  # lane-dense channel padding used for every conv layer / the head


# ---------------------------------------------------------------------------
# In-kernel building blocks (operate on one sample, channels-last 2D tiles)
# ---------------------------------------------------------------------------
def _conv_bn_relu(patches, w_ref, s_ref, t_ref, cdt):
    """im2col matmul + folded BN + ReLU.  patches: (L_out, K*C), w: (K*C, 128)."""
    z = jnp.dot(patches.astype(cdt), w_ref[...],
                preferred_element_type=jnp.float32)
    return jnp.maximum(z * s_ref[...] + t_ref[...], 0.0)


def _maxpool2(y):
    """MaxPool1d(kernel=2, stride=2) over rows of (L, 128).

    Adjacent-row max followed by a 0/1 'take every even row' selection matmul
    (runs on the idle MXU; avoids strided sublane slicing).  The selection
    matrix is a handful of vregs built with iota/compare (free VPU filler).
    """
    L = y.shape[0]
    Lp = L // 2
    r = jnp.maximum(y[0:L - 1, :], y[1:L, :])          # r[l] = max(y[l], y[l+1])
    rows = jax.lax.broadcasted_iota(jnp.int32, (Lp, L - 1), 0)
    cols = jax.lax.broadcasted_iota(jnp.int32, (Lp, L - 1), 1)
    sel = jnp.where(cols == 2 * rows, 1.0, 0.0).astype(jnp.float32)
    return jnp.dot(sel, r, preferred_element_type=jnp.float32)


def _im2col_lanes(y, K):
    """(L_in, C) -> (L_in-K+1, K*C): column index = k*C + c (vreg-aligned, C=128)."""
    L_out = y.shape[0] - K + 1
    return jnp.concatenate([y[k:k + L_out, :] for k in range(K)], axis=1)


def _adaptive_max(y, bins):
    """AdaptiveMaxPool1d with static PyTorch bin boundaries over rows of (L, 128)."""
    return jnp.concatenate(
        [jnp.max(y[lo:hi, :], axis=0, keepdims=True) for lo, hi in bins], axis=0)


def _cnn1d_fused_kernel(p1_ref,
                        w1_ref, s1_ref, t1_ref,
                        w2_ref, s2_ref, t2_ref,
                        w3_ref, s3_ref, t3_ref,
                        w4_ref, s4_ref, t4_ref,
                        wc_ref, bc_ref, wd1_ref, bd1_ref, wd2_ref, bd2_ref,
                        pool_ref, logit_ref, dom_ref,
                        *, ksizes, bins, cdt):
    """Entire CNN_1Dfea forward for one batch element (eval mode)."""
    # ----- sharedNet: conv1 (precomputed im2col) + BN + ReLU + maxpool(2,2) ---
    a = _conv_bn_relu(p1_ref[0], w1_ref, s1_ref, t1_ref, cdt)       # (L1, 128)
    a = _maxpool2(a)                                                 # (P1, 128)
    # ----- conv2..conv4: im2col built in VMEM from the previous activation ---
    a = _conv_bn_relu(_im2col_lanes(a, ksizes[0]), w2_ref, s2_ref, t2_ref, cdt)
    a = _maxpool2(a)
    a = _conv_bn_relu(_im2col_lanes(a, ksizes[1]), w3_ref, s3_ref, t3_ref, cdt)
    a = _maxpool2(a)
    a = _conv_bn_relu(_im2col_lanes(a, ksizes[2]), w4_ref, s4_ref, t4_ref, cdt)
    p = _adaptive_max(a, bins)                                       # (4, 128)
    pool_ref[0] = p

    # ----- heads: torch flatten order (c*4+t) is folded into the weights -----
    # feat[0, t*128 + c] = p[t, c]  (padded channels are exact zeros)
    feat = jnp.concatenate([p[t:t + 1, :] for t in range(p.shape[0])], axis=1)
    feat = feat.astype(cdt)                                          # (1, 512)

    logit_ref[0] = (jnp.dot(feat, wc_ref[...],
                            preferred_element_type=jnp.float32) + bc_ref[...])

    # domain_fc: Linear(256,128) -> ReLU -> Dropout(eval: identity) -> Linear(128,2)
    h = jnp.maximum(
        jnp.dot(feat, wd1_ref[...], preferred_element_type=jnp.float32)
        + bd1_ref[...], 0.0)
    dom_ref[0] = (jnp.dot(h.astype(cdt), wd2_ref[...],
                          preferred_element_type=jnp.float32) + bd2_ref[...])


# ---------------------------------------------------------------------------
# Parameter preparation (BN folding, channel padding, head-weight reordering)
# ---------------------------------------------------------------------------
def _fold_conv_bn(w, b, gamma, beta, mean, var, *, c_pad=C_PAD, eps=1e-5,
                  dtype=jnp.float32, single_channel=False):
    """Conv1d weight (C_out, C_in, K) + eval-mode BN -> im2col matrix + scale/shift."""
    C_out, C_in, K = w.shape
    scale = gamma / jnp.sqrt(var + eps)
    shift = scale * (b - mean) + beta
    if single_channel:
        # layer 1: patches are indexed by k only (C_in == 1)
        wp = jnp.transpose(w[:, 0, :], (1, 0))                       # (K, C_out)
        wp = jnp.pad(wp, ((0, 0), (0, c_pad - C_out)))
    else:
        # in-kernel im2col column index = k*c_pad + c
        wt = jnp.transpose(w, (2, 1, 0))                             # (K, C_in, C_out)
        wt = jnp.pad(wt, ((0, 0), (0, c_pad - C_in), (0, c_pad - C_out)))
        wp = wt.reshape(K * c_pad, c_pad)
    s = jnp.pad(scale, (0, c_pad - C_out)).reshape(1, c_pad)
    t = jnp.pad(shift, (0, c_pad - C_out)).reshape(1, c_pad)
    return wp.astype(dtype), s.astype(jnp.float32), t.astype(jnp.float32)


def _reorder_head_w(w, *, c_real, t_bins, c_pad=C_PAD):
    """(c_real*t_bins, d) with torch row index c*t_bins+t -> (t_bins*c_pad, d)."""
    d_out = w.shape[1]
    wr = w.reshape(c_real, t_bins, d_out)            # [c, t, :]
    wr = jnp.transpose(wr, (1, 0, 2))                # [t, c, :]
    wr = jnp.pad(wr, ((0, 0), (0, c_pad - c_real), (0, 0)))
    return wr.reshape(t_bins * c_pad, d_out)


def _prep_head(wc, bc, w1, b1, w2, b2, *, c_real, t_bins, c_pad=C_PAD,
               dtype=jnp.float32):
    n_cls = wc.shape[1]
    d_dom = w2.shape[1]
    wc_r = jnp.pad(_reorder_head_w(wc, c_real=c_real, t_bins=t_bins, c_pad=c_pad),
                   ((0, 0), (0, c_pad - n_cls)))
    bc_r = jnp.pad(jnp.reshape(bc, (1, -1)), ((0, 0), (0, c_pad - n_cls)))
    w1_r = _reorder_head_w(w1, c_real=c_real, t_bins=t_bins, c_pad=c_pad)
    b1_r = jnp.reshape(b1, (1, -1))                  # already 128 wide
    w2_r = jnp.pad(w2, ((0, 0), (0, c_pad - d_dom)))
    b2_r = jnp.pad(jnp.reshape(b2, (1, -1)), ((0, 0), (0, c_pad - d_dom)))
    return (wc_r.astype(dtype), bc_r.astype(jnp.float32),
            w1_r.astype(dtype), b1_r.astype(jnp.float32),
            w2_r.astype(dtype), b2_r.astype(jnp.float32))


# ---------------------------------------------------------------------------
# Forward pass wrapper
# ---------------------------------------------------------------------------
def cnn_1dfea_forward(source, params, compute_dtype=jnp.float32):
    """source: (B, L) f32 -> (source_fea (B,256), source_lab (B,), domain (B,2))."""
    B, L = source.shape
    K1 = params["layer1"][0].shape[2]
    K2 = params["layer2"][0].shape[2]
    K3 = params["layer3"][0].shape[2]
    K4 = params["layer4"][0].shape[2]

    L1 = L - K1 + 1
    P1 = L1 // 2
    L2 = P1 - K2 + 1
    P2 = L2 // 2
    L3 = P2 - K3 + 1
    P3 = L3 // 2
    L4 = P3 - K4 + 1
    assert L4 >= 1, "input length too short for the conv/pool chain"

    out_size = 4
    # PyTorch AdaptiveMaxPool1d bin boundaries (static).
    bins = tuple(((i * L4) // out_size,
                  ((i + 1) * L4 + out_size - 1) // out_size)
                 for i in range(out_size))

    c_real = params["layer4"][0].shape[0]            # 64 channels out of layer4
    num_classes = params["head"][0].shape[1]
    d_dom = params["head"][4].shape[1]
    assert params["head"][0].shape[0] == c_real * out_size
    assert num_classes <= C_PAD and d_dom <= C_PAD

    # layer-1 im2col in XLA (C_in == 1; only B*L1*K1 elements -> tiny).
    patches1 = jnp.stack([source[:, k:k + L1] for k in range(K1)],
                         axis=-1).astype(compute_dtype)              # (B, L1, K1)

    # Fold BN (eval mode) into conv weights; pad channels to 128 lanes.
    w1p, s1, t1 = _fold_conv_bn(*params["layer1"], dtype=compute_dtype,
                                single_channel=True)
    w2p, s2, t2 = _fold_conv_bn(*params["layer2"], dtype=compute_dtype)
    w3p, s3, t3 = _fold_conv_bn(*params["layer3"], dtype=compute_dtype)
    w4p, s4, t4 = _fold_conv_bn(*params["layer4"], dtype=compute_dtype)
    wc, bc, wd1, bd1, wd2, bd2 = _prep_head(
        *params["head"], c_real=c_real, t_bins=out_size, dtype=compute_dtype)

    kernel = functools.partial(_cnn1d_fused_kernel,
                               ksizes=(K2, K3, K4), bins=bins, cdt=compute_dtype)

    def _full2d(x):
        # Whole-array block, constant index_map: DMA'd once, resident in VMEM.
        return pl.BlockSpec(x.shape, lambda b: (0, 0))

    pool4, logits, dom = pl.pallas_call(
        kernel,
        grid=(B,),
        out_shape=(
            jax.ShapeDtypeStruct((B, out_size, C_PAD), jnp.float32),
            jax.ShapeDtypeStruct((B, 1, C_PAD), jnp.float32),
            jax.ShapeDtypeStruct((B, 1, C_PAD), jnp.float32),
        ),
        in_specs=[
            pl.BlockSpec((1, L1, K1), lambda b: (b, 0, 0)),
            _full2d(w1p), _full2d(s1), _full2d(t1),
            _full2d(w2p), _full2d(s2), _full2d(t2),
            _full2d(w3p), _full2d(s3), _full2d(t3),
            _full2d(w4p), _full2d(s4), _full2d(t4),
            _full2d(wc), _full2d(bc),
            _full2d(wd1), _full2d(bd1),
            _full2d(wd2), _full2d(bd2),
        ],
        out_specs=(
            pl.BlockSpec((1, out_size, C_PAD), lambda b: (b, 0, 0)),
            pl.BlockSpec((1, 1, C_PAD), lambda b: (b, 0, 0)),
            pl.BlockSpec((1, 1, C_PAD), lambda b: (b, 0, 0)),
        ),
        compiler_params=pltpu.CompilerParams(
            dimension_semantics=("parallel",)),   # v7x: batch split over both TCs
    )(patches1, w1p, s1, t1, w2p, s2, t2, w3p, s3, t3, w4p, s4, t4,
      wc, bc, wd1, bd1, wd2, bd2)

    # PyTorch x.view(B, -1) of (B, C=64, T=4): feature index = c*4 + t.
    feat = jnp.transpose(pool4[:, :, :c_real], (0, 2, 1)).reshape(B, c_real * out_size)
    # Argmax only over the real class lanes (padded lanes excluded).
    # TODO(synk): torch.max returns int64 indices; int32 (JAX default) is returned.
    lab = jnp.argmax(logits[:, 0, :num_classes], axis=-1)
    dom2 = dom[:, 0, :d_dom]
    return feat, lab, dom2


# ---------------------------------------------------------------------------
# Pure-JAX reference (eval mode) used for self-validation
# ---------------------------------------------------------------------------
def _reference_forward(source, params):
    def conv_bn_relu(x, w, b, gamma, beta, mean, var):
        C_out, C_in, K = w.shape
        L_out = x.shape[1] - K + 1
        patches = jnp.stack([x[:, k:k + L_out, :] for k in range(K)], axis=-1)
        z = jnp.einsum('blck,ock->blo', patches, w) + b
        y = gamma * (z - mean) / jnp.sqrt(var + 1e-5) + beta
        return jnp.maximum(y, 0.0)

    def maxpool2(x):
        Lp = x.shape[1] // 2
        return jnp.maximum(x[:, 0:2 * Lp:2, :], x[:, 1:2 * Lp:2, :])

    x = source[:, :, None]
    x = maxpool2(conv_bn_relu(x, *params["layer1"]))
    x = maxpool2(conv_bn_relu(x, *params["layer2"]))
    x = maxpool2(conv_bn_relu(x, *params["layer3"]))
    x = conv_bn_relu(x, *params["layer4"])
    L4, out_size = x.shape[1], 4
    bins = [((i * L4) // out_size, ((i + 1) * L4 + out_size - 1) // out_size)
            for i in range(out_size)]
    x = jnp.stack([jnp.max(x[:, lo:hi, :], axis=1) for lo, hi in bins], axis=-1)
    feat = x.reshape(x.shape[0], -1)                 # (B, 256), index c*4 + t
    wc, bc, w1, b1, w2, b2 = params["head"]
    logits = feat @ wc + bc
    lab = jnp.argmax(logits, axis=-1)
    h = jnp.maximum(feat @ w1 + b1, 0.0)
    dom = h @ w2 + b2
    return feat, lab, dom


# ---------------------------------------------------------------------------
# Deterministic synthetic parameters (shapes from CNN_1Dfea.__init__)
# ---------------------------------------------------------------------------
def init_params(key, num_classes=31):
    def conv_layer(k, c_in, c_out, ksz):
        kk = jax.random.split(k, 6)
        fan = c_in * ksz
        w = jax.random.normal(kk[0], (c_out, c_in, ksz), jnp.float32) / math.sqrt(fan)
        b = 0.1 * jax.random.normal(kk[1], (c_out,), jnp.float32)
        gamma = 1.0 + 0.1 * jax.random.normal(kk[2], (c_out,), jnp.float32)
        beta = 0.1 * jax.random.normal(kk[3], (c_out,), jnp.float32)
        mean = 0.1 * jax.random.normal(kk[4], (c_out,), jnp.float32)
        var = jnp.abs(jax.random.normal(kk[5], (c_out,), jnp.float32)) + 0.5
        return (w, b, gamma, beta, mean, var)

    def linear(k, d_in, d_out):
        k1, k2 = jax.random.split(k)
        w = jax.random.normal(k1, (d_in, d_out), jnp.float32) / math.sqrt(d_in)
        b = 0.1 * jax.random.normal(k2, (1, d_out), jnp.float32)
        return w, b

    ks = jax.random.split(key, 7)
    wc, bc = linear(ks[4], 256, num_classes)
    w1, b1 = linear(ks[5], 256, 128)
    w2, b2 = linear(ks[6], 128, 2)
    return {
        "layer1": conv_layer(ks[0], 1, 16, 64),
        "layer2": conv_layer(ks[1], 16, 32, 16),
        "layer3": conv_layer(ks[2], 32, 64, 5),
        "layer4": conv_layer(ks[3], 64, 64, 5),
        "head": (wc, bc, w1, b1, w2, b2),
    }


if __name__ == "__main__":
    key = jax.random.PRNGKey(0)
    k_param, k_x = jax.random.split(key)
    params = init_params(k_param, num_classes=31)

    # Smallest clean input length: L=205 -> 142->71->56->28->24->12->8,
    # adaptive-pooled to 4 time bins => feature dim 64*4 = 256.
    B, L = 2, 205
    source = jax.random.normal(k_x, (B, L), jnp.float32)

    fwd = jax.jit(functools.partial(cnn_1dfea_forward, params=params))
    fea, lab, dom = fwd(source)
    jax.block_until_ready((fea, lab, dom))

    # shape / dtype checks
    assert fea.shape == (B, 256) and fea.dtype == jnp.float32
    assert lab.shape == (B,) and jnp.issubdtype(lab.dtype, jnp.integer)
    assert dom.shape == (B, 2) and dom.dtype == jnp.float32

    # numerical self-check vs a pure-JAX reference (loose tol: MXU matmul
    # passes on TPU use reduced-precision operands in both implementations).
    ref_fea, _, ref_dom = jax.jit(
        functools.partial(_reference_forward, params=params))(source)
    assert jnp.allclose(fea, ref_fea, atol=5e-2, rtol=5e-2)
    assert jnp.allclose(dom, ref_dom, atol=5e-2, rtol=5e-2)

    print("KERNEL_OK")
</pallas_src>

<mosaic_0001>
module attributes {stable_mosaic.version = 11 : i64} {
  func.func @_cnn1d_fused_kernel(%arg0: i32, %arg1: memref<1x142x64xf32, #tpu.memory_space<vmem>>, %arg2: memref<64x128xf32, #tpu.memory_space<vmem>>, %arg3: memref<1x128xf32, #tpu.memory_space<vmem>>, %arg4: memref<1x128xf32, #tpu.memory_space<vmem>>, %arg5: memref<2048x128xf32, #tpu.memory_space<vmem>>, %arg6: memref<1x128xf32, #tpu.memory_space<vmem>>, %arg7: memref<1x128xf32, #tpu.memory_space<vmem>>, %arg8: memref<640x128xf32, #tpu.memory_space<vmem>>, %arg9: memref<1x128xf32, #tpu.memory_space<vmem>>, %arg10: memref<1x128xf32, #tpu.memory_space<vmem>>, %arg11: memref<640x128xf32, #tpu.memory_space<vmem>>, %arg12: memref<1x128xf32, #tpu.memory_space<vmem>>, %arg13: memref<1x128xf32, #tpu.memory_space<vmem>>, %arg14: memref<512x128xf32, #tpu.memory_space<vmem>>, %arg15: memref<1x128xf32, #tpu.memory_space<vmem>>, %arg16: memref<512x128xf32, #tpu.memory_space<vmem>>, %arg17: memref<1x128xf32, #tpu.memory_space<vmem>>, %arg18: memref<128x128xf32, #tpu.memory_space<vmem>>, %arg19: memref<1x128xf32, #tpu.memory_space<vmem>>, %arg20: memref<1x4x128xf32, #tpu.memory_space<vmem>>, %arg21: memref<1x1x128xf32, #tpu.memory_space<vmem>>, %arg22: memref<1x1x128xf32, #tpu.memory_space<vmem>>) attributes {dimension_semantics = [#tpu.dimension_semantics<parallel>], iteration_bounds = array<i64: 2>, scalar_prefetch = 0 : i64, scratch_operands = 0 : i64, tpu.core_type = #tpu.core_type<tc>, window_params = [{transform_indices = @transform_0, window_bounds = array<i64: 1, 142, 64>}, {pipeline_mode = #tpu.pipeline_mode<synchronous>, transform_indices = @transform_1, window_bounds = array<i64: 64, 128>}, {pipeline_mode = #tpu.pipeline_mode<synchronous>, transform_indices = @transform_2, window_bounds = array<i64: 1, 128>}, {pipeline_mode = #tpu.pipeline_mode<synchronous>, transform_indices = @transform_3, window_bounds = array<i64: 1, 128>}, {pipeline_mode = #tpu.pipeline_mode<synchronous>, transform_indices = @transform_4, window_bounds = array<i64: 2048, 128>}, {pipeline_mode = #tpu.pipeline_mode<synchronous>, transform_indices = @transform_5, window_bounds = array<i64: 1, 128>}, {pipeline_mode = #tpu.pipeline_mode<synchronous>, transform_indices = @transform_6, window_bounds = array<i64: 1, 128>}, {pipeline_mode = #tpu.pipeline_mode<synchronous>, transform_indices = @transform_7, window_bounds = array<i64: 640, 128>}, {pipeline_mode = #tpu.pipeline_mode<synchronous>, transform_indices = @transform_8, window_bounds = array<i64: 1, 128>}, {pipeline_mode = #tpu.pipeline_mode<synchronous>, transform_indices = @transform_9, window_bounds = array<i64: 1, 128>}, {pipeline_mode = #tpu.pipeline_mode<synchronous>, transform_indices = @transform_10, window_bounds = array<i64: 640, 128>}, {pipeline_mode = #tpu.pipeline_mode<synchronous>, transform_indices = @transform_11, window_bounds = array<i64: 1, 128>}, {pipeline_mode = #tpu.pipeline_mode<synchronous>, transform_indices = @transform_12, window_bounds = array<i64: 1, 128>}, {pipeline_mode = #tpu.pipeline_mode<synchronous>, transform_indices = @transform_13, window_bounds = array<i64: 512, 128>}, {pipeline_mode = #tpu.pipeline_mode<synchronous>, transform_indices = @transform_14, window_bounds = array<i64: 1, 128>}, {pipeline_mode = #tpu.pipeline_mode<synchronous>, transform_indices = @transform_15, window_bounds = array<i64: 512, 128>}, {pipeline_mode = #tpu.pipeline_mode<synchronous>, transform_indices = @transform_16, window_bounds = array<i64: 1, 128>}, {pipeline_mode = #tpu.pipeline_mode<synchronous>, transform_indices = @transform_17, window_bounds = array<i64: 128, 128>}, {pipeline_mode = #tpu.pipeline_mode<synchronous>, transform_indices = @transform_18, window_bounds = array<i64: 1, 128>}, {transform_indices = @transform_19, window_bounds = array<i64: 1, 4, 128>}, {transform_indices = @transform_20, window_bounds = array<i64: 1, 1, 128>}, {transform_indices = @transform_21, window_bounds = array<i64: 1, 1, 128>}]} {
    %c0 = arith.constant 0 : index
    %c0_0 = arith.constant 0 : index
    %c0_1 = arith.constant 0 : index
    %0 = vector.load %arg1[%c0, %c0_0, %c0_1] : memref<1x142x64xf32, #tpu.memory_space<vmem>>, vector<1x142x64xf32>
    %1 = vector.shape_cast %0 : vector<1x142x64xf32> to vector<142x64xf32>
    %c0_2 = arith.constant 0 : index
    %c0_3 = arith.constant 0 : index
    %2 = vector.load %arg2[%c0_2, %c0_3] : memref<64x128xf32, #tpu.memory_space<vmem>>, vector<64x128xf32>
    %cst = arith.constant dense<0.000000e+00> : vector<142x128xf32>
    %3 = tpu.matmul %1, %2, %cst {dimension_numbers = #tpu.dot_dimension_numbers<[1], [0], [0], [1], [0, 0, 1, 1], [], []>} : vector<142x64xf32>, vector<64x128xf32>, vector<142x128xf32> -> vector<142x128xf32>
    %c0_4 = arith.constant 0 : index
    %c0_5 = arith.constant 0 : index
    %4 = vector.load %arg3[%c0_4, %c0_5] : memref<1x128xf32, #tpu.memory_space<vmem>>, vector<1x128xf32>
    %5 = vector.broadcast %4 : vector<1x128xf32> to vector<142x128xf32>
    %6 = arith.mulf %3, %5 : vector<142x128xf32>
    %c0_6 = arith.constant 0 : index
    %c0_7 = arith.constant 0 : index
    %7 = vector.load %arg4[%c0_6, %c0_7] : memref<1x128xf32, #tpu.memory_space<vmem>>, vector<1x128xf32>
    %8 = vector.broadcast %7 : vector<1x128xf32> to vector<142x128xf32>
    %9 = arith.addf %6, %8 : vector<142x128xf32>
    %cst_8 = arith.constant 0.000000e+00 : f32
    %10 = vector.broadcast %cst_8 : f32 to vector<142x128xf32>
    %11 = arith.maximumf %9, %10 : vector<142x128xf32>
    %12 = vector.extract_strided_slice %11 {offsets = [0, 0], sizes = [141, 128], strides = [1, 1]} : vector<142x128xf32> to vector<141x128xf32>
    %13 = vector.extract_strided_slice %11 {offsets = [1, 0], sizes = [141, 128], strides = [1, 1]} : vector<142x128xf32> to vector<141x128xf32>
    %14 = arith.maximumf %12, %13 : vector<141x128xf32>
    %15 = tpu.iota {dimensions = array<i32: 0>} : vector<71x141xi32>
    %16 = tpu.iota {dimensions = array<i32: 1>} : vector<71x141xi32>
    %c2_i32 = arith.constant 2 : i32
    %17 = vector.broadcast %c2_i32 : i32 to vector<71x141xi32>
    %18 = arith.muli %17, %15 : vector<71x141xi32>
    %19 = arith.cmpi eq, %16, %18 : vector<71x141xi32>
    %cst_9 = arith.constant 1.000000e+00 : f32
    %cst_10 = arith.constant 0.000000e+00 : f32
    %20 = vector.broadcast %cst_9 : f32 to vector<71x141xf32>
    %21 = vector.broadcast %cst_10 : f32 to vector<71x141xf32>
    %22 = arith.select %19, %20, %21 : vector<71x141xi1>, vector<71x141xf32>
    %cst_11 = arith.constant dense<0.000000e+00> : vector<71x128xf32>
    %23 = tpu.matmul %22, %14, %cst_11 {dimension_numbers = #tpu.dot_dimension_numbers<[1], [0], [0], [1], [0, 0, 1, 1], [], []>} : vector<71x141xf32>, vector<141x128xf32>, vector<71x128xf32> -> vector<71x128xf32>
    %24 = vector.extract_strided_slice %23 {offsets = [0, 0], sizes = [56, 128], strides = [1, 1]} : vector<71x128xf32> to vector<56x128xf32>
    %25 = vector.extract_strided_slice %23 {offsets = [1, 0], sizes = [56, 128], strides = [1, 1]} : vector<71x128xf32> to vector<56x128xf32>
    %26 = vector.extract_strided_slice %23 {offsets = [2, 0], sizes = [56, 128], strides = [1, 1]} : vector<71x128xf32> to vector<56x128xf32>
    %27 = vector.extract_strided_slice %23 {offsets = [3, 0], sizes = [56, 128], strides = [1, 1]} : vector<71x128xf32> to vector<56x128xf32>
    %28 = vector.extract_strided_slice %23 {offsets = [4, 0], sizes = [56, 128], strides = [1, 1]} : vector<71x128xf32> to vector<56x128xf32>
    %29 = vector.extract_strided_slice %23 {offsets = [5, 0], sizes = [56, 128], strides = [1, 1]} : vector<71x128xf32> to vector<56x128xf32>
    %30 = vector.extract_strided_slice %23 {offsets = [6, 0], sizes = [56, 128], strides = [1, 1]} : vector<71x128xf32> to vector<56x128xf32>
    %31 = vector.extract_strided_slice %23 {offsets = [7, 0], sizes = [56, 128], strides = [1, 1]} : vector<71x128xf32> to vector<56x128xf32>
    %32 = vector.extract_strided_slice %23 {offsets = [8, 0], sizes = [56, 128], strides = [1, 1]} : vector<71x128xf32> to vector<56x128xf32>
    %33 = vector.extract_strided_slice %23 {offsets = [9, 0], sizes = [56, 128], strides = [1, 1]} : vector<71x128xf32> to vector<56x128xf32>
    %34 = vector.extract_strided_slice %23 {offsets = [10, 0], sizes = [56, 128], strides = [1, 1]} : vector<71x128xf32> to vector<56x128xf32>
    %35 = vector.extract_strided_slice %23 {offsets = [11, 0], sizes = [56, 128], strides = [1, 1]} : vector<71x128xf32> to vector<56x128xf32>
    %36 = vector.extract_strided_slice %23 {offsets = [12, 0], sizes = [56, 128], strides = [1, 1]} : vector<71x128xf32> to vector<56x128xf32>
    %37 = vector.extract_strided_slice %23 {offsets = [13, 0], sizes = [56, 128], strides = [1, 1]} : vector<71x128xf32> to vector<56x128xf32>
    %38 = vector.extract_strided_slice %23 {offsets = [14, 0], sizes = [56, 128], strides = [1, 1]} : vector<71x128xf32> to vector<56x128xf32>
    %39 = vector.extract_strided_slice %23 {offsets = [15, 0], sizes = [56, 128], strides = [1, 1]} : vector<71x128xf32> to vector<56x128xf32>
    %40 = tpu.concatenate %24, %25, %26, %27, %28, %29, %30, %31, %32, %33, %34, %35, %36, %37, %38, %39 in 1 : vector<56x128xf32>, vector<56x128xf32>, vector<56x128xf32>, vector<56x128xf32>, vector<56x128xf32>, vector<56x128xf32>, vector<56x128xf32>, vector<56x128xf32>, vector<56x128xf32>, vector<56x128xf32>, vector<56x128xf32>, vector<56x128xf32>, vector<56x128xf32>, vector<56x128xf32>, vector<56x128xf32>, vector<56x128xf32> -> vector<56x2048xf32>
    %c0_12 = arith.constant 0 : index
    %c0_13 = arith.constant 0 : index
    %41 = vector.load %arg5[%c0_12, %c0_13] : memref<2048x128xf32, #tpu.memory_space<vmem>>, vector<2048x128xf32>
    %cst_14 = arith.constant dense<0.000000e+00> : vector<56x128xf32>
    %42 = tpu.matmul %40, %41, %cst_14 {dimension_numbers = #tpu.dot_dimension_numbers<[1], [0], [0], [1], [0, 0, 1, 1], [], []>} : vector<56x2048xf32>, vector<2048x128xf32>, vector<56x128xf32> -> vector<56x128xf32>
    %c0_15 = arith.constant 0 : index
    %c0_16 = arith.constant 0 : index
    %43 = vector.load %arg6[%c0_15, %c0_16] : memref<1x128xf32, #tpu.memory_space<vmem>>, vector<1x128xf32>
    %44 = vector.broadcast %43 : vector<1x128xf32> to vector<56x128xf32>
    %45 = arith.mulf %42, %44 : vector<56x128xf32>
    %c0_17 = arith.constant 0 : index
    %c0_18 = arith.constant 0 : index
    %46 = vector.load %arg7[%c0_17, %c0_18] : memref<1x128xf32, #tpu.memory_space<vmem>>, vector<1x128xf32>
    %47 = vector.broadcast %46 : vector<1x128xf32> to vector<56x128xf32>
    %48 = arith.addf %45, %47 : vector<56x128xf32>
    %cst_19 = arith.constant 0.000000e+00 : f32
    %49 = vector.broadcast %cst_19 : f32 to vector<56x128xf32>
    %50 = arith.maximumf %48, %49 : vector<56x128xf32>
    %51 = vector.extract_strided_slice %50 {offsets = [0, 0], sizes = [55, 128], strides = [1, 1]} : vector<56x128xf32> to vector<55x128xf32>
    %52 = vector.extract_strided_slice %50 {offsets = [1, 0], sizes = [55, 128], strides = [1, 1]} : vector<56x128xf32> to vector<55x128xf32>
    %53 = arith.maximumf %51, %52 : vector<55x128xf32>
    %54 = tpu.iota {dimensions = array<i32: 0>} : vector<28x55xi32>
    %55 = tpu.iota {dimensions = array<i32: 1>} : vector<28x55xi32>
    %c2_i32_20 = arith.constant 2 : i32
    %56 = vector.broadcast %c2_i32_20 : i32 to vector<28x55xi32>
    %57 = arith.muli %56, %54 : vector<28x55xi32>
    %58 = arith.cmpi eq, %55, %57 : vector<28x55xi32>
    %cst_21 = arith.constant 1.000000e+00 : f32
    %cst_22 = arith.constant 0.000000e+00 : f32
    %59 = vector.broadcast %cst_21 : f32 to vector<28x55xf32>
    %60 = vector.broadcast %cst_22 : f32 to vector<28x55xf32>
    %61 = arith.select %58, %59, %60 : vector<28x55xi1>, vector<28x55xf32>
    %cst_23 = arith.constant dense<0.000000e+00> : vector<28x128xf32>
    %62 = tpu.matmul %61, %53, %cst_23 {dimension_numbers = #tpu.dot_dimension_numbers<[1], [0], [0], [1], [0, 0, 1, 1], [], []>} : vector<28x55xf32>, vector<55x128xf32>, vector<28x128xf32> -> vector<28x128xf32>
    %63 = vector.extract_strided_slice %62 {offsets = [0, 0], sizes = [24, 128], strides = [1, 1]} : vector<28x128xf32> to vector<24x128xf32>
    %64 = vector.extract_strided_slice %62 {offsets = [1, 0], sizes = [24, 128], strides = [1, 1]} : vector<28x128xf32> to vector<24x128xf32>
    %65 = vector.extract_strided_slice %62 {offsets = [2, 0], sizes = [24, 128], strides = [1, 1]} : vector<28x128xf32> to vector<24x128xf32>
    %66 = vector.extract_strided_slice %62 {offsets = [3, 0], sizes = [24, 128], strides = [1, 1]} : vector<28x128xf32> to vector<24x128xf32>
    %67 = vector.extract_strided_slice %62 {offsets = [4, 0], sizes = [24, 128], strides = [1, 1]} : vector<28x128xf32> to vector<24x128xf32>
    %68 = tpu.concatenate %63, %64, %65, %66, %67 in 1 : vector<24x128xf32>, vector<24x128xf32>, vector<24x128xf32>, vector<24x128xf32>, vector<24x128xf32> -> vector<24x640xf32>
    %c0_24 = arith.constant 0 : index
    %c0_25 = arith.constant 0 : index
    %69 = vector.load %arg8[%c0_24, %c0_25] : memref<640x128xf32, #tpu.memory_space<vmem>>, vector<640x128xf32>
    %cst_26 = arith.constant dense<0.000000e+00> : vector<24x128xf32>
    %70 = tpu.matmul %68, %69, %cst_26 {dimension_numbers = #tpu.dot_dimension_numbers<[1], [0], [0], [1], [0, 0, 1, 1], [], []>} : vector<24x640xf32>, vector<640x128xf32>, vector<24x128xf32> -> vector<24x128xf32>
    %c0_27 = arith.constant 0 : index
    %c0_28 = arith.constant 0 : index
    %71 = vector.load %arg9[%c0_27, %c0_28] : memref<1x128xf32, #tpu.memory_space<vmem>>, vector<1x128xf32>
    %72 = vector.broadcast %71 : vector<1x128xf32> to vector<24x128xf32>
    %73 = arith.mulf %70, %72 : vector<24x128xf32>
    %c0_29 = arith.constant 0 : index
    %c0_30 = arith.constant 0 : index
    %74 = vector.load %arg10[%c0_29, %c0_30] : memref<1x128xf32, #tpu.memory_space<vmem>>, vector<1x128xf32>
    %75 = vector.broadcast %74 : vector<1x128xf32> to vector<24x128xf32>
    %76 = arith.addf %73, %75 : vector<24x128xf32>
    %cst_31 = arith.constant 0.000000e+00 : f32
    %77 = vector.broadcast %cst_31 : f32 to vector<24x128xf32>
    %78 = arith.maximumf %76, %77 : vector<24x128xf32>
    %79 = vector.extract_strided_slice %78 {offsets = [0, 0], sizes = [23, 128], strides = [1, 1]} : vector<24x128xf32> to vector<23x128xf32>
    %80 = vector.extract_strided_slice %78 {offsets = [1, 0], sizes = [23, 128], strides = [1, 1]} : vector<24x128xf32> to vector<23x128xf32>
    %81 = arith.maximumf %79, %80 : vector<23x128xf32>
    %82 = tpu.iota {dimensions = array<i32: 0>} : vector<12x23xi32>
    %83 = tpu.iota {dimensions = array<i32: 1>} : vector<12x23xi32>
    %c2_i32_32 = arith.constant 2 : i32
    %84 = vector.broadcast %c2_i32_32 : i32 to vector<12x23xi32>
    %85 = arith.muli %84, %82 : vector<12x23xi32>
    %86 = arith.cmpi eq, %83, %85 : vector<12x23xi32>
    %cst_33 = arith.constant 1.000000e+00 : f32
    %cst_34 = arith.constant 0.000000e+00 : f32
    %87 = vector.broadcast %cst_33 : f32 to vector<12x23xf32>
    %88 = vector.broadcast %cst_34 : f32 to vector<12x23xf32>
    %89 = arith.select %86, %87, %88 : vector<12x23xi1>, vector<12x23xf32>
    %cst_35 = arith.constant dense<0.000000e+00> : vector<12x128xf32>
    %90 = tpu.matmul %89, %81, %cst_35 {dimension_numbers = #tpu.dot_dimension_numbers<[1], [0], [0], [1], [0, 0, 1, 1], [], []>} : vector<12x23xf32>, vector<23x128xf32>, vector<12x128xf32> -> vector<12x128xf32>
    %91 = vector.extract_strided_slice %90 {offsets = [0, 0], sizes = [8, 128], strides = [1, 1]} : vector<12x128xf32> to vector<8x128xf32>
    %92 = vector.extract_strided_slice %90 {offsets = [1, 0], sizes = [8, 128], strides = [1, 1]} : vector<12x128xf32> to vector<8x128xf32>
    %93 = vector.extract_strided_slice %90 {offsets = [2, 0], sizes = [8, 128], strides = [1, 1]} : vector<12x128xf32> to vector<8x128xf32>
    %94 = vector.extract_strided_slice %90 {offsets = [3, 0], sizes = [8, 128], strides = [1, 1]} : vector<12x128xf32> to vector<8x128xf32>
    %95 = vector.extract_strided_slice %90 {offsets = [4, 0], sizes = [8, 128], strides = [1, 1]} : vector<12x128xf32> to vector<8x128xf32>
    %96 = tpu.concatenate %91, %92, %93, %94, %95 in 1 : vector<8x128xf32>, vector<8x128xf32>, vector<8x128xf32>, vector<8x128xf32>, vector<8x128xf32> -> vector<8x640xf32>
    %c0_36 = arith.constant 0 : index
    %c0_37 = arith.constant 0 : index
    %97 = vector.load %arg11[%c0_36, %c0_37] : memref<640x128xf32, #tpu.memory_space<vmem>>, vector<640x128xf32>
    %cst_38 = arith.constant dense<0.000000e+00> : vector<8x128xf32>
    %98 = tpu.matmul %96, %97, %cst_38 {dimension_numbers = #tpu.dot_dimension_numbers<[1], [0], [0], [1], [0, 0, 1, 1], [], []>} : vector<8x640xf32>, vector<640x128xf32>, vector<8x128xf32> -> vector<8x128xf32>
    %c0_39 = arith.constant 0 : index
    %c0_40 = arith.constant 0 : index
    %99 = vector.load %arg12[%c0_39, %c0_40] : memref<1x128xf32, #tpu.memory_space<vmem>>, vector<1x128xf32>
    %100 = vector.broadcast %99 : vector<1x128xf32> to vector<8x128xf32>
    %101 = arith.mulf %98, %100 : vector<8x128xf32>
    %c0_41 = arith.constant 0 : index
    %c0_42 = arith.constant 0 : index
    %102 = vector.load %arg13[%c0_41, %c0_42] : memref<1x128xf32, #tpu.memory_space<vmem>>, vector<1x128xf32>
    %103 = vector.broadcast %102 : vector<1x128xf32> to vector<8x128xf32>
    %104 = arith.addf %101, %103 : vector<8x128xf32>
    %cst_43 = arith.constant 0.000000e+00 : f32
    %105 = vector.broadcast %cst_43 : f32 to vector<8x128xf32>
    %106 = arith.maximumf %104, %105 : vector<8x128xf32>
    %107 = vector.extract_strided_slice %106 {offsets = [0, 0], sizes = [2, 128], strides = [1, 1]} : vector<8x128xf32> to vector<2x128xf32>
    %cst_44 = arith.constant dense<0xFF800000> : vector<128xf32>
    %108 = vector.multi_reduction <maximumf>, %107, %cst_44 [0] : vector<2x128xf32> to vector<128xf32>
    %109 = vector.shape_cast %108 : vector<128xf32> to vector<1x128xf32>
    %110 = vector.extract_strided_slice %106 {offsets = [2, 0], sizes = [2, 128], strides = [1, 1]} : vector<8x128xf32> to vector<2x128xf32>
    %cst_45 = arith.constant dense<0xFF800000> : vector<128xf32>
    %111 = vector.multi_reduction <maximumf>, %110, %cst_45 [0] : vector<2x128xf32> to vector<128xf32>
    %112 = vector.shape_cast %111 : vector<128xf32> to vector<1x128xf32>
    %113 = vector.extract_strided_slice %106 {offsets = [4, 0], sizes = [2, 128], strides = [1, 1]} : vector<8x128xf32> to vector<2x128xf32>
    %cst_46 = arith.constant dense<0xFF800000> : vector<128xf32>
    %114 = vector.multi_reduction <maximumf>, %113, %cst_46 [0] : vector<2x128xf32> to vector<128xf32>
    %115 = vector.shape_cast %114 : vector<128xf32> to vector<1x128xf32>
    %116 = vector.extract_strided_slice %106 {offsets = [6, 0], sizes = [2, 128], strides = [1, 1]} : vector<8x128xf32> to vector<2x128xf32>
    %cst_47 = arith.constant dense<0xFF800000> : vector<128xf32>
    %117 = vector.multi_reduction <maximumf>, %116, %cst_47 [0] : vector<2x128xf32> to vector<128xf32>
    %118 = vector.shape_cast %117 : vector<128xf32> to vector<1x128xf32>
    %119 = tpu.concatenate %109, %112, %115, %118 in 0 : vector<1x128xf32>, vector<1x128xf32>, vector<1x128xf32>, vector<1x128xf32> -> vector<4x128xf32>
    %c0_48 = arith.constant 0 : index
    %c0_49 = arith.constant 0 : index
    %c0_50 = arith.constant 0 : index
    %120 = vector.load %arg20[%c0_48, %c0_49, %c0_50] : memref<1x4x128xf32, #tpu.memory_space<vmem>>, vector<1x4x128xf32>
    %121 = vector.shape_cast %120 : vector<1x4x128xf32> to vector<4x128xf32>
    %122 = vector.shape_cast %119 : vector<4x128xf32> to vector<1x4x128xf32>
    tpu.vector_store %arg20[%c0_48, %c0_49, %c0_50], %122 {strides = array<i32>} : memref<1x4x128xf32, #tpu.memory_space<vmem>>, vector<1x4x128xf32>,
    %123 = vector.extract_strided_slice %119 {offsets = [0, 0], sizes = [1, 128], strides = [1, 1]} : vector<4x128xf32> to vector<1x128xf32>
    %124 = vector.extract_strided_slice %119 {offsets = [1, 0], sizes = [1, 128], strides = [1, 1]} : vector<4x128xf32> to vector<1x128xf32>
    %125 = vector.extract_strided_slice %119 {offsets = [2, 0], sizes = [1, 128], strides = [1, 1]} : vector<4x128xf32> to vector<1x128xf32>
    %126 = vector.extract_strided_slice %119 {offsets = [3, 0], sizes = [1, 128], strides = [1, 1]} : vector<4x128xf32> to vector<1x128xf32>
    %127 = tpu.concatenate %123, %124, %125, %126 in 1 : vector<1x128xf32>, vector<1x128xf32>, vector<1x128xf32>, vector<1x128xf32> -> vector<1x512xf32>
    %c0_51 = arith.constant 0 : index
    %c0_52 = arith.constant 0 : index
    %128 = vector.load %arg14[%c0_51, %c0_52] : memref<512x128xf32, #tpu.memory_space<vmem>>, vector<512x128xf32>
    %cst_53 = arith.constant dense<0.000000e+00> : vector<1x128xf32>
    %129 = tpu.matmul %127, %128, %cst_53 {dimension_numbers = #tpu.dot_dimension_numbers<[1], [0], [0], [1], [0, 0, 1, 1], [], []>} : vector<1x512xf32>, vector<512x128xf32>, vector<1x128xf32> -> vector<1x128xf32>
    %c0_54 = arith.constant 0 : index
    %c0_55 = arith.constant 0 : index
    %130 = vector.load %arg15[%c0_54, %c0_55] : memref<1x128xf32, #tpu.memory_space<vmem>>, vector<1x128xf32>
    %131 = arith.addf %129, %130 : vector<1x128xf32>
    %c0_56 = arith.constant 0 : index
    %c0_57 = arith.constant 0 : index
    %c0_58 = arith.constant 0 : index
    %132 = vector.load %arg21[%c0_56, %c0_57, %c0_58] : memref<1x1x128xf32, #tpu.memory_space<vmem>>, vector<1x1x128xf32>
    %133 = vector.shape_cast %132 : vector<1x1x128xf32> to vector<1x128xf32>
    %134 = vector.shape_cast %131 : vector<1x128xf32> to vector<1x1x128xf32>
    tpu.vector_store %arg21[%c0_56, %c0_57, %c0_58], %134 {strides = array<i32>} : memref<1x1x128xf32, #tpu.memory_space<vmem>>, vector<1x1x128xf32>,
    %c0_59 = arith.constant 0 : index
    %c0_60 = arith.constant 0 : index
    %135 = vector.load %arg16[%c0_59, %c0_60] : memref<512x128xf32, #tpu.memory_space<vmem>>, vector<512x128xf32>
    %cst_61 = arith.constant dense<0.000000e+00> : vector<1x128xf32>
    %136 = tpu.matmul %127, %135, %cst_61 {dimension_numbers = #tpu.dot_dimension_numbers<[1], [0], [0], [1], [0, 0, 1, 1], [], []>} : vector<1x512xf32>, vector<512x128xf32>, vector<1x128xf32> -> vector<1x128xf32>
    %c0_62 = arith.constant 0 : index
    %c0_63 = arith.constant 0 : index
    %137 = vector.load %arg17[%c0_62, %c0_63] : memref<1x128xf32, #tpu.memory_space<vmem>>, vector<1x128xf32>
    %138 = arith.addf %136, %137 : vector<1x128xf32>
    %cst_64 = arith.constant 0.000000e+00 : f32
    %139 = vector.broadcast %cst_64 : f32 to vector<1x128xf32>
    %140 = arith.maximumf %138, %139 : vector<1x128xf32>
    %c0_65 = arith.constant 0 : index
    %c0_66 = arith.constant 0 : index
    %141 = vector.load %arg18[%c0_65, %c0_66] : memref<128x128xf32, #tpu.memory_space<vmem>>, vector<128x128xf32>
    %cst_67 = arith.constant dense<0.000000e+00> : vector<1x128xf32>
    %142 = tpu.matmul %140, %141, %cst_67 {dimension_numbers = #tpu.dot_dimension_numbers<[1], [0], [0], [1], [0, 0, 1, 1], [], []>} : vector<1x128xf32>, vector<128x128xf32>, vector<1x128xf32> -> vector<1x128xf32>
    %c0_68 = arith.constant 0 : index
    %c0_69 = arith.constant 0 : index
    %143 = vector.load %arg19[%c0_68, %c0_69] : memref<1x128xf32, #tpu.memory_space<vmem>>, vector<1x128xf32>
    %144 = arith.addf %142, %143 : vector<1x128xf32>
    %c0_70 = arith.constant 0 : index
    %c0_71 = arith.constant 0 : index
    %c0_72 = arith.constant 0 : index
    %145 = vector.load %arg22[%c0_70, %c0_71, %c0_72] : memref<1x1x128xf32, #tpu.memory_space<vmem>>, vector<1x1x128xf32>
    %146 = vector.shape_cast %145 : vector<1x1x128xf32> to vector<1x128xf32>
    %147 = vector.shape_cast %144 : vector<1x128xf32> to vector<1x1x128xf32>
    tpu.vector_store %arg22[%c0_70, %c0_71, %c0_72], %147 {strides = array<i32>} : memref<1x1x128xf32, #tpu.memory_space<vmem>>, vector<1x1x128xf32>,
    return
  }
  func.func @transform_0(%arg0: i32) -> (i32, i32, i32) {
    %c0_i32 = arith.constant 0 : i32
    %c0_i32_0 = arith.constant 0 : i32
    %c0_i32_1 = arith.constant 0 : i32
    return %arg0, %c0_i32, %c0_i32_0 : i32, i32, i32
  }
  func.func @transform_1(%arg0: i32) -> (i32, i32) {
    %c0_i32 = arith.constant 0 : i32
    %c0_i32_0 = arith.constant 0 : i32
    %c0_i32_1 = arith.constant 0 : i32
    return %c0_i32, %c0_i32_0 : i32, i32
  }
  func.func @transform_2(%arg0: i32) -> (i32, i32) {
    %c0_i32 = arith.constant 0 : i32
    %c0_i32_0 = arith.constant 0 : i32
    %c0_i32_1 = arith.constant 0 : i32
    return %c0_i32, %c0_i32_0 : i32, i32
  }
  func.func @transform_3(%arg0: i32) -> (i32, i32) {
    %c0_i32 = arith.constant 0 : i32
    %c0_i32_0 = arith.constant 0 : i32
    %c0_i32_1 = arith.constant 0 : i32
    return %c0_i32, %c0_i32_0 : i32, i32
  }
  func.func @transform_4(%arg0: i32) -> (i32, i32) {
    %c0_i32 = arith.constant 0 : i32
    %c0_i32_0 = arith.constant 0 : i32
    %c0_i32_1 = arith.constant 0 : i32
    return %c0_i32, %c0_i32_0 : i32, i32
  }
  func.func @transform_5(%arg0: i32) -> (i32, i32) {
    %c0_i32 = arith.constant 0 : i32
    %c0_i32_0 = arith.constant 0 : i32
    %c0_i32_1 = arith.constant 0 : i32
    return %c0_i32, %c0_i32_0 : i32, i32
  }
  func.func @transform_6(%arg0: i32) -> (i32, i32) {
    %c0_i32 = arith.constant 0 : i32
    %c0_i32_0 = arith.constant 0 : i32
    %c0_i32_1 = arith.constant 0 : i32
    return %c0_i32, %c0_i32_0 : i32, i32
  }
  func.func @transform_7(%arg0: i32) -> (i32, i32) {
    %c0_i32 = arith.constant 0 : i32
    %c0_i32_0 = arith.constant 0 : i32
    %c0_i32_1 = arith.constant 0 : i32
    return %c0_i32, %c0_i32_0 : i32, i32
  }
  func.func @transform_8(%arg0: i32) -> (i32, i32) {
    %c0_i32 = arith.constant 0 : i32
    %c0_i32_0 = arith.constant 0 : i32
    %c0_i32_1 = arith.constant 0 : i32
    return %c0_i32, %c0_i32_0 : i32, i32
  }
  func.func @transform_9(%arg0: i32) -> (i32, i32) {
    %c0_i32 = arith.constant 0 : i32
    %c0_i32_0 = arith.constant 0 : i32
    %c0_i32_1 = arith.constant 0 : i32
    return %c0_i32, %c0_i32_0 : i32, i32
  }
  func.func @transform_10(%arg0: i32) -> (i32, i32) {
    %c0_i32 = arith.constant 0 : i32
    %c0_i32_0 = arith.constant 0 : i32
    %c0_i32_1 = arith.constant 0 : i32
    return %c0_i32, %c0_i32_0 : i32, i32
  }
  func.func @transform_11(%arg0: i32) -> (i32, i32) {
    %c0_i32 = arith.constant 0 : i32
    %c0_i32_0 = arith.constant 0 : i32
    %c0_i32_1 = arith.constant 0 : i32
    return %c0_i32, %c0_i32_0 : i32, i32
  }
  func.func @transform_12(%arg0: i32) -> (i32, i32) {
    %c0_i32 = arith.constant 0 : i32
    %c0_i32_0 = arith.constant 0 : i32
    %c0_i32_1 = arith.constant 0 : i32
    return %c0_i32, %c0_i32_0 : i32, i32
  }
  func.func @transform_13(%arg0: i32) -> (i32, i32) {
    %c0_i32 = arith.constant 0 : i32
    %c0_i32_0 = arith.constant 0 : i32
    %c0_i32_1 = arith.constant 0 : i32
    return %c0_i32, %c0_i32_0 : i32, i32
  }
  func.func @transform_14(%arg0: i32) -> (i32, i32) {
    %c0_i32 = arith.constant 0 : i32
    %c0_i32_0 = arith.constant 0 : i32
    %c0_i32_1 = arith.constant 0 : i32
    return %c0_i32, %c0_i32_0 : i32, i32
  }
  func.func @transform_15(%arg0: i32) -> (i32, i32) {
    %c0_i32 = arith.constant 0 : i32
    %c0_i32_0 = arith.constant 0 : i32
    %c0_i32_1 = arith.constant 0 : i32
    return %c0_i32, %c0_i32_0 : i32, i32
  }
  func.func @transform_16(%arg0: i32) -> (i32, i32) {
    %c0_i32 = arith.constant 0 : i32
    %c0_i32_0 = arith.constant 0 : i32
    %c0_i32_1 = arith.constant 0 : i32
    return %c0_i32, %c0_i32_0 : i32, i32
  }
  func.func @transform_17(%arg0: i32) -> (i32, i32) {
    %c0_i32 = arith.constant 0 : i32
    %c0_i32_0 = arith.constant 0 : i32
    %c0_i32_1 = arith.constant 0 : i32
    return %c0_i32, %c0_i32_0 : i32, i32
  }
  func.func @transform_18(%arg0: i32) -> (i32, i32) {
    %c0_i32 = arith.constant 0 : i32
    %c0_i32_0 = arith.constant 0 : i32
    %c0_i32_1 = arith.constant 0 : i32
    return %c0_i32, %c0_i32_0 : i32, i32
  }
  func.func @transform_19(%arg0: i32) -> (i32, i32, i32) {
    %c0_i32 = arith.constant 0 : i32
    %c0_i32_0 = arith.constant 0 : i32
    %c0_i32_1 = arith.constant 0 : i32
    return %arg0, %c0_i32, %c0_i32_0 : i32, i32, i32
  }
  func.func @transform_20(%arg0: i32) -> (i32, i32, i32) {
    %c0_i32 = arith.constant 0 : i32
    %c0_i32_0 = arith.constant 0 : i32
    %c0_i32_1 = arith.constant 0 : i32
    return %arg0, %c0_i32, %c0_i32_0 : i32, i32, i32
  }
  func.func @transform_21(%arg0: i32) -> (i32, i32, i32) {
    %c0_i32 = arith.constant 0 : i32
    %c0_i32_0 = arith.constant 0 : i32
    %c0_i32_1 = arith.constant 0 : i32
    return %arg0, %c0_i32, %c0_i32_0 : i32, i32, i32
  }
}

</mosaic_0001>

<bundles_post_ra>
// kernel: cnn_1dfea_forward.1
= control target key start
LH: loop header
LB: loop body
LE: loop exit
PB: predicated region body
PF: predicated region fallthrough
CT: control target
= control target key end

     0   :  { %s8937_s0 = inlined_call_operand.vmem [shape: f32[2,142,64], index: 0, kind: input, shape index: {}]   ;;  %s8938_s1 = inlined_call_operand.vmem [shape: f32[64,128], index: 1, kind: input, shape index: {}]   ;;  %s8939_s2 = inlined_call_operand.vmem [shape: f32[1,128], index: 2, kind: input, shape index: {}]   ;;  %s8940_s3 = inlined_call_operand.vmem [shape: f32[1,128], index: 3, kind: input, shape index: {}]   ;;  %s8941_s4 = inlined_call_operand.vmem [shape: f32[2048,128], index: 4, kind: input, shape index: {}]   ;;  %s8942_s5 = inlined_call_operand.vmem [shape: f32[1,128], index: 5, kind: input, shape index: {}]   ;;  %s8943_s6 = inlined_call_operand.vmem [shape: f32[1,128], index: 6, kind: input, shape index: {}]   ;;  %s8944_s7 = inlined_call_operand.vmem [shape: f32[640,128], index: 7, kind: input, shape index: {}]   ;;  %s8945_s8 = inlined_call_operand.vmem [shape: f32[1,128], index: 8, kind: input, shape index: {}]   ;;  %s8946_s9 = inlined_call_operand.vmem [shape: f32[1,128], index: 9, kind: input, shape index: {}]   ;;  %s8947_s10 = inlined_call_operand.vmem [shape: f32[640,128], index: 10, kind: input, shape index: {}]   ;;  %s8948_s11 = inlined_call_operand.vmem [shape: f32[1,128], index: 11, kind: input, shape index: {}]   ;;  %s8949_s12 = inlined_call_operand.vmem [shape: f32[1,128], index: 12, kind: input, shape index: {}]   ;;  %s8950_s13 = inlined_call_operand.vmem [shape: f32[512,128], index: 13, kind: input, shape index: {}]   ;;  %s8951_s14 = inlined_call_operand.vmem [shape: f32[1,128], index: 14, kind: input, shape index: {}]   ;;  %s8952_s15 = inlined_call_operand.vmem [shape: f32[512,128], index: 15, kind: input, shape index: {}]   ;;  %s8953_s16 = inlined_call_operand.vmem [shape: f32[1,128], index: 16, kind: input, shape index: {}]   ;;  %s8954_s17 = inlined_call_operand.vmem [shape: f32[128,128], index: 17, kind: input, shape index: {}]   ;;  %s8955_s18 = inlined_call_operand.vmem [shape: f32[1,128], index: 18, kind: input, shape index: {}]   ;;  %s8956_s19 = inlined_call_operand.vmem [shape: f32[2,4,128], index: 19, kind: output, shape index: {0}]   ;;  %s8957_s20 = inlined_call_operand.vmem [shape: f32[2,1,128], index: 20, kind: output, shape index: {1}]   ;;  %s8958_s21 = inlined_call_operand.hbm [shape: f32[2,1,128], index: 21, kind: output, shape index: {2}]  }
   0x1   :  { %9016 = sst [smem:[#allocation47_spill]] %s8937_s0 }
   0x2   :  { %9017 = sst [smem:[#allocation48_spill]] %s8938_s1 }
   0x3   :  { %9018 = sst [smem:[#allocation49_spill]] %s8939_s2 }
   0x4   :  { %9019 = sst [smem:[#allocation50_spill]] %s8940_s3 }
   0x5   :  { %9020 = sst [smem:[#allocation51_spill]] %s8941_s4 }
   0x6   :  { %9021 = sst [smem:[#allocation52_spill]] %s8942_s5 }
   0x7   :  { %9022 = sst [smem:[#allocation53_spill]] %s8955_s18 }
   0x8   :  { %9023 = sst [smem:[#allocation54_spill]] %s8958_s21 }
   0x9   :  { %27 = vsyncpa [#allocation3], 0 }
   0xa   :  { %29 = vsyncpa [#allocation3 + $0x1], 0  ;;  %s6082_s2 = smov 0   ;;  %s6084_s25 = smov 0  }
   0xb   :  { %s6086_s26 = smov 0   ;;  %s6088_s27 = smov 0  }
   0xc LB: > { %9024 = sst [smem:[#allocation5_spill]] %s5952_s2  ;;  %s6103_s3 = sadd.s32 4294967295, %s5964_s27   ;;  %s5964_s27 = sphi %s6088_s27, %s9237_s27   ;;  %s5960_s26 = sphi %s6086_s26, %s9239_s26   ;;  %s5956_s25 = sphi %s6084_s25, %s9241_s25   ;;  %s5952_s2 = sphi %s6082_s2, %s9240_s2  }
   0xd   : > { %9025 = sst [smem:[#allocation6_spill]] %s5960_s26  ;;  %s4157_s28 = sadd.s32 4294967294, %s5964_s27  }
   0xe   : > { %9026 = sst [smem:[#allocation7_spill]] %s5964_s27  ;;  %s6107_s29 = sadd.s32 1, %s5964_s27  }
   0xf   : > { %9027 = sst [smem:[#allocation8_spill]] %s6107_s29  ;;  %s498_s0 = sadd.s32 1, %s5960_s26 }
  0x10   : > { %s495_s4 = ssub.s32 %s5964_s27, %s6107_s29  ;;  %p508_p0 = scmp.ne.s32.totalorder %s5960_s26, %s5956_s25 }
  0x11   : > { %p496_p1 = scmp.eq.s32.totalorder %s495_s4, 0  ;;  %p509_p2 = scmp.eq.s32.totalorder %s6103_s3, 1 }
  0x12   : > { %p514_p3 = scmp.ne.s32.totalorder %s5956_s25, %s5952_s2  ;;  %p515_p4 = scmp.eq.s32.totalorder %s4157_s28, 1 }
  0x13   : > { %s6118_s30 = scalar_select %p496_p1, %s5960_s26, %s498_s0  }
  0x14   : > { %p6120_p5 = por %p509_p2, %p508_p0  ;;  %p6124_p6 = por %p515_p4, %p514_p3 }
  0x15   : > { %9028 = sst [smem:[#allocation9_spill]] %s6118_s30  ;;  %p4160_p7 = scmp.ge.s32.totalorder %s5964_s27, 1 }
  0x16   : > { %s9030_s22 = scalar_select %p6124_p6, 1, 0 }
  0x17   : > { %p595_p8 = scmp.lt.s32.totalorder %s5964_s27, 3 }
  0x18   : > { %9031 = sst [smem:[#allocation10_spill]] %s9030_s22 }
  0x19   : > { %p596_p9 = pnand %p4160_p7, %p595_p8 }
  0x1b   : > { %599 = sbr.rel (%p596_p9) target bundleno = 2372 (0x944), region = 96 }
  0x22   : > { %s9032_s24 = sld [smem:[#allocation48_spill]]  ;;  %p661_p10 = scmp.lt.s32.totalorder %s6103_s3, 1  ;;  %vm699_vm0 = vcmask 523264   ;;  %v8971_v30 = vmov 0.0|0.0   ;;  %v1067_v31 = vlaneseq  ;;  %vm8966_vm2 = vcmask 105472  }
  0x23   : > { %s9033_s23 = sld [smem:[#allocation47_spill]]  ;;  %5229 = vmatprep.subr.bf16.mxu1 %v8971_v30  ;;  %v9034_v36 = vmov 0  ;;  %v8973_v37 = vmov 0.0   ;;  %v9039_v43 = vmov 0  ;;  %v9044_v46 = vmov 0  ;;  %s9072_s29 = sld [smem:[#allocation51_spill]] }
  0x24   : > { %s6150_s28 = scalar_select %p661_p10, %s6103_s3, 1  ;;  %v1068_v32 = vshrl.u32 %v1067_v31, 7  ;;  %v1078_v33 = vand.u32 127, %v1067_v31  ;;  %v9049_v50 = vmov 0  ;;  %v9058_v58 = vmov 0 }
  0x25   : > { %s9074_s22 = sld [smem:[#allocation50_spill]]  ;;  %v5969_v42 = vmov 1.0   ;;  %s659_s21 = sand.u32 1, %s5956_s25  }
  0x26   : > { %s5857_s30 = smul.u32 144, %s6150_s28  ;;  %v1079_v34 = vadd.s32 128, %v1078_v33  ;;  %v1080_v35 = vmul.u32 2, %v1068_v32  ;;  %v1069_v39 = vadd.s32 8, %v1068_v32  ;;  %v1070_v41 = vadd.s32 16, %v1068_v32  ;;  %s4162_s0 = sshll.u32 %s6150_s28, 2 }
  0x27   : > { %v1071_v47 = vadd.s32 24, %v1068_v32  ;;  %v1072_v51 = vadd.s32 32, %v1068_v32  ;;  %v1073_v55 = vadd.s32 40, %v1068_v32  ;;  %v1074_v59 = vadd.s32 48, %v1068_v32  ;;  %s669_s27 = scalar_lea.vmem %s8956_s19, %s4162_s0  ;;  %s4216_s26 = sshll.u32 %s6103_s3, 4 }
  0x28   : > { %v691_v0 = vld [vmem:[%s9032_s24] sm:$0xff]  ;;  %v692_v1 = vld [vmem:[%s9032_s24 + $0x8] sm:$0xff]  ;;  %v693_v2 = vld [vmem:[%s9032_s24 + $0x10] sm:$0xff]  ;;  %vm1090_vm1 = vcmp.eq.s32.totalorder %v1079_v34, %v1080_v35  ;;  %vm6201_vm3 = vcmp.eq.s32.totalorder %v1078_v33, %v1080_v35  ;;  %v1081_v40 = vmul.u32 2, %v1069_v39  ;;  %v1082_v44 = vmul.u32 2, %v1070_v41  ;;  %s9232_s2 = sld [smem:[#allocation54_spill]] }
  0x29   : > { %v5213_v3 = vpack.c.bf16 %v692_v1, %v691_v0  ;;  %v694_v4 = vld [vmem:[%s9032_s24 + $0x18] sm:$0xff]  ;;  %v695_v6 = vld [vmem:[%s9032_s24 + $0x20] sm:$0xff]  ;;  %v696_v7 = vld [vmem:[%s9032_s24 + $0x28] sm:$0xff]  ;;  %s6162_s1 = scalar_lea.vmem %s9033_s23, %s5857_s30  ;;  %v9035_v36 = vsel %vm6201_vm3, 4294967295, %v9034_v36  ;;  %v1108_v38 = vsel %vm1090_vm1, 1.0, %v8973_v37  ;;  %v1083_v48 = vmul.u32 2, %v1071_v47  ;;  %s672_s23 = scalar_lea.vmem %s8957_s20, %s6150_s28 }
  0x2a   : > { %v5217_v5 = vpack.c.bf16 %v694_v4, %v693_v2  ;;  %v5221_v8 = vpack.c.bf16 %v696_v7, %v695_v6  ;;  %v697_v9 = vld [vmem:[%s9032_s24 + $0x30] sm:$0xff]  ;;  %v698_v10 = vld [vmem:[%s9032_s24 + $0x38] sm:$0xff]  ;;  %v673_v11 = vld [vmem:[%s6162_s1] sm:$0xff]  ;;  %9036 = vst [vmem:[#allocation11_spill] sm:$0xff] %v9035_v36  ;;  %4184 = vmatprep.mubr.msk.f32.mxu1 %vm8966_vm2, %v1108_v38  ;;  %vm6207_vm4 = vcmp.eq.s32.totalorder %v1079_v34, %v1081_v40  ;;  %v1084_v52 = vmul.u32 2, %v1072_v51  ;;  %s9073_s30 = sld [smem:[#allocation49_spill]] }
  0x2b   : > { %5214 = vmatprep.subr.bf16.mxu0 %v5213_v3  ;;  %5046 = vmatprep.mubr.msk.f32.mxu0 %vm699_vm0, %v673_v11  ;;  %v5225_v12 = vpack.c.bf16 %v698_v10, %v697_v9  ;;  %v674_v13 = vld [vmem:[%s6162_s1 + $0x8] sm:$0xff]  ;;  %v675_v14 = vld [vmem:[%s6162_s1 + $0x10] sm:$0xff]  ;;  %v676_v15 = vld [vmem:[%s6162_s1 + $0x18] sm:$0xff]  ;;  %vm6211_vm5 = vcmp.eq.s32.totalorder %v1078_v33, %v1081_v40  ;;  %vm6215_vm6 = vcmp.eq.s32.totalorder %v1079_v34, %v1082_v44  ;;  %v1085_v56 = vmul.u32 2, %v1073_v55  ;;  %s9212_s24 = sld [smem:[#allocation52_spill]]  ;;  %s5971_s3 = smov [#allocation2]  }
  0x2c   : > { %5216 = vmatpush3.bf16.msra.mxu0 %v5213_v3  ;;  %v677_v16 = vld [vmem:[%s6162_s1 + $0x20] sm:$0xff]  ;;  %v678_v17 = vld [vmem:[%s6162_s1 + $0x28] sm:$0xff]  ;;  %v679_v18 = vld [vmem:[%s6162_s1 + $0x30] sm:$0xff]  ;;  %v9040_v43 = vsel %vm6211_vm5, 4294967295, %v9039_v43  ;;  %vm6219_vm7 = vcmp.eq.s32.totalorder %v1078_v33, %v1082_v44  ;;  %vm6223_vm8 = vcmp.eq.s32.totalorder %v1079_v34, %v1083_v48  ;;  %vm6227_vm9 = vcmp.eq.s32.totalorder %v1078_v33, %v1083_v48 }
  0x2d   : > { %5218 = vmatprep.subr.bf16.mxu0 %v5217_v5  ;;  %v680_v19 = vld [vmem:[%s6162_s1 + $0x38] sm:$0xff]  ;;  %v681_v20 = vld [vmem:[%s6162_s1 + $0x40] sm:$0xff]  ;;  %v682_v21 = vld [vmem:[%s6162_s1 + $0x48] sm:$0xff]  ;;  %9041 = vst [vmem:[#allocation12_spill] sm:$0xff] %v9040_v43  ;;  %v9045_v46 = vsel %vm6219_vm7, 4294967295, %v9044_v46  ;;  %v9050_v50 = vsel %vm6227_vm9, 4294967295, %v9049_v50  ;;  %vm6231_vm10 = vcmp.eq.s32.totalorder %v1079_v34, %v1084_v52  ;;  %vm6235_vm11 = vcmp.eq.s32.totalorder %v1078_v33, %v1084_v52 }
  0x2e   : > { %v683_v22 = vld [vmem:[%s6162_s1 + $0x50] sm:$0xff]  ;;  %v684_v23 = vld [vmem:[%s6162_s1 + $0x58] sm:$0xff]  ;;  %v685_v24 = vld [vmem:[%s6162_s1 + $0x60] sm:$0xff]  ;;  %9046 = vst [vmem:[#allocation13_spill] sm:$0xff] %v9045_v46  ;;  %vm6239_vm12 = vcmp.eq.s32.totalorder %v1079_v34, %v1085_v56  ;;  %vm6243_vm13 = vcmp.eq.s32.totalorder %v1078_v33, %v1085_v56  ;;  %v1086_v60 = vmul.u32 2, %v1074_v59  ;;  %v1075_v63 = vadd.s32 56, %v1068_v32  ;;  %s8895_s18 = scalar_lea.hbm %s9232_s2, %s4216_s26 }
  0x2f   : > { %v686_v25 = vld [vmem:[%s6162_s1 + $0x68] sm:$0xff]  ;;  %v687_v26 = vld [vmem:[%s6162_s1 + $0x70] sm:$0xff]  ;;  %v688_v27 = vld [vmem:[%s6162_s1 + $0x78] sm:$0xff]  ;;  %9051 = vst [vmem:[#allocation14_spill] sm:$0xff] %v9050_v50  ;;  %v9059_v58 = vsel %vm6243_vm13, 4294967295, %v9058_v58  ;;  %v9066_v2 = vmov 0 }
  0x30   : > { %5220 = vmatpush3.bf16.msra.mxu0 %v5217_v5  ;;  %v689_v28 = vld [vmem:[%s6162_s1 + $0x80] sm:$0xff]  ;;  %v690_v29 = vld [vmem:[%s6162_s1 + $0x88] sm:$0x3f]  ;;  %vm6247_vm14 = vcmp.eq.s32.totalorder %v1079_v34, %v1086_v60  ;;  %vm6251_vm15 = vcmp.eq.s32.totalorder %v1078_v33, %v1086_v60  ;;  %v1087_v0 = vmul.u32 2, %v1075_v63  ;;  %v1076_v3 = vadd.s32 64, %v1068_v32  ;;  %v1482_v39 = vld [vmem:[%s9072_s29 + $0xd0] sm:$0xff] }
  0x31   : > { %5222 = vmatprep.subr.bf16.mxu0 %v5221_v8  ;;  %v9068_v5 = vmov 0  ;;  %v9070_v6 = vmov 0  ;;  %v1472_v7 = vld [vmem:[%s9072_s29 + $0x80] sm:$0xff]  ;;  %v1457_v11 = vld [vmem:[%s9072_s29 + $0x8] sm:$0xff]  ;;  %v1483_v40 = vld [vmem:[%s9072_s29 + $0xd8] sm:$0xff]  ;;  %v1120_v57 = vsel %vm6247_vm14, 1.0, %v8973_v37 }
  0x32   : > { %vm6259_vm1 = vcmp.eq.s32.totalorder %v1078_v33, %v1087_v0  ;;  %v1088_v4 = vmul.u32 2, %v1076_v3  ;;  %v1456_v10 = vld [vmem:[%s9072_s29] sm:$0xff]  ;;  %v1481_v32 = vld [vmem:[%s9072_s29 + $0xc8] sm:$0xff]  ;;  %v5277_v44 = vpack.c.bf16 %v1483_v40, %v1482_v39  ;;  %v1466_v47 = vld [vmem:[%s9072_s29 + $0x50] sm:$0xff]  ;;  %s4041_s1 = scalar_lea.sflag [#allocation3], %s659_s21 }
  0x33   : > { %v9067_v2 = vsel %vm6259_vm1, 4294967295, %v9066_v2  ;;  %v1480_v31 = vld [vmem:[%s9072_s29 + $0xc0] sm:$0xff]  ;;  %v1465_v38 = vld [vmem:[%s9072_s29 + $0x48] sm:$0xff]  ;;  %v1467_v48 = vld [vmem:[%s9072_s29 + $0x58] sm:$0xff]  ;;  %vm1153_vm1 = vcmask 1044480  }
  0x34   : > { %5224 = vmatpush3.bf16.msra.mxu0 %v5221_v8  ;;  %vm6263_vm2 = vcmp.eq.s32.totalorder %v1079_v34, %v1088_v4  ;;  %vm6267_vm13 = vcmp.eq.s32.totalorder %v1078_v33, %v1088_v4  ;;  %v1473_v8 = vld [vmem:[%s9072_s29 + $0x88] sm:$0xff]  ;;  %v1464_v35 = vld [vmem:[%s9072_s29 + $0x40] sm:$0xff]  ;;  %v5279_v51 = vpack.c.bf16 %v1467_v48, %v1466_v47  ;;  %vm9084_vm14 = vnez %v9067_v2  ;;  %v6914_v50 = vld [vmem:[%s9072_s29 + $0x270] sm:$0xff] }
  0x35   : > { %5226 = vmatprep.subr.bf16.mxu0 %v5225_v12  ;;  %v9069_v5 = vsel %vm6263_vm2, 4294967295, %v9068_v5  ;;  %v9071_v6 = vsel %vm6267_vm13, 4294967295, %v9070_v6  ;;  %v5257_v9 = vpack.c.bf16 %v1473_v8, %v1472_v7  ;;  %v5275_v41 = vpack.c.bf16 %v1465_v38, %v1464_v35  ;;  %v6346_v52 = vld [vmem:[%s9073_s30] ss:$0 sm:$0xff]  ;;  %v1485_v62 = vld [vmem:[%s9072_s29 + $0xe8] sm:$0xff]  ;;  %9103 = vst [vmem:[#allocation32_spill] sm:$0xff] %v6914_v50 }
  0x36   : > { %v6351_v56 = vld [vmem:[%s9074_s22] ss:$0 sm:$0xff]  ;;  %vm8969_vm13 = vcmask 1046528   ;;  %v1517_v2 = vld [vmem:[%s9072_s29 + $0x1e8] sm:$0xff]  ;;  %v6919_v46 = vld [vmem:[%s9072_s29 + $0x278] sm:$0xff]  ;;  %s9231_s30 = sld [smem:[#allocation53_spill]] }
  0x37   : > { %v1516_v1 = vld [vmem:[%s9072_s29 + $0x1e0] sm:$0xff]  ;;  %9104 = vst [vmem:[#allocation33_spill] sm:$0xff] %v6919_v46  ;;  %s660_s22 = scalar_lea.vmem [#allocation2], %s659_s21 }
  0x38   : > { %5228 = vmatpush3.bf16.msra.mxu0 %v5225_v12  ;;  %v5259_v12 = vpack.c.bf16 %v1457_v11, %v1456_v10  ;;  %s4059_s4 = sshll.u32 %s660_s22, 4  ;;  %s8897_s4 = int_to_ptr.vmem [resolvable:$true] %s4059_s4 }
  0x39   : > { %5258 = vmatprep.subr.bf16.mxu0 %v5257_v9  ;;  %s5902_s28 = scalar_lea.vmem %s8897_s4, 16 }
  0x3a   : > { %p5903_p11 = scmp.ne.s32.totalorder %s8897_s4, %s5902_s28 }
  0x3b   : > { %5047 = vmatmul.mubr.msk.f32.vlgmr.msra.gmra.mrb[0].mxu0 %vm699_vm0, %v674_v13  ;;  %v1474_v13 = vld [vmem:[%s9072_s29 + $0x90] sm:$0xff] }
  0x3c   : > { %5049 = vmatprep.mubr.msk.f32.mxu0 %vm699_vm0, %v675_v14  ;;  %v1475_v14 = vld [vmem:[%s9072_s29 + $0x98] sm:$0xff]  ;;  %5260 = vmatpush3.bf16.msra.mxu0 %v5259_v12  ;;  %p5904_p12 = pnand %p5903_p11, %p6120_p5 }
  0x3e   : > { %p5905_p13 = pneg %p5904_p12 }
  0x3f   : > { %5050 = vmatmul.mubr.msk.f32.gmra.mrb[2].mxu0 %vm699_vm0, %v676_v15  ;;  %v5261_v15 = vpack.c.bf16 %v1475_v14, %v1474_v13 }
  0x40   : > { %5052 = vmatprep.mubr.msk.f32.mxu0 %vm699_vm0, %v677_v16  ;;  %v1458_v16 = vld [vmem:[%s9072_s29 + $0x10] sm:$0xff] }
  0x41   : > { %5262 = vmatprep.subr.bf16.mxu0 %v5261_v15 }
  0x43   : > { %5053 = vmatmul.mubr.msk.f32.gmra.mrb[4].mxu0 %vm699_vm0, %v678_v17  ;;  %v1459_v17 = vld [vmem:[%s9072_s29 + $0x18] sm:$0xff] }
  0x44   : > { %5055 = vmatprep.mubr.msk.f32.mxu0 %vm699_vm0, %v679_v18  ;;  %v5263_v18 = vpack.c.bf16 %v1459_v17, %v1458_v16 }
  0x46   : > { %5264 = vmatpush3.bf16.msra.mxu0 %v5263_v18 }
  0x47   : > { %5056 = vmatmul.mubr.msk.f32.gmra.mrb[6].mxu0 %vm699_vm0, %v680_v19  ;;  %v1476_v19 = vld [vmem:[%s9072_s29 + $0xa0] sm:$0xff] }
  0x48   : > { %5058 = vmatprep.mubr.msk.f32.mxu0 %vm699_vm0, %v681_v20  ;;  %v1477_v20 = vld [vmem:[%s9072_s29 + $0xa8] sm:$0xff] }
  0x4b   : > { %5059 = vmatmul.mubr.msk.f32.gmra.mrb[8].mxu0 %vm699_vm0, %v682_v21  ;;  %v5265_v21 = vpack.c.bf16 %v1477_v20, %v1476_v19 }
  0x4c   : > { %5061 = vmatprep.mubr.msk.f32.mxu0 %vm699_vm0, %v683_v22  ;;  %v1460_v22 = vld [vmem:[%s9072_s29 + $0x20] sm:$0xff] }
  0x4d   : > { %5266 = vmatprep.subr.bf16.mxu0 %v5265_v21 }
  0x4f   : > { %5062 = vmatmul.mubr.msk.f32.gmra.mrb[10].mxu0 %vm699_vm0, %v684_v23  ;;  %v1461_v23 = vld [vmem:[%s9072_s29 + $0x28] sm:$0xff] }
  0x50   : > { %5064 = vmatprep.mubr.msk.f32.mxu0 %vm699_vm0, %v685_v24  ;;  %v5267_v24 = vpack.c.bf16 %v1461_v23, %v1460_v22 }
  0x52   : > { %5268 = vmatpush3.bf16.msra.mxu0 %v5267_v24 }
  0x53   : > { %5065 = vmatmul.mubr.msk.f32.gmra.mrb[12].mxu0 %vm699_vm0, %v686_v25  ;;  %v1478_v25 = vld [vmem:[%s9072_s29 + $0xb0] sm:$0xff] }
  0x54   : > { %5067 = vmatprep.mubr.msk.f32.mxu0 %vm699_vm0, %v687_v26  ;;  %v1479_v26 = vld [vmem:[%s9072_s29 + $0xb8] sm:$0xff] }
  0x57   : > { %5068 = vmatmul.mubr.msk.f32.gmra.mrb[14].mxu0 %vm699_vm0, %v688_v27  ;;  %v5269_v27 = vpack.c.bf16 %v1479_v26, %v1478_v25 }
  0x58   : > { %5070 = vmatprep.mubr.msk.f32.mxu0 %vm699_vm0, %v689_v28  ;;  %v1462_v28 = vld [vmem:[%s9072_s29 + $0x30] sm:$0xff] }
  0x59   : > { %5270 = vmatprep.subr.bf16.mxu0 %v5269_v27 }
  0x5b   : > { %5071 = vmatmul.mubr.msk.f32.gmra.mrb[16].mxu0 %vm699_vm0, %v690_v29  ;;  %vm6255_vm0 = vcmp.eq.s32.totalorder %v1079_v34, %v1087_v0  ;;  %v1463_v29 = vld [vmem:[%s9072_s29 + $0x38] sm:$0xff]  ;;  %v5273_v34 = vpack.c.bf16 %v1481_v32, %v1480_v31 }
  0x5c   : > { %v5271_v33 = vpack.c.bf16 %v1463_v29, %v1462_v28  ;;  %v1122_v54 = vsel %vm6255_vm0, 1.0, %v8973_v37  ;;  %vm1365_vm0 = vcmask 1042432  }
  0x5e   : > { %5272 = vmatpush3.bf16.msra.mxu0 %v5271_v33 }
  0x5f   : > { %5274 = vmatprep.subr.bf16.mxu0 %v5273_v34 }
  0x62   : > { %5276 = vmatpush3.bf16.msra.mxu0 %v5275_v41 }
  0x63   : > { %5278 = vmatprep.subr.bf16.mxu0 %v5277_v44 }
  0x66   : > { %5280 = vmatpush3.bf16.msra.mxu0 %v5279_v51 }
 0x10e   : > { %v5048_v55 = vpop.f32.mrb[0].mxu0 }
 0x10f   : > { %v917_v59 = vmul.f32 %v5048_v55, %v6346_v52  ;;  %v820_v60 = vpop.f32.mrb[1].mxu0 }
 0x110   : > { %v916_v63 = vmul.f32 %v6346_v52, %v820_v60 }
 0x111   : > { %v942_v0 = vadd.f32 %v6351_v56, %v917_v59 }
 0x112   : > { %v941_v3 = vadd.f32 %v6351_v56, %v916_v63  ;;  %v5051_v4 = vpop.f32.mrb[2].mxu0 }
 0x113   : > { %v960_v7 = vmax.f32 %v942_v0, 0.0  ;;  %v919_v8 = vmul.f32 %v5051_v4, %v6346_v52  ;;  %v830_v9 = vpop.f32.mrb[3].mxu0 }
 0x114   : > { %v959_v10 = vmax.f32 %v941_v3, 0.0  ;;  %v918_v11 = vmul.f32 %v6346_v52, %v830_v9 }
 0x115   : > { %v997_v12 = vrot.slane %v960_v7, 1  ;;  %v944_v13 = vadd.f32 %v6351_v56, %v919_v8 }
 0x116   : > { %v996_v14 = vrot.slane %v959_v10, 1  ;;  %v943_v15 = vadd.f32 %v6351_v56, %v918_v11  ;;  %v5054_v16 = vpop.f32.mrb[4].mxu0 }
 0x117   : > { %v962_v17 = vmax.f32 %v944_v13, 0.0  ;;  %v921_v18 = vmul.f32 %v5054_v16, %v6346_v52  ;;  %v840_v19 = vpop.f32.mrb[5].mxu0 }
 0x118   : > { %v961_v20 = vmax.f32 %v943_v15, 0.0  ;;  %v920_v21 = vmul.f32 %v6346_v52, %v840_v19  ;;  %v998_v22 = vsel %vm8969_vm13, %v996_v14, %v997_v12 }
 0x119   : > { %v1001_v23 = vrot.slane %v962_v17, 1  ;;  %v946_v24 = vadd.f32 %v6351_v56, %v921_v18  ;;  %v1049_v25 = vmax.f32 %v959_v10, %v998_v22 }
 0x11a   : > { %v999_v26 = vrot.slane %v961_v20, 1  ;;  %v945_v27 = vadd.f32 %v6351_v56, %v920_v21  ;;  %v5057_v28 = vpop.f32.mrb[6].mxu0 }
 0x11b   : > { %v964_v29 = vmax.f32 %v946_v24, 0.0  ;;  %v923_v31 = vmul.f32 %v5057_v28, %v6346_v52  ;;  %v850_v32 = vpop.f32.mrb[7].mxu0 }
 0x11c   : > { %v1002_v33 = vsel %vm8969_vm13, %v999_v26, %v1001_v23  ;;  %v963_v34 = vmax.f32 %v945_v27, 0.0  ;;  %v922_v35 = vmul.f32 %v6346_v52, %v850_v32  ;;  %v1000_v38 = vsel %vm8969_vm13, %v997_v12, %v999_v26 }
 0x11d   : > { %v1051_v39 = vmax.f32 %v961_v20, %v1002_v33  ;;  %v1005_v40 = vrot.slane %v964_v29, 1  ;;  %v948_v41 = vadd.f32 %v6351_v56, %v923_v31  ;;  %v1050_v44 = vmax.f32 %v960_v7, %v1000_v38 }
 0x11e   : > { %v1003_v47 = vrot.slane %v963_v34, 1  ;;  %v947_v48 = vadd.f32 %v6351_v56, %v922_v35  ;;  %v5060_v51 = vpop.f32.mrb[8].mxu0 }
 0x11f   : > { %v966_v55 = vmax.f32 %v948_v41, 0.0  ;;  %v925_v59 = vmul.f32 %v5060_v51, %v6346_v52  ;;  %v860_v60 = vpop.f32.mrb[9].mxu0  ;;  %v5230_v63 = vpack.c.bf16 %v1050_v44, %v1049_v25 }
 0x120   : > { %v1006_v0 = vsel %vm8969_vm13, %v1003_v47, %v1005_v40  ;;  %v965_v3 = vmax.f32 %v947_v48, 0.0  ;;  %v924_v4 = vmul.f32 %v6346_v52, %v860_v60  ;;  %v1004_v8 = vsel %vm8969_vm13, %v1001_v23, %v1003_v47 }
 0x121   : > { %v1053_v9 = vmax.f32 %v963_v34, %v1006_v0  ;;  %v1009_v10 = vrot.slane %v966_v55, 1  ;;  %v950_v7 = vadd.f32 %v6351_v56, %v925_v59  ;;  %5231 = vmatpush1.bf16.msra.mxu1 %v5230_v63  ;;  %v1052_v11 = vmax.f32 %v962_v17, %v1004_v8 }
 0x122   : > { %v1007_v12 = vrot.slane %v965_v3, 1  ;;  %v949_v13 = vadd.f32 %v6351_v56, %v924_v4  ;;  %v5063_v14 = vpop.f32.mrb[10].mxu0  ;;  %5232 = vmatprep.subr.bf16.mxu1 %v8971_v30 }
 0x123   : > { %v968_v15 = vmax.f32 %v950_v7, 0.0  ;;  %v927_v16 = vmul.f32 %v5063_v14, %v6346_v52  ;;  %v870_v18 = vpop.f32.mrb[11].mxu0  ;;  %v5233_v19 = vpack.c.bf16 %v1052_v11, %v1051_v39 }
 0x124   : > { %v1010_v20 = vsel %vm8969_vm13, %v1007_v12, %v1009_v10  ;;  %v967_v21 = vmax.f32 %v949_v13, 0.0  ;;  %v926_v22 = vmul.f32 %v6346_v52, %v870_v18  ;;  %v1008_v23 = vsel %vm8969_vm13, %v1005_v40, %v1007_v12 }
 0x125   : > { %v1055_v24 = vmax.f32 %v965_v3, %v1010_v20  ;;  %v1013_v17 = vrot.slane %v968_v15, 1  ;;  %v952_v25 = vadd.f32 %v6351_v56, %v927_v16  ;;  %5234 = vmatpush1.bf16.msra.mxu1 %v5233_v19  ;;  %v1054_v26 = vmax.f32 %v964_v29, %v1008_v23 }
 0x126   : > { %v1011_v27 = vrot.slane %v967_v21, 1  ;;  %v951_v28 = vadd.f32 %v6351_v56, %v926_v22  ;;  %v5066_v31 = vpop.f32.mrb[12].mxu0  ;;  %5235 = vmatprep.subr.bf16.mxu1 %v8971_v30 }
 0x127   : > { %v970_v32 = vmax.f32 %v952_v25, 0.0  ;;  %v929_v33 = vmul.f32 %v5066_v31, %v6346_v52  ;;  %v880_v34 = vpop.f32.mrb[13].mxu0  ;;  %v5236_v35 = vpack.c.bf16 %v1054_v26, %v1053_v9 }
 0x128   : > { %v1014_v38 = vsel %vm8969_vm13, %v1011_v27, %v1013_v17  ;;  %v969_v39 = vmax.f32 %v951_v28, 0.0  ;;  %v928_v40 = vmul.f32 %v6346_v52, %v880_v34  ;;  %v1012_v41 = vsel %vm8969_vm13, %v1009_v10, %v1011_v27 }
 0x129   : > { %v1057_v44 = vmax.f32 %v967_v21, %v1014_v38  ;;  %v1017_v29 = vrot.slane %v970_v32, 1  ;;  %v954_v47 = vadd.f32 %v6351_v56, %v929_v33  ;;  %5237 = vmatpush1.bf16.msra.mxu1 %v5236_v35  ;;  %v1056_v48 = vmax.f32 %v966_v55, %v1012_v41 }
 0x12a   : > { %v1015_v51 = vrot.slane %v969_v39, 1  ;;  %v953_v59 = vadd.f32 %v6351_v56, %v928_v40  ;;  %v5069_v60 = vpop.f32.mrb[14].mxu0  ;;  %5238 = vmatprep.subr.bf16.mxu1 %v8971_v30 }
 0x12b   : > { %v972_v63 = vmax.f32 %v954_v47, 0.0  ;;  %v931_v0 = vmul.f32 %v5069_v60, %v6346_v52  ;;  %v890_v3 = vpop.f32.mrb[15].mxu0  ;;  %v5239_v4 = vpack.c.bf16 %v1056_v48, %v1055_v24 }
 0x12c   : > { %v1018_v8 = vsel %vm8969_vm13, %v1015_v51, %v1017_v29  ;;  %v971_v9 = vmax.f32 %v953_v59, 0.0  ;;  %v930_v10 = vmul.f32 %v6346_v52, %v890_v3  ;;  %v1016_v7 = vsel %vm8969_vm13, %v1013_v17, %v1015_v51  ;;  %v1505_v3 = vld [vmem:[%s9072_s29 + $0x188] sm:$0xff] }
 0x12d   : > { %v1059_v11 = vmax.f32 %v969_v39, %v1018_v8  ;;  %v1021_v55 = vrot.slane %v972_v63, 1  ;;  %v956_v12 = vadd.f32 %v6351_v56, %v931_v0  ;;  %5240 = vmatpush1.bf16.msra.mxu1 %v5239_v4  ;;  %v1058_v13 = vmax.f32 %v968_v15, %v1016_v7  ;;  %v1488_v8 = vld [vmem:[%s9072_s29 + $0x100] sm:$0xff]  ;;  %v1507_v7 = vld [vmem:[%s9072_s29 + $0x198] sm:$0xff] }
 0x12e   : > { %v1019_v14 = vrot.slane %v971_v9, 1  ;;  %v955_v16 = vadd.f32 %v6351_v56, %v930_v10  ;;  %v5072_v18 = vpop.f32.mrb[16].mxu0  ;;  %5241 = vmatprep.subr.bf16.mxu1 %v8971_v30  ;;  %v1506_v10 = vld [vmem:[%s9072_s29 + $0x190] sm:$0xff] }
 0x12f   : > { %v974_v19 = vmax.f32 %v956_v12, 0.0  ;;  %v933_v20 = vmul.f32 %v5072_v18, %v6346_v52  ;;  %v900_v21 = vpop.f32.mrb[17].mxu0  ;;  %v5242_v22 = vpack.c.bf16 %v1058_v13, %v1057_v44  ;;  %v5293_v12 = vpack.c.bf16 %v1507_v7, %v1506_v10  ;;  %v1490_v13 = vld [vmem:[%s9072_s29 + $0x110] sm:$0xff]  ;;  %v1509_v18 = vld [vmem:[%s9072_s29 + $0x1a8] sm:$0xff]  ;;  %v1471_v10 = vld [vmem:[%s9072_s29 + $0x78] sm:$0xff] }
 0x130   : > { %v1022_v23 = vsel %vm8969_vm13, %v1019_v14, %v1021_v55  ;;  %v973_v24 = vmax.f32 %v955_v16, 0.0  ;;  %v932_v17 = vmul.f32 %v6346_v52, %v900_v21  ;;  %v1020_v25 = vsel %vm8969_vm13, %v1017_v29, %v1019_v14  ;;  %v1491_v14 = vld [vmem:[%s9072_s29 + $0x118] sm:$0xff]  ;;  %v1508_v16 = vld [vmem:[%s9072_s29 + $0x1a0] sm:$0xff] }
 0x131   : > { %v1061_v26 = vmax.f32 %v971_v9, %v1022_v23  ;;  %v1025_v15 = vrot.slane %v974_v19, 1  ;;  %v958_v27 = vadd.f32 %v6351_v56, %v933_v20  ;;  %5243 = vmatpush1.bf16.msra.mxu1 %v5242_v22  ;;  %v1060_v28 = vmax.f32 %v970_v32, %v1020_v25  ;;  %v1489_v9 = vld [vmem:[%s9072_s29 + $0x108] sm:$0xff]  ;;  %v1492_v22 = vld [vmem:[%s9072_s29 + $0x120] sm:$0xff] }
 0x132   : > { %v1023_v31 = vrot.slane %v973_v24, 1  ;;  %v957_v33 = vadd.f32 %v6351_v56, %v932_v17  ;;  %5244 = vmatprep.subr.bf16.mxu1 %v8971_v30  ;;  %v1112_v20 = vsel %vm6215_vm6, 1.0, %v8973_v37  ;;  %v5297_v21 = vpack.c.bf16 %v1509_v18, %v1508_v16  ;;  %v1493_v23 = vld [vmem:[%s9072_s29 + $0x128] sm:$0xff]  ;;  %v1511_v17 = vld [vmem:[%s9072_s29 + $0x1b8] sm:$0xff]  ;;  %v1568_v18 = vld [vmem:[%s9072_s29 + $0x380] sm:$0xff] }
 0x133   : > { %v976_v34 = vmax.f32 %v958_v27, 0.0  ;;  %v5245_v35 = vpack.c.bf16 %v1060_v28, %v1059_v11  ;;  %v5291_v11 = vpack.c.bf16 %v1489_v9, %v1488_v8  ;;  %v5299_v45 = vpack.c.bf16 %v1493_v23, %v1492_v22  ;;  %v1495_v27 = vld [vmem:[%s9072_s29 + $0x138] sm:$0xff]  ;;  %v1512_v28 = vld [vmem:[%s9072_s29 + $0x1c0] sm:$0xff]  ;;  %v1470_v9 = vld [vmem:[%s9072_s29 + $0x70] sm:$0xff] }
 0x134   : > { %v1026_v38 = vsel %vm8969_vm13, %v1023_v31, %v1025_v15  ;;  %v975_v39 = vmax.f32 %v957_v33, 0.0  ;;  %v1024_v52 = vsel %vm8969_vm13, %v1021_v55, %v1023_v31  ;;  %v1110_v55 = vsel %vm6207_vm4, 1.0, %v8973_v37  ;;  %v1513_v31 = vld [vmem:[%s9072_s29 + $0x1c8] sm:$0xff]  ;;  %v1519_v8 = vld [vmem:[%s9072_s29 + $0x1f8] sm:$0xff]  ;;  %v6610_v23 = vld [vmem:[%s9072_s29 + $0x300] sm:$0xff] }
 0x135   : > { %v1063_v40 = vmax.f32 %v973_v24, %v1026_v38  ;;  %v1029_v41 = vrot.slane %v976_v34, 1  ;;  %5246 = vmatpush1.bf16.msra.mxu1 %v5245_v35  ;;  %v1062_v44 = vmax.f32 %v972_v63, %v1024_v52  ;;  %v1504_v63 = vld [vmem:[%s9072_s29 + $0x180] sm:$0xff]  ;;  %v1510_v24 = vld [vmem:[%s9072_s29 + $0x1b0] sm:$0xff]  ;;  %v1114_v25 = vsel %vm6223_vm8, 1.0, %v8973_v37  ;;  %v1497_v38 = vld [vmem:[%s9072_s29 + $0x148] sm:$0xff] }
 0x136   : > { %v1027_v29 = vrot.slane %v975_v39, 1  ;;  %5247 = vmatprep.subr.bf16.mxu1 %v8971_v30  ;;  %v5289_v4 = vpack.c.bf16 %v1505_v3, %v1504_v63  ;;  %v1116_v33 = vsel %vm6231_vm10, 1.0, %v8973_v37  ;;  %v1496_v35 = vld [vmem:[%s9072_s29 + $0x140] sm:$0xff]  ;;  %v1515_v52 = vld [vmem:[%s9072_s29 + $0x1d8] sm:$0xff]  ;;  %v1518_v3 = vld [vmem:[%s9072_s29 + $0x1f0] sm:$0xff] }
 0x137   : > { %v5248_v32 = vpack.c.bf16 %v1062_v44, %v1061_v26  ;;  %v1066_v48 = vmax.f32 %v976_v34, %v1029_v41  ;;  %v5301_v26 = vpack.c.bf16 %v1511_v17, %v1510_v24  ;;  %v5305_v34 = vpack.c.bf16 %v1513_v31, %v1512_v28  ;;  %v1498_v44 = vld [vmem:[%s9072_s29 + $0x150] sm:$0xff]  ;;  %v1487_v63 = vld [vmem:[%s9072_s29 + $0xf8] sm:$0xff]  ;;  %v1537_v16 = vld [vmem:[%s9072_s29 + $0x288] sm:$0xff] }
 0x138   : > { %v1030_v47 = vsel %vm8969_vm13, %v1027_v29, %v1029_v41  ;;  %v1028_v56 = vsel %vm8969_vm13, %v1025_v15, %v1027_v29  ;;  %vm5968_vm13 = vmmov 1   ;;  %v1494_v15 = vld [vmem:[%s9072_s29 + $0x130] sm:$0xff]  ;;  %v5307_v53 = vpack.c.bf16 %v1497_v38, %v1496_v35  ;;  %v1499_v29 = vld [vmem:[%s9072_s29 + $0x158] sm:$0xff]  ;;  %v6605_v22 = vld [vmem:[%s9072_s29 + $0x208] sm:$0xff] }
 0x139   : > { %v1065_v51 = vmax.f32 %v975_v39, %v1030_v47  ;;  %5249 = vmatpush1.bf16.msra.mxu1 %v5248_v32  ;;  %v1064_v59 = vmax.f32 %v974_v19, %v1028_v56  ;;  %vm5255_vm2 = vmpackc.low %vm1153_vm1, %vm5968_vm13  ;;  %v5295_v19 = vpack.c.bf16 %v1491_v14, %v1490_v13  ;;  %v5303_v49 = vpack.c.bf16 %v1495_v27, %v1494_v15  ;;  %v1514_v39 = vld [vmem:[%s9072_s29 + $0x1d0] sm:$0xff]  ;;  %v1469_v47 = vld [vmem:[%s9072_s29 + $0x68] sm:$0xff] }
 0x13a   : > { %5250 = vmatprep.subr.bf16.mxu1 %v8971_v30  ;;  %v5309_v41 = vpack.c.bf16 %v1515_v52, %v1514_v39  ;;  %v5311_v32 = vpack.c.bf16 %v1499_v29, %v1498_v44  ;;  %v5313_v56 = vpack.c.bf16 %v1517_v2, %v1516_v1  ;;  %v5317_v7 = vpack.c.bf16 %v1519_v8, %v1518_v3  ;;  %v1536_v14 = vld [vmem:[%s9072_s29 + $0x280] sm:$0xff]  ;;  %v6615_v24 = vld [vmem:[%s9072_s29 + $0x308] sm:$0xff]  ;;  %v6620_v17 = vld [vmem:[%s9072_s29 + $0x290] sm:$0xff] }
 0x13b   : > { %v5254_v60 = vpack.c.bf16 %v1066_v48, %v1065_v51  ;;  %v5251_v0 = vpack.c.bf16 %v1064_v59, %v1063_v40  ;;  %v1118_v40 = vsel %vm6239_vm12, 1.0, %v8973_v37  ;;  %vm9080_vm12 = vnez %v9059_v58  ;;  %v1484_v58 = vld [vmem:[%s9072_s29 + $0xe0] sm:$0xff]  ;;  %v1501_v59 = vld [vmem:[%s9072_s29 + $0x168] sm:$0xff]  ;;  %v6640_v15 = vld [vmem:[%s9072_s29 + $0x210] sm:$0xff] }
 0x13c   : > { %v1500_v51 = vld [vmem:[%s9072_s29 + $0x160] sm:$0xff]  ;;  %v6645_v27 = vld [vmem:[%s9072_s29 + $0x218] sm:$0xff]  ;;  %v6650_v28 = vld [vmem:[%s9072_s29 + $0x310] sm:$0xff] }
 0x13d   : > { %5252 = vmatpush1.bf16.msra.mxu1 %v5251_v0  ;;  %v1486_v0 = vld [vmem:[%s9072_s29 + $0xf0] sm:$0xff]  ;;  %v6655_v31 = vld [vmem:[%s9072_s29 + $0x318] sm:$0xff]  ;;  %v6675_v35 = vld [vmem:[%s9072_s29 + $0x3a8] sm:$0xff] }
 0x13e   : > { %5253 = vmatprep.subr.bf16.mxu1 %v8971_v30  ;;  %v6680_v38 = vld [vmem:[%s9072_s29 + $0x220] sm:$0xff]  ;;  %v6685_v39 = vld [vmem:[%s9072_s29 + $0x228] sm:$0xff]  ;;  %v6710_v44 = vld [vmem:[%s9072_s29 + $0x3b0] sm:$0xff] }
 0x13f   : > { %v6690_v52 = vld [vmem:[%s9072_s29 + $0x320] sm:$0xff]  ;;  %v6715_v29 = vld [vmem:[%s9072_s29 + $0x3b8] sm:$0xff] }
 0x140   : > { %v6750_v1 = vld [vmem:[%s9072_s29 + $0x3c0] sm:$0xff]  ;;  %v6807_v3 = vld [vmem:[%s9072_s29 + $0x258] sm:$0xff] }
 0x141   : > { %5256 = vmatpush1.bf16.msk.msra.mxu1 %vm5255_vm2, %v5254_v60  ;;  %vm9075_vm2 = vcmask 105472   ;;  %v5315_v60 = vpack.c.bf16 %v1501_v59, %v1500_v51  ;;  %v6760_v2 = vld [vmem:[%s9072_s29 + $0x240] sm:$0xff]  ;;  %v6782_v51 = vld [vmem:[%s9072_s29 + $0x2d0] sm:$0xff]  ;;  %v6787_v59 = vld [vmem:[%s9072_s29 + $0x2d8] sm:$0xff]  ;;  %9091 = vst [vmem:[#allocation20_spill] sm:$0xff] %v6807_v3 }
 0x142   : > { %5290 = vmatprep.subr.bf16.mxu1 %v5289_v4  ;;  %vm9076_vm4 = vmmov %vm9075_vm2  ;;  %v5285_v4 = vpack.c.bf16 %v1487_v63, %v1486_v0  ;;  %9086 = vst [vmem:[#allocation15_spill] sm:$0xff] %v6760_v2  ;;  %v6797_v0 = vld [vmem:[%s9072_s29 + $0x3d8] sm:$0xff]  ;;  %v6802_v63 = vld [vmem:[%s9072_s29 + $0x250] sm:$0xff] }
 0x143   : > { %vm9077_vm6 = vmmov %vm9075_vm2  ;;  %9089 = vst [vmem:[#allocation18_spill] sm:$0xff] %v6797_v0  ;;  %v6891_v8 = vld [vmem:[%s9072_s29 + $0x2f8] sm:$0xff] }
 0x144   : > { %4185 = vmatmul.mubr.msk.f32.vlgmr.msra.gmra.mrb[0].mxu1 %vm6201_vm3, %v5969_v42  ;;  %vm9078_vm8 = vmmov %vm9075_vm2  ;;  %9090 = vst [vmem:[#allocation19_spill] sm:$0xff] %v6802_v63  ;;  %v6937_v2 = vld [vmem:[%s9072_s29 + $0x378] sm:$0xff] }
 0x145   : > { %4186 = vmatprep.mubr.msk.f32.mxu1 %vm9075_vm2, %v1110_v55  ;;  %5292 = vmatpush3.bf16.msra.mxu1 %v5291_v11  ;;  %vm9079_vm10 = vmmov %vm9075_vm2  ;;  %v5287_v11 = vpack.c.bf16 %v1471_v10, %v1470_v9  ;;  %v1502_v55 = vld [vmem:[%s9072_s29 + $0x170] sm:$0xff]  ;;  %v6873_v10 = vld [vmem:[%s9072_s29 + $0x368] sm:$0xff]  ;;  %9100 = vst [vmem:[#allocation29_spill] sm:$0xff] %v6891_v8 }
 0x146   : > { %5294 = vmatprep.subr.bf16.mxu1 %v5293_v12  ;;  %vm9081_vm13 = vmmov %vm9075_vm2  ;;  %v1503_v12 = vld [vmem:[%s9072_s29 + $0x178] sm:$0xff]  ;;  %9098 = vst [vmem:[#allocation27_spill] sm:$0xff] %v6873_v10  ;;  %v6924_v9 = vld [vmem:[%s9072_s29 + $0x370] sm:$0xff] }
 0x147   : > { %v5319_v13 = vpack.c.bf16 %v1503_v12, %v1502_v55  ;;  %v6830_v55 = vld [vmem:[%s9072_s29 + $0x2e0] sm:$0xff]  ;;  %v6835_v12 = vld [vmem:[%s9072_s29 + $0x2e8] sm:$0xff]  ;;  %9105 = vst [vmem:[#allocation34_spill] sm:$0xff] %v6924_v9  ;;  %9106 = vst [vmem:[#allocation35_spill] sm:$0xff] %v6937_v2 }
 0x148   : > { %4187 = vmatmul.mubr.msk.f32.gmra.mrb[2].mxu1 %vm6211_vm5, %v5969_v42  ;;  %v6992_v8 = vld [vmem:[%s9072_s29 + $0x588] sm:$0xff] }
 0x149   : > { %4188 = vmatprep.mubr.msk.f32.mxu1 %vm9076_vm4, %v1112_v20  ;;  %5296 = vmatpush3.bf16.msra.mxu1 %v5295_v19  ;;  %v1569_v19 = vld [vmem:[%s9072_s29 + $0x388] sm:$0xff] }
 0x14a   : > { %5298 = vmatprep.subr.bf16.mxu1 %v5297_v21  ;;  %v5353_v20 = vpack.c.bf16 %v1569_v19, %v1568_v18  ;;  %v6600_v21 = vld [vmem:[%s9072_s29 + $0x200] sm:$0xff]  ;;  %v6855_v18 = vld [vmem:[%s9072_s29 + $0x268] sm:$0xff]  ;;  %v6878_v19 = vld [vmem:[%s9072_s29 + $0x2f0] sm:$0xff] }
 0x14b   : > { %9096 = vst [vmem:[#allocation25_spill] sm:$0xff] %v6855_v18  ;;  %9099 = vst [vmem:[#allocation28_spill] sm:$0xff] %v6878_v19 }
 0x14c   : > { %4189 = vmatmul.mubr.msk.f32.gmra.mrb[4].mxu1 %vm6219_vm7, %v5969_v42 }
 0x14d   : > { %4190 = vmatprep.mubr.msk.f32.mxu1 %vm9077_vm6, %v1114_v25  ;;  %5300 = vmatpush3.bf16.msra.mxu1 %v5299_v45  ;;  %vm9085_vm6 = vnez %v9071_v6  ;;  %v1468_v6 = vld [vmem:[%s9072_s29 + $0x60] sm:$0xff]  ;;  %v6625_v45 = vld [vmem:[%s9072_s29 + $0x298] sm:$0xff]  ;;  %v6630_v25 = vld [vmem:[%s9072_s29 + $0x390] sm:$0xff] }
 0x14e   : > { %5302 = vmatprep.subr.bf16.mxu1 %v5301_v26  ;;  %v5283_v48 = vpack.c.bf16 %v1469_v47, %v1468_v6  ;;  %v6635_v26 = vld [vmem:[%s9072_s29 + $0x398] sm:$0xff]  ;;  %v6765_v6 = vld [vmem:[%s9072_s29 + $0x248] sm:$0xff] }
 0x14f   : > { %9087 = vst [vmem:[#allocation16_spill] sm:$0xff] %v6765_v6  ;;  %v6942_v6 = vld [vmem:[%s9072_s29 + $0x480] sm:$0xff]  ;;  %v6947_v47 = vld [vmem:[%s9072_s29 + $0x488] sm:$0xff] }
 0x150   : > { %4191 = vmatmul.mubr.msk.f32.gmra.mrb[6].mxu1 %vm6227_vm9, %v5969_v42  ;;  %9107 = vst [vmem:[#allocation36_spill] sm:$0xff] %v6942_v6  ;;  %9108 = vst [vmem:[#allocation37_spill] sm:$0xff] %v6947_v47 }
 0x151   : > { %4192 = vmatprep.mubr.msk.f32.mxu1 %vm9078_vm8, %v1116_v33  ;;  %5304 = vmatpush3.bf16.msra.mxu1 %v5303_v49  ;;  %v6660_v49 = vld [vmem:[%s9072_s29 + $0x2a0] sm:$0xff]  ;;  %v6665_v33 = vld [vmem:[%s9072_s29 + $0x2a8] sm:$0xff]  ;;  %vm1411_vm8 = vcmask 1040384  }
 0x152   : > { %5306 = vmatprep.subr.bf16.mxu1 %v5305_v34  ;;  %v6670_v34 = vld [vmem:[%s9072_s29 + $0x3a0] sm:$0xff] }
 0x154   : > { %4193 = vmatmul.mubr.msk.f32.gmra.mrb[8].mxu1 %vm6235_vm11, %v5969_v42  ;;  %vm9082_vm11 = vmmov %vm9075_vm2  ;;  %vm9083_vm2 = vnez %v9069_v5  ;;  %v5281_v5 = vpack.c.bf16 %v1485_v62, %v1484_v58  ;;  %v6740_v58 = vld [vmem:[%s9072_s29 + $0x2c0] sm:$0xff]  ;;  %v6745_v62 = vld [vmem:[%s9072_s29 + $0x2c8] sm:$0xff] }
 0x155   : > { %4194 = vmatprep.mubr.msk.f32.mxu1 %vm9079_vm10, %v1118_v40  ;;  %5308 = vmatpush3.bf16.msra.mxu1 %v5307_v53  ;;  %v1124_v61 = vsel %vm9083_vm2, 1.0, %v8973_v37  ;;  %v6695_v53 = vld [vmem:[%s9072_s29 + $0x328] sm:$0xff]  ;;  %v6700_v40 = vld [vmem:[%s9072_s29 + $0x2b0] sm:$0xff]  ;;  %v6868_v37 = vld [vmem:[%s9072_s29 + $0x360] sm:$0xff]  ;;  %vm1342_vm10 = vcmask 1043456  }
 0x156   : > { %5310 = vmatprep.subr.bf16.mxu1 %v5309_v41  ;;  %5282 = vmatprep.subr.bf16.mxu0 %v5281_v5  ;;  %v6705_v41 = vld [vmem:[%s9072_s29 + $0x2b8] sm:$0xff]  ;;  %v6755_v5 = vld [vmem:[%s9072_s29 + $0x3c8] sm:$0xff]  ;;  %9097 = vst [vmem:[#allocation26_spill] sm:$0xff] %v6868_v37 }
 0x157   : > { %5284 = vmatpush3.bf16.msra.mxu0 %v5283_v48  ;;  %v6777_v48 = vld [vmem:[%s9072_s29 + $0x348] sm:$0xff] }
 0x158   : > { %4195 = vmatmul.mubr.msk.f32.gmra.mrb[10].mxu1 %vm9080_vm12, %v5969_v42  ;;  %5286 = vmatprep.subr.bf16.mxu0 %v5285_v4  ;;  %vm1388_vm12 = vcmask 1041408   ;;  %v6896_v4 = vld [vmem:[%s9072_s29 + $0x3f0] sm:$0xff] }
 0x159   : > { %4196 = vmatprep.mubr.msk.f32.mxu1 %vm9081_vm13, %v1120_v57  ;;  %5312 = vmatpush3.bf16.msra.mxu1 %v5311_v32  ;;  %v6720_v32 = vld [vmem:[%s9072_s29 + $0x230] sm:$0xff]  ;;  %v6725_v57 = vld [vmem:[%s9072_s29 + $0x238] sm:$0xff]  ;;  %9101 = vst [vmem:[#allocation30_spill] sm:$0xff] %v6896_v4  ;;  %vm9109_vm13 = vcmask 1046528  }
 0x15a   : > { %5314 = vmatprep.subr.bf16.mxu1 %v5313_v56  ;;  %v6772_v56 = vld [vmem:[%s9072_s29 + $0x340] sm:$0xff] }
 0x15b   : > { %5288 = vmatpush3.bf16.msra.mxu0 %v5287_v11  ;;  %v6825_v11 = vld [vmem:[%s9072_s29 + $0x358] sm:$0xff] }
 0x15c   : > { %4197 = vmatmul.mubr.msk.f32.gmra.mrb[12].mxu1 %vm6251_vm15, %v5969_v42  ;;  %vm1297_vm15 = vcmask 1045504  }
 0x15d   : > { %4198 = vmatprep.mubr.msk.f32.mxu1 %vm9082_vm11, %v1122_v54  ;;  %5316 = vmatpush3.bf16.msra.mxu1 %v5315_v60  ;;  %v6730_v54 = vld [vmem:[%s9072_s29 + $0x330] sm:$0xff]  ;;  %vm9114_vm11 = vmmov %vm9109_vm13 }
 0x15e   : > { %5318 = vmatprep.subr.bf16.mxu1 %v5317_v7  ;;  %v6792_v60 = vld [vmem:[%s9072_s29 + $0x3d0] sm:$0xff]  ;;  %vm9119_vm2 = vmmov %vm9114_vm11 }
 0x15f   : > { %9088 = vst [vmem:[#allocation17_spill] sm:$0xff] %v6792_v60  ;;  %v6820_v7 = vld [vmem:[%s9072_s29 + $0x350] sm:$0xff] }
 0x160   : > { %4199 = vmatmul.mubr.msk.f32.gmra.mrb[14].mxu1 %vm9084_vm14, %v5969_v42  ;;  %9092 = vst [vmem:[#allocation21_spill] sm:$0xff] %v6820_v7  ;;  %vm9125_vm14 = vmmov %vm9119_vm2 }
 0x161   : > { %4200 = vmatprep.mubr.msk.f32.mxu1 %vm9076_vm4, %v1124_v61  ;;  %5320 = vmatpush3.bf16.msra.mxu1 %v5319_v13  ;;  %v6735_v61 = vld [vmem:[%s9072_s29 + $0x338] sm:$0xff]  ;;  %v6840_v13 = vld [vmem:[%s9072_s29 + $0x3e0] sm:$0xff]  ;;  %vm9132_vm4 = vmmov %vm9119_vm2 }
 0x162   : > { %5354 = vmatprep.subr.bf16.mxu1 %v5353_v20  ;;  %9093 = vst [vmem:[#allocation22_spill] sm:$0xff] %v6840_v13  ;;  %v6901_v20 = vld [vmem:[%s9072_s29 + $0x3f8] sm:$0xff] }
 0x163   : > { %9102 = vst [vmem:[#allocation31_spill] sm:$0xff] %v6901_v20  ;;  %v6987_v20 = vld [vmem:[%s9072_s29 + $0x580] sm:$0xff] }
 0x164   : > { %4201 = vmatmul.mubr.msk.f32.gmra.mrb[16].mxu1 %vm9085_vm6, %v5969_v42  ;;  %v5321_v42 = vpack.c.bf16 %v1537_v16, %v1536_v14  ;;  %v6845_v14 = vld [vmem:[%s9072_s29 + $0x3e8] sm:$0xff]  ;;  %v6850_v16 = vld [vmem:[%s9072_s29 + $0x260] sm:$0xff]  ;;  %vm9143_vm6 = vmmov %vm9119_vm2 }
 0x165   : > { %9094 = vst [vmem:[#allocation23_spill] sm:$0xff] %v6845_v14  ;;  %9095 = vst [vmem:[#allocation24_spill] sm:$0xff] %v6850_v16 }
 0x166   : > { %5322 = vmatprep.subr.bf16.mxu0 %v5321_v42 }
 0x217   : > { %v1223_v42 = vpop.f32.mrb[0].mxu1 }
 0x218   : > { %v1225_v30 = vpop.f32.mrb[1].mxu1  ;;  %v1275_v7 = vrot.slane %v1223_v42, 1  ;;  %v1320_v36 = vrot.slane %v1223_v42, 3  ;;  %v1298_v60 = vrot.slane %v1223_v42, 2  ;;  %v1366_v37 = vrot.slane %v1223_v42, 5 }
 0x219   : > { %v1412_v10 = vrot.slane %v1223_v42, 7  ;;  %v1343_v0 = vrot.slane %v1223_v42, 4  ;;  %v1389_v3 = vrot.slane %v1223_v42, 6 }
 0x21b   : > { %v6969_v16 = vpop.f32.mrb[2].mxu1 }
 0x21c   : > { %v1230_v19 = vpop.f32.mrb[3].mxu1  ;;  %v1276_v30 = vrot.slane %v6969_v16, 1  ;;  %v1321_v4 = vrot.slane %v6969_v16, 3  ;;  %v1299_v43 = vrot.slane %v6969_v16, 2  ;;  %v1367_v50 = vrot.slane %v6969_v16, 5 }
 0x21d   : > { %v1413_v63 = vrot.slane %v6969_v16, 7  ;;  %v1344_v9 = vrot.slane %v6969_v16, 4  ;;  %v1390_v6 = vrot.slane %v6969_v16, 6 }
 0x21e   : > { %v1277_v47 = vsel %vm9109_vm13, %v1275_v7, %v1276_v30  ;;  %v1322_v2 = vsel %vm1153_vm1, %v1320_v36, %v1321_v4  ;;  %v1300_v19 = vsel %vm1297_vm15, %v1298_v60, %v1299_v43  ;;  %v6982_v46 = vsel %vm1365_vm0, %v1366_v37, %v1367_v50  ;;  %vm9157_vm13 = vmmov %vm9119_vm2 }
 0x21f   : > { %9110 = vst [vmem:[#allocation38_spill] sm:$0xff] %v6982_v46  ;;  %v6994_v18 = vpop.f32.mrb[4].mxu1  ;;  %1776 = vmatprep.mubr.f32.mxu0 %v1277_v47  ;;  %1876 = vmatprep.mubr.f32.mxu1 %v1322_v2  ;;  %v6997_v36 = vsel %vm1411_vm8, %v1412_v10, %v1413_v63  ;;  %v7000_v37 = vsel %vm1342_vm10, %v1343_v0, %v1344_v9 }
 0x220   : > { %v7003_v60 = vsel %vm1388_vm12, %v1389_v3, %v1390_v6  ;;  %1777 = vmatmul.mubr.f32.vlgmr.msra.gmra.mrb[18].mxu0 %v1223_v42  ;;  %1877 = vmatmul.mubr.f32.vlgmr.msra.gmra.mrb[18].mxu1 %v1300_v19  ;;  %v1235_v7 = vpop.f32.mrb[5].mxu1  ;;  %v1278_v46 = vrot.slane %v6994_v18, 1  ;;  %v1323_v13 = vrot.slane %v6994_v18, 3  ;;  %v1301_v14 = vrot.slane %v6994_v18, 2 }
 0x221   : > { %9111 = vst [vmem:[#allocation39_spill] sm:$0xff] %v7003_v60  ;;  %v1369_v2 = vrot.slane %v6994_v18, 5  ;;  %v9112_v47 = vpack.c.bf16 %v6605_v22, %v6600_v21  ;;  %v9113_v0 = vpack.c.bf16 %v6615_v24, %v6610_v23  ;;  %v1415_v10 = vrot.slane %v6994_v18, 7 }
 0x222   : > { %v1346_v42 = vrot.slane %v6994_v18, 4  ;;  %v1392_v19 = vrot.slane %v6994_v18, 6  ;;  %v7021_v7 = vsel %vm9114_vm11, %v1276_v30, %v1278_v46  ;;  %v7024_v60 = vsel %vm1153_vm1, %v1321_v4, %v1323_v13  ;;  %vm9172_vm11 = vmmov %vm9119_vm2 }
 0x223   : > { %5324 = vmatpush3.bf16.msra.mxu0 %v9112_v47  ;;  %5356 = vmatpush3.bf16.msra.mxu1 %v9113_v0  ;;  %v9115_v21 = vpack.c.bf16 %v6625_v45, %v6620_v17  ;;  %v9116_v22 = vpack.c.bf16 %v6635_v26, %v6630_v25  ;;  %v7033_v23 = vsel %vm1297_vm15, %v1299_v43, %v1301_v14  ;;  %v7035_v24 = vpop.f32.mrb[6].mxu1 }
 0x224   : > { %1781 = vmatprep.mubr.f32.mxu0 %v7021_v7  ;;  %1881 = vmatprep.mubr.f32.mxu1 %v7024_v60  ;;  %v7040_v4 = vsel %vm1365_vm0, %v1367_v50, %v1369_v2  ;;  %v7043_v30 = vsel %vm1411_vm8, %v1413_v63, %v1415_v10  ;;  %v7046_v17 = vsel %vm1342_vm10, %v1344_v9, %v1346_v42  ;;  %v1240_v43 = vpop.f32.mrb[7].mxu1  ;;  %v1280_v45 = vrot.slane %v7035_v24, 1 }
 0x225   : > { %5326 = vmatprep.subr.bf16.mxu0 %v9115_v21  ;;  %5358 = vmatprep.subr.bf16.mxu1 %v9116_v22  ;;  %v1325_v25 = vrot.slane %v7035_v24, 3  ;;  %v1303_v26 = vrot.slane %v7035_v24, 2  ;;  %v7054_v50 = vsel %vm1388_vm12, %v1390_v6, %v1392_v19  ;;  %v9117_v63 = vpack.c.bf16 %v6645_v27, %v6640_v15 }
 0x226   : > { %1782 = vmatmul.mubr.f32.gmra.mrb[20].mxu0 %v6969_v16  ;;  %1882 = vmatmul.mubr.f32.gmra.mrb[20].mxu1 %v7033_v23  ;;  %v9118_v9 = vpack.c.bf16 %v6655_v31, %v6650_v28  ;;  %v1371_v47 = vrot.slane %v7035_v24, 5  ;;  %v1417_v0 = vrot.slane %v7035_v24, 7  ;;  %v1348_v21 = vrot.slane %v7035_v24, 4 }
 0x227   : > { %5328 = vmatpush3.bf16.msra.mxu0 %v9117_v63  ;;  %v1394_v22 = vrot.slane %v7035_v24, 6  ;;  %v7067_v43 = vsel %vm9119_vm2, %v1278_v46, %v1280_v45  ;;  %v7070_v6 = vsel %vm1153_vm1, %v1323_v13, %v1325_v25  ;;  %v9120_v15 = vpack.c.bf16 %v6665_v33, %v6660_v49  ;;  %v7081_v31 = vpop.f32.mrb[8].mxu1 }
 0x228   : > { %5360 = vmatpush3.bf16.msra.mxu1 %v9118_v9  ;;  %v9121_v27 = vpack.c.bf16 %v6675_v35, %v6670_v34  ;;  %v7079_v28 = vsel %vm1297_vm15, %v1301_v14, %v1303_v26  ;;  %9122 = vst [vmem:[#allocation40_spill] sm:$0xff] %v7081_v31  ;;  %1786 = vmatprep.mubr.f32.mxu0 %v7067_v43  ;;  %v1245_v33 = vpop.f32.mrb[9].mxu1  ;;  %v1282_v34 = vrot.slane %v7081_v31, 1  ;;  %v1327_v35 = vrot.slane %v7081_v31, 3 }
 0x229   : > { %5330 = vmatprep.subr.bf16.mxu0 %v9120_v15  ;;  %1886 = vmatprep.mubr.f32.mxu1 %v7070_v6  ;;  %v7086_v46 = vsel %vm1365_vm0, %v1369_v2, %v1371_v47  ;;  %v7089_v13 = vsel %vm1411_vm8, %v1415_v10, %v1417_v0  ;;  %v7092_v49 = vsel %vm1342_vm10, %v1346_v42, %v1348_v21  ;;  %v1305_v14 = vrot.slane %v7081_v31, 2 }
 0x22a   : > { %5362 = vmatprep.subr.bf16.mxu1 %v9121_v27  ;;  %1787 = vmatmul.mubr.f32.gmra.mrb[22].mxu0 %v6994_v18  ;;  %v7100_v2 = vsel %vm1388_vm12, %v1392_v19, %v1394_v22  ;;  %v9123_v10 = vpack.c.bf16 %v6685_v39, %v6680_v38  ;;  %v9124_v42 = vpack.c.bf16 %v6695_v53, %v6690_v52  ;;  %v1373_v63 = vrot.slane %v7081_v31, 5 }
 0x22b   : > { %1887 = vmatmul.mubr.f32.gmra.mrb[22].mxu1 %v7079_v28  ;;  %v1419_v9 = vrot.slane %v7081_v31, 7  ;;  %v1350_v15 = vrot.slane %v7081_v31, 4  ;;  %v1396_v27 = vrot.slane %v7081_v31, 6  ;;  %v7113_v33 = vsel %vm9125_vm14, %v1280_v45, %v1282_v34  ;;  %v7127_v53 = vpop.f32.mrb[10].mxu1 }
 0x22c   : > { %5332 = vmatpush3.bf16.msra.mxu0 %v9123_v10  ;;  %5364 = vmatpush3.bf16.msra.mxu1 %v9124_v42  ;;  %v7116_v19 = vsel %vm1153_vm1, %v1325_v25, %v1327_v35  ;;  %v9126_v38 = vpack.c.bf16 %v6705_v41, %v6700_v40  ;;  %v9127_v39 = vpack.c.bf16 %v6715_v29, %v6710_v44  ;;  %v1250_v41 = vpop.f32.mrb[11].mxu1  ;;  %v1284_v44 = vrot.slane %v7127_v53, 1 }
 0x22d   : > { %v7125_v52 = vsel %vm1297_vm15, %v1303_v26, %v1305_v14  ;;  %9129 = vst [vmem:[#allocation42_spill] sm:$0xff] %v7127_v53  ;;  %1791 = vmatprep.mubr.f32.mxu0 %v7113_v33  ;;  %1891 = vmatprep.mubr.f32.mxu1 %v7116_v19  ;;  %v7132_v45 = vsel %vm1365_vm0, %v1371_v47, %v1373_v63  ;;  %v1329_v29 = vrot.slane %v7127_v53, 3  ;;  %v1307_v26 = vrot.slane %v7127_v53, 2 }
 0x22e   : > { %5334 = vmatprep.subr.bf16.mxu0 %v9126_v38  ;;  %5366 = vmatprep.subr.bf16.mxu1 %v9127_v39  ;;  %9128 = vst [vmem:[#allocation41_spill] sm:$0xff] %v7125_v52  ;;  %v7135_v25 = vsel %vm1411_vm8, %v1417_v0, %v1419_v9  ;;  %v7138_v40 = vsel %vm1342_vm10, %v1348_v21, %v1350_v15  ;;  %v1375_v10 = vrot.slane %v7127_v53, 5  ;;  %v1421_v42 = vrot.slane %v7127_v53, 7 }
 0x22f   : > { %1792 = vmatmul.mubr.f32.gmra.mrb[24].mxu0 %v7035_v24  ;;  %1892 = vmatmul.mubr.f32.gmra.mrb[24].mxu1 %v7125_v52  ;;  %v7146_v47 = vsel %vm1388_vm12, %v1394_v22, %v1396_v27  ;;  %v9130_v0 = vpack.c.bf16 %v6725_v57, %v6720_v32  ;;  %v9131_v21 = vpack.c.bf16 %v6735_v61, %v6730_v54  ;;  %v1352_v38 = vrot.slane %v7127_v53, 4  ;;  %v7173_v61 = vpop.f32.mrb[12].mxu1  ;;  %v1616_v52 = vld [vmem:[%s9072_s29 + $0x500] sm:$0xff] }
 0x230   : > { %v1398_v39 = vrot.slane %v7127_v53, 6  ;;  %v7159_v41 = vsel %vm9132_vm4, %v1282_v34, %v1284_v44  ;;  %v7162_v22 = vsel %vm1153_vm1, %v1327_v35, %v1329_v29  ;;  %v9135_v32 = vpack.c.bf16 %v6745_v62, %v6740_v58  ;;  %9138 = vst [vmem:[#allocation46_spill] sm:$0xff] %v7173_v61  ;;  %v1255_v62 = vpop.f32.mrb[13].mxu1 }
 0x231   : > { %5336 = vmatpush3.bf16.msra.mxu0 %v9130_v0  ;;  %5368 = vmatpush3.bf16.msra.mxu1 %v9131_v21  ;;  %9133 = vst [vmem:[#allocation43_spill] sm:$0xff] %v7159_v41  ;;  %9134 = vst [vmem:[#allocation44_spill] sm:$0xff] %v7162_v22  ;;  %v9136_v57 = vpack.c.bf16 %v6755_v5, %v6750_v1  ;;  %v7171_v54 = vsel %vm1297_vm15, %v1305_v14, %v1307_v26  ;;  %v1286_v1 = vrot.slane %v7173_v61, 1  ;;  %v9139_v0 = vld [vmem:[#allocation16_spill] sm:$0xff]  ;;  %vm2581_vm2 = vcmask 449536  }
 0x232   : > { %5338 = vmatprep.subr.bf16.mxu0 %v9135_v32  ;;  %9137 = vst [vmem:[#allocation45_spill] sm:$0xff] %v7171_v54  ;;  %1796 = vmatprep.mubr.f32.mxu0 %v7159_v41  ;;  %v7178_v34 = vsel %vm1365_vm0, %v1373_v63, %v1375_v10  ;;  %v7181_v35 = vsel %vm1411_vm8, %v1419_v9, %v1421_v42  ;;  %v1331_v5 = vrot.slane %v7173_v61, 3  ;;  %v1309_v14 = vrot.slane %v7173_v61, 2  ;;  %v9140_v9 = vld [vmem:[#allocation15_spill] sm:$0xff] }
 0x233   : > { %5370 = vmatprep.subr.bf16.mxu1 %v9136_v57  ;;  %1896 = vmatprep.mubr.f32.mxu1 %v7162_v22  ;;  %v7184_v58 = vsel %vm1342_vm10, %v1350_v15, %v1352_v38  ;;  %v7192_v63 = vsel %vm1388_vm12, %v1396_v27, %v1398_v39  ;;  %v9141_v21 = vpack.c.bf16 %v9139_v0, %v9140_v9  ;;  %v1377_v32 = vrot.slane %v7173_v61, 5 }
 0x234   : > { %1797 = vmatmul.mubr.f32.gmra.mrb[26].mxu0 %v7081_v31  ;;  %1897 = vmatmul.mubr.f32.gmra.mrb[26].mxu1 %v7171_v54  ;;  %v9142_v15 = vpack.c.bf16 %v6777_v48, %v6772_v56  ;;  %v1423_v57 = vrot.slane %v7173_v61, 7  ;;  %v1354_v62 = vrot.slane %v7173_v61, 4  ;;  %v1400_v3 = vrot.slane %v7173_v61, 6  ;;  %v9147_v56 = vld [vmem:[#allocation18_spill] sm:$0xff]  ;;  %v9148_v48 = vld [vmem:[#allocation17_spill] sm:$0xff] }
 0x235   : > { %5340 = vmatpush3.bf16.msra.mxu0 %v9141_v21  ;;  %v7205_v54 = vsel %vm9143_vm6, %v1284_v44, %v1286_v1  ;;  %v7208_v27 = vsel %vm1153_vm1, %v1329_v29, %v1331_v5  ;;  %v9146_v0 = vpack.c.bf16 %v6787_v59, %v6782_v51  ;;  %v9149_v9 = vpack.c.bf16 %v9147_v56, %v9148_v48  ;;  %v9152_v48 = vld [vmem:[#allocation20_spill] sm:$0xff] }
 0x236   : > { %5372 = vmatpush3.bf16.msra.mxu1 %v9142_v15  ;;  %9144 = vst [vmem:[#allocation16_spill] sm:$0xff] %v7205_v54  ;;  %9145 = vst [vmem:[#allocation15_spill] sm:$0xff] %v7208_v27  ;;  %v7217_v21 = vsel %vm1297_vm15, %v1307_v26, %v1309_v14  ;;  %v7219_v15 = vpop.f32.mrb[14].mxu1  ;;  %1801 = vmatprep.mubr.f32.mxu0 %v7205_v54  ;;  %v7224_v44 = vsel %vm1365_vm0, %v1375_v10, %v1377_v32 }
 0x237   : > { %5342 = vmatprep.subr.bf16.mxu0 %v9146_v0  ;;  %5374 = vmatprep.subr.bf16.mxu1 %v9149_v9  ;;  %9150 = vst [vmem:[#allocation18_spill] sm:$0xff] %v7217_v21  ;;  %9151 = vst [vmem:[#allocation17_spill] sm:$0xff] %v7219_v15  ;;  %v7227_v29 = vsel %vm1411_vm8, %v1421_v42, %v1423_v57  ;;  %v7230_v51 = vsel %vm1342_vm10, %v1352_v38, %v1354_v62  ;;  %v1260_v59 = vpop.f32.mrb[15].mxu1  ;;  %v1288_v26 = vrot.slane %v7219_v15, 1  ;;  %v9153_v42 = vld [vmem:[#allocation19_spill] sm:$0xff]  ;;  %v9155_v38 = vld [vmem:[#allocation21_spill] sm:$0xff] }
 0x238   : > { %1901 = vmatprep.mubr.f32.mxu1 %v7208_v27  ;;  %1802 = vmatmul.mubr.f32.gmra.mrb[28].mxu0 %v7127_v53  ;;  %v1333_v0 = vrot.slane %v7219_v15, 3  ;;  %v1311_v56 = vrot.slane %v7219_v15, 2  ;;  %v7238_v10 = vsel %vm1388_vm12, %v1398_v39, %v1400_v3  ;;  %v9154_v9 = vpack.c.bf16 %v9152_v48, %v9153_v42 }
 0x239   : > { %1902 = vmatmul.mubr.f32.gmra.mrb[28].mxu1 %v7217_v21  ;;  %v9156_v27 = vpack.c.bf16 %v6825_v11, %v9155_v38  ;;  %v1379_v21 = vrot.slane %v7219_v15, 5  ;;  %v1425_v59 = vrot.slane %v7219_v15, 7  ;;  %v1356_v53 = vrot.slane %v7219_v15, 4  ;;  %v9161_v11 = vld [vmem:[#allocation23_spill] sm:$0xff]  ;;  %v1263_v38 = vpop.f32.mrb[16].mxu1 }
 0x23a   : > { %5344 = vmatpush3.bf16.msra.mxu0 %v9154_v9  ;;  %v1402_v54 = vrot.slane %v7219_v15, 6  ;;  %v7251_v31 = vsel %vm9157_vm13, %v1286_v1, %v1288_v26  ;;  %v7254_v39 = vsel %vm1153_vm1, %v1331_v5, %v1333_v0  ;;  %v9160_v48 = vpack.c.bf16 %v6835_v12, %v6830_v55 }
 0x23b   : > { %5376 = vmatpush3.bf16.msra.mxu1 %v9156_v27  ;;  %9158 = vst [vmem:[#allocation20_spill] sm:$0xff] %v7251_v31  ;;  %9159 = vst [vmem:[#allocation19_spill] sm:$0xff] %v7254_v39  ;;  %v9162_v27 = vld [vmem:[#allocation22_spill] sm:$0xff]  ;;  %v7263_v9 = vsel %vm1297_vm15, %v1309_v14, %v1311_v56  ;;  %1806 = vmatprep.mubr.f32.mxu0 %v7251_v31  ;;  %v7268_v1 = vsel %vm1365_vm0, %v1377_v32, %v1379_v21  ;;  %v1435_v14 = vrot.slane %v1263_v38, 1  ;;  %v9166_v32 = vld [vmem:[#allocation24_spill] sm:$0xff] }
 0x23c   : > { %5346 = vmatprep.subr.bf16.mxu0 %v9160_v48  ;;  %v9163_v42 = vpack.c.bf16 %v9161_v11, %v9162_v27  ;;  %9164 = vst [vmem:[#allocation21_spill] sm:$0xff] %v7263_v9  ;;  %1906 = vmatprep.mubr.f32.mxu1 %v7254_v39  ;;  %v7271_v5 = vsel %vm1411_vm8, %v1423_v57, %v1425_v59  ;;  %v1441_v48 = vrot.slane %v1263_v38, 3  ;;  %v1265_v11 = vpop.f32.mrb[17].mxu1  ;;  %v1438_v27 = vrot.slane %v1263_v38, 2  ;;  %v9168_v57 = vld [vmem:[#allocation27_spill] sm:$0xff]  ;;  %v9169_v39 = vld [vmem:[#allocation26_spill] sm:$0xff] }
 0x23d   : > { %v7274_v55 = vsel %vm1342_vm10, %v1354_v62, %v1356_v53  ;;  %1807 = vmatmul.mubr.f32.gmra.mrb[30].mxu0 %v7173_v61  ;;  %1907 = vmatmul.mubr.f32.gmra.mrb[30].mxu1 %v7263_v9  ;;  %v7279_v12 = vsel %vm1388_vm12, %v1400_v3, %v1402_v54  ;;  %v9170_v31 = vpack.c.bf16 %v9168_v57, %v9169_v39  ;;  %v1447_v62 = vrot.slane %v1263_v38, 5  ;;  %v9171_v9 = vld [vmem:[#allocation38_spill] sm:$0xff] }
 0x23e   : > { %5378 = vmatprep.subr.bf16.mxu1 %v9163_v42  ;;  %v9165_v42 = vld [vmem:[#allocation25_spill] sm:$0xff]  ;;  %v1453_v22 = vrot.slane %v1263_v38, 7  ;;  %v1444_v61 = vrot.slane %v1263_v38, 4  ;;  %v1450_v41 = vrot.slane %v1263_v38, 6  ;;  %1976 = vmatprep.mubr.f32.mxu0 %v9171_v9  ;;  %v1584_v3 = vld [vmem:[%s9072_s29 + $0x400] sm:$0xff]  ;;  %v7296_v11 = vsel %vm9172_vm11, %v1288_v26, %v1435_v14  ;;  %v9174_v38 = vld [vmem:[#allocation28_spill] sm:$0xff] }
 0x23f   : > { %v9167_v15 = vpack.c.bf16 %v9165_v42, %v9166_v32  ;;  %5380 = vmatpush3.bf16.msra.mxu1 %v9170_v31  ;;  %2076 = vmatprep.mubr.f32.mxu1 %v6997_v36  ;;  %v7299_v31 = vsel %vm1153_vm1, %v1333_v0, %v1441_v48  ;;  %v7302_v39 = vsel %vm1297_vm15, %v1311_v56, %v1438_v27  ;;  %v9173_v9 = vld [vmem:[#allocation29_spill] sm:$0xff]  ;;  %v9176_v42 = vld [vmem:[#allocation31_spill] sm:$0xff]  ;;  %v9177_v32 = vld [vmem:[#allocation30_spill] sm:$0xff] }
 0x240   : > { %v9175_v36 = vpack.c.bf16 %v9173_v9, %v9174_v38  ;;  %v9178_v57 = vpack.c.bf16 %v9176_v42, %v9177_v32  ;;  %v1617_v26 = vld [vmem:[%s9072_s29 + $0x508] sm:$0xff]  ;;  %v1602_v0 = vld [vmem:[%s9072_s29 + $0x490] sm:$0xff]  ;;  %v7320_v56 = vsel %vm1365_vm0, %v1379_v21, %v1447_v62  ;;  %v7323_v14 = vsel %vm1411_vm8, %v1425_v59, %v1453_v22  ;;  %v1603_v27 = vld [vmem:[%s9072_s29 + $0x498] sm:$0xff] }
 0x241   : > { %5348 = vmatpush3.bf16.msra.mxu0 %v9167_v15  ;;  %v1585_v15 = vld [vmem:[%s9072_s29 + $0x408] sm:$0xff]  ;;  %9179 = vst [vmem:[#allocation23_spill] sm:$0xff] %v7320_v56  ;;  %9180 = vst [vmem:[#allocation22_spill] sm:$0xff] %v7323_v14  ;;  %v7326_v48 = vsel %vm1342_vm10, %v1356_v53, %v1444_v61  ;;  %v1634_v9 = vld [vmem:[%s9072_s29 + $0x590] sm:$0xff]  ;;  %v7338_v21 = vsel %vm1388_vm12, %v1402_v54, %v1450_v41  ;;  %v5419_v56 = vpack.c.bf16 %v1617_v26, %v1616_v52 }
 0x242   : > { %5350 = vmatprep.subr.bf16.mxu0 %v9175_v36  ;;  %5382 = vmatprep.subr.bf16.mxu1 %v9178_v57  ;;  %9181 = vst [vmem:[#allocation25_spill] sm:$0xff] %v7326_v48  ;;  %v1635_v38 = vld [vmem:[%s9072_s29 + $0x598] sm:$0xff]  ;;  %v9183_v59 = vld [vmem:[#allocation32_spill] sm:$0xff]  ;;  %v9185_v53 = vld [vmem:[#allocation35_spill] sm:$0xff]  ;;  %v9191_v48 = vpack.c.bf16 %v6992_v8, %v6987_v20  ;;  %v5387_v14 = vpack.c.bf16 %v1585_v15, %v1584_v3 }
 0x243   : > { %v9182_v22 = vld [vmem:[#allocation33_spill] sm:$0xff]  ;;  %v9186_v61 = vld [vmem:[#allocation34_spill] sm:$0xff]  ;;  %v9189_v32 = vld [vmem:[#allocation36_spill] sm:$0xff] }
 0x244   : > { %v9184_v62 = vpack.c.bf16 %v9182_v22, %v9183_v59  ;;  %v9187_v36 = vpack.c.bf16 %v9185_v53, %v9186_v61  ;;  %v9188_v42 = vld [vmem:[#allocation37_spill] sm:$0xff]  ;;  %v5389_v22 = vpack.c.bf16 %v1603_v27, %v1602_v0  ;;  %v5421_v59 = vpack.c.bf16 %v1635_v38, %v1634_v9  ;;  %v1604_v20 = vld [vmem:[%s9072_s29 + $0x4a0] sm:$0xff]  ;;  %v1605_v3 = vld [vmem:[%s9072_s29 + $0x4a8] sm:$0xff] }
 0x245   : > { %v9190_v57 = vpack.c.bf16 %v9188_v42, %v9189_v32  ;;  %v1586_v41 = vld [vmem:[%s9072_s29 + $0x410] sm:$0xff]  ;;  %v1587_v54 = vld [vmem:[%s9072_s29 + $0x418] sm:$0xff]  ;;  %v9192_v52 = vld [vmem:[#allocation39_spill] sm:$0xff]  ;;  %v5393_v9 = vpack.c.bf16 %v1605_v3, %v1604_v20 }
 0x246   : > { %5352 = vmatpush3.bf16.msra.mxu0 %v9184_v62  ;;  %5384 = vmatpush3.bf16.msra.mxu1 %v9187_v36  ;;  %v1618_v62 = vld [vmem:[%s9072_s29 + $0x510] sm:$0xff]  ;;  %v1619_v8 = vld [vmem:[%s9072_s29 + $0x518] sm:$0xff]  ;;  %v1636_v15 = vld [vmem:[%s9072_s29 + $0x5a0] sm:$0xff] }
 0x247   : > { %5386 = vmatprep.subr.bf16.mxu0 %v9190_v57  ;;  %5418 = vmatprep.subr.bf16.mxu1 %v9191_v48  ;;  %v1637_v26 = vld [vmem:[%s9072_s29 + $0x5a8] sm:$0xff]  ;;  %v5423_v0 = vpack.c.bf16 %v1619_v8, %v1618_v62  ;;  %v1588_v48 = vld [vmem:[%s9072_s29 + $0x420] sm:$0xff]  ;;  %v1607_v61 = vld [vmem:[%s9072_s29 + $0x4b8] sm:$0xff] }
 0x248   : > { %v1589_v27 = vld [vmem:[%s9072_s29 + $0x428] sm:$0xff]  ;;  %v5425_v38 = vpack.c.bf16 %v1637_v26, %v1636_v15  ;;  %v1620_v53 = vld [vmem:[%s9072_s29 + $0x520] sm:$0xff]  ;;  %v1638_v36 = vld [vmem:[%s9072_s29 + $0x5b0] sm:$0xff] }
 0x249   : > { %1977 = vmatmul.mubr.f32.vlgmr.msra.gmra.mrb[32].mxu0 %v7000_v37  ;;  %2077 = vmatmul.mubr.f32.vlgmr.msra.gmra.mrb[32].mxu1 %v9192_v52  ;;  %v5391_v37 = vpack.c.bf16 %v1587_v54, %v1586_v41  ;;  %v1639_v42 = vld [vmem:[%s9072_s29 + $0x5b8] sm:$0xff]  ;;  %v5395_v32 = vpack.c.bf16 %v1589_v27, %v1588_v48  ;;  %v1590_v41 = vld [vmem:[%s9072_s29 + $0x430] sm:$0xff]  ;;  %v1608_v20 = vld [vmem:[%s9072_s29 + $0x4c0] sm:$0xff] }
 0x24a   : > { %1981 = vmatprep.mubr.f32.mxu0 %v7040_v4  ;;  %2081 = vmatprep.mubr.f32.mxu1 %v7043_v30  ;;  %v1591_v54 = vld [vmem:[%s9072_s29 + $0x438] sm:$0xff]  ;;  %v1622_v62 = vld [vmem:[%s9072_s29 + $0x530] sm:$0xff]  ;;  %v1609_v52 = vld [vmem:[%s9072_s29 + $0x4c8] sm:$0xff] }
 0x24b   : > { %5388 = vmatpush3.bf16.msra.mxu0 %v5387_v14  ;;  %5420 = vmatpush3.bf16.msra.mxu1 %v5419_v56  ;;  %v1621_v56 = vld [vmem:[%s9072_s29 + $0x528] sm:$0xff]  ;;  %v1606_v14 = vld [vmem:[%s9072_s29 + $0x4b0] sm:$0xff]  ;;  %v1623_v8 = vld [vmem:[%s9072_s29 + $0x538] sm:$0xff]  ;;  %v5399_v26 = vpack.c.bf16 %v1591_v54, %v1590_v41  ;;  %v5401_v27 = vpack.c.bf16 %v1609_v52, %v1608_v20 }
 0x24c   : > { %5390 = vmatprep.subr.bf16.mxu0 %v5389_v22  ;;  %5422 = vmatprep.subr.bf16.mxu1 %v5421_v59  ;;  %v5427_v57 = vpack.c.bf16 %v1621_v56, %v1620_v53  ;;  %v5397_v22 = vpack.c.bf16 %v1607_v61, %v1606_v14  ;;  %v5429_v59 = vpack.c.bf16 %v1639_v42, %v1638_v36  ;;  %v1640_v3 = vld [vmem:[%s9072_s29 + $0x5c0] sm:$0xff]  ;;  %v1641_v15 = vld [vmem:[%s9072_s29 + $0x5c8] sm:$0xff]  ;;  %v1610_v56 = vld [vmem:[%s9072_s29 + $0x4d0] sm:$0xff] }
 0x24d   : > { %1982 = vmatmul.mubr.f32.gmra.mrb[34].mxu0 %v7046_v17  ;;  %2082 = vmatmul.mubr.f32.gmra.mrb[34].mxu1 %v7054_v50  ;;  %v1593_v48 = vld [vmem:[%s9072_s29 + $0x448] sm:$0xff]  ;;  %v1611_v14 = vld [vmem:[%s9072_s29 + $0x4d8] sm:$0xff]  ;;  %v1642_v61 = vld [vmem:[%s9072_s29 + $0x5d0] sm:$0xff] }
 0x24e   : > { %1986 = vmatprep.mubr.f32.mxu0 %v7086_v46  ;;  %2086 = vmatprep.mubr.f32.mxu1 %v7089_v13  ;;  %v1625_v53 = vld [vmem:[%s9072_s29 + $0x548] sm:$0xff]  ;;  %v1643_v36 = vld [vmem:[%s9072_s29 + $0x5d8] sm:$0xff]  ;;  %v5405_v54 = vpack.c.bf16 %v1611_v14, %v1610_v56  ;;  %v1644_v52 = vld [vmem:[%s9072_s29 + $0x5e0] sm:$0xff] }
 0x24f   : > { %5392 = vmatpush3.bf16.msra.mxu0 %v5391_v37  ;;  %5424 = vmatpush3.bf16.msra.mxu1 %v5423_v0  ;;  %v5431_v37 = vpack.c.bf16 %v1623_v8, %v1622_v62  ;;  %v1592_v0 = vld [vmem:[%s9072_s29 + $0x440] sm:$0xff]  ;;  %v1595_v41 = vld [vmem:[%s9072_s29 + $0x458] sm:$0xff]  ;;  %v1613_v20 = vld [vmem:[%s9072_s29 + $0x4e8] sm:$0xff] }
 0x250   : > { %5394 = vmatprep.subr.bf16.mxu0 %v5393_v9  ;;  %5426 = vmatprep.subr.bf16.mxu1 %v5425_v38  ;;  %v5433_v9 = vpack.c.bf16 %v1641_v15, %v1640_v3  ;;  %v1624_v38 = vld [vmem:[%s9072_s29 + $0x540] sm:$0xff]  ;;  %v5403_v42 = vpack.c.bf16 %v1593_v48, %v1592_v0  ;;  %v1627_v62 = vld [vmem:[%s9072_s29 + $0x558] sm:$0xff]  ;;  %v1645_v3 = vld [vmem:[%s9072_s29 + $0x5e8] sm:$0xff] }
 0x251   : > { %1987 = vmatmul.mubr.f32.gmra.mrb[36].mxu0 %v7092_v49  ;;  %2087 = vmatmul.mubr.f32.gmra.mrb[36].mxu1 %v7100_v2  ;;  %v1612_v8 = vld [vmem:[%s9072_s29 + $0x4e0] sm:$0xff]  ;;  %v1597_v0 = vld [vmem:[%s9072_s29 + $0x468] sm:$0xff]  ;;  %v1615_v56 = vld [vmem:[%s9072_s29 + $0x4f8] sm:$0xff] }
 0x252   : > { %1991 = vmatprep.mubr.f32.mxu0 %v7132_v45  ;;  %2091 = vmatprep.mubr.f32.mxu1 %v7135_v25  ;;  %v5409_v48 = vpack.c.bf16 %v1613_v20, %v1612_v8  ;;  %v1646_v14 = vld [vmem:[%s9072_s29 + $0x5f0] sm:$0xff]  ;;  %v1665_v8 = vld [vmem:[%s9072_s29 + $0x688] sm:$0xff]  ;;  %v1696_v20 = vld [vmem:[%s9072_s29 + $0x780] sm:$0xff] }
 0x253   : > { %5396 = vmatpush3.bf16.msra.mxu0 %v5395_v32  ;;  %5428 = vmatpush3.bf16.msra.mxu1 %v5427_v57  ;;  %v5435_v32 = vpack.c.bf16 %v1625_v53, %v1624_v38  ;;  %v1594_v57 = vld [vmem:[%s9072_s29 + $0x450] sm:$0xff]  ;;  %v1629_v38 = vld [vmem:[%s9072_s29 + $0x568] sm:$0xff] }
 0x254   : > { %5398 = vmatprep.subr.bf16.mxu0 %v5397_v22  ;;  %5430 = vmatprep.subr.bf16.mxu1 %v5429_v59  ;;  %v5437_v22 = vpack.c.bf16 %v1643_v36, %v1642_v61  ;;  %v1626_v59 = vld [vmem:[%s9072_s29 + $0x550] sm:$0xff]  ;;  %v5407_v15 = vpack.c.bf16 %v1595_v41, %v1594_v57  ;;  %v1647_v61 = vld [vmem:[%s9072_s29 + $0x5f8] sm:$0xff] }
 0x255   : > { %1992 = vmatmul.mubr.f32.gmra.mrb[38].mxu0 %v7138_v40  ;;  %2092 = vmatmul.mubr.f32.gmra.mrb[38].mxu1 %v7146_v47  ;;  %v1614_v53 = vld [vmem:[%s9072_s29 + $0x4f0] sm:$0xff]  ;;  %v1599_v57 = vld [vmem:[%s9072_s29 + $0x478] sm:$0xff] }
 0x256   : > { %1996 = vmatprep.mubr.f32.mxu0 %v7178_v34  ;;  %2096 = vmatprep.mubr.f32.mxu1 %v7181_v35  ;;  %v5413_v41 = vpack.c.bf16 %v1615_v56, %v1614_v53  ;;  %v1699_v53 = vld [vmem:[%s9072_s29 + $0x798] sm:$0xff] }
 0x257   : > { %5400 = vmatpush3.bf16.msra.mxu0 %v5399_v26  ;;  %5432 = vmatpush3.bf16.msra.mxu1 %v5431_v37  ;;  %v5439_v26 = vpack.c.bf16 %v1627_v62, %v1626_v59  ;;  %v1596_v37 = vld [vmem:[%s9072_s29 + $0x460] sm:$0xff]  ;;  %v1631_v59 = vld [vmem:[%s9072_s29 + $0x578] sm:$0xff] }
 0x258   : > { %5402 = vmatprep.subr.bf16.mxu0 %v5401_v27  ;;  %5434 = vmatprep.subr.bf16.mxu1 %v5433_v9  ;;  %v5441_v27 = vpack.c.bf16 %v1645_v3, %v1644_v52  ;;  %v1628_v9 = vld [vmem:[%s9072_s29 + $0x560] sm:$0xff]  ;;  %v5411_v36 = vpack.c.bf16 %v1597_v0, %v1596_v37  ;;  %v1697_v52 = vld [vmem:[%s9072_s29 + $0x788] sm:$0xff] }
 0x259   : > { %1997 = vmatmul.mubr.f32.gmra.mrb[40].mxu0 %v7184_v58  ;;  %2097 = vmatmul.mubr.f32.gmra.mrb[40].mxu1 %v7192_v63  ;;  %v1664_v62 = vld [vmem:[%s9072_s29 + $0x680] sm:$0xff]  ;;  %v5481_v37 = vpack.c.bf16 %v1697_v52, %v1696_v20  ;;  %v1653_v20 = vld [vmem:[%s9072_s29 + $0x628] sm:$0xff] }
 0x25a   : > { %2001 = vmatprep.mubr.f32.mxu0 %v7224_v44  ;;  %2101 = vmatprep.mubr.f32.mxu1 %v7227_v29  ;;  %v1648_v0 = vld [vmem:[%s9072_s29 + $0x600] sm:$0xff] }
 0x25b   : > { %5404 = vmatpush3.bf16.msra.mxu0 %v5403_v42  ;;  %5436 = vmatpush3.bf16.msra.mxu1 %v5435_v32  ;;  %v5443_v42 = vpack.c.bf16 %v1629_v38, %v1628_v9  ;;  %v1598_v32 = vld [vmem:[%s9072_s29 + $0x470] sm:$0xff]  ;;  %v1667_v9 = vld [vmem:[%s9072_s29 + $0x698] sm:$0xff] }
 0x25c   : > { %5406 = vmatprep.subr.bf16.mxu0 %v5405_v54  ;;  %5438 = vmatprep.subr.bf16.mxu1 %v5437_v22  ;;  %v5445_v54 = vpack.c.bf16 %v1647_v61, %v1646_v14  ;;  %v1630_v22 = vld [vmem:[%s9072_s29 + $0x570] sm:$0xff]  ;;  %v5415_v3 = vpack.c.bf16 %v1599_v57, %v1598_v32 }
 0x25d   : > { %2002 = vmatmul.mubr.f32.gmra.mrb[42].mxu0 %v7230_v51  ;;  %2102 = vmatmul.mubr.f32.gmra.mrb[42].mxu1 %v7238_v10  ;;  %v1698_v38 = vld [vmem:[%s9072_s29 + $0x790] sm:$0xff] }
 0x25e   : > { %2006 = vmatprep.mubr.f32.mxu0 %v7268_v1  ;;  %2106 = vmatprep.mubr.f32.mxu1 %v7271_v5  ;;  %v1650_v61 = vld [vmem:[%s9072_s29 + $0x610] sm:$0xff]  ;;  %v5485_v32 = vpack.c.bf16 %v1699_v53, %v1698_v38  ;;  %v1673_v53 = vld [vmem:[%s9072_s29 + $0x6c8] sm:$0xff] }
 0x25f   : > { %5408 = vmatpush3.bf16.msra.mxu0 %v5407_v15  ;;  %5440 = vmatpush3.bf16.msra.mxu1 %v5439_v26  ;;  %v5447_v15 = vpack.c.bf16 %v1631_v59, %v1630_v22  ;;  %v5449_v26 = vpack.c.bf16 %v1665_v8, %v1664_v62  ;;  %v1682_v57 = vld [vmem:[%s9072_s29 + $0x710] sm:$0xff]  ;;  %v1669_v22 = vld [vmem:[%s9072_s29 + $0x6a8] sm:$0xff]  ;;  %v1700_v59 = vld [vmem:[%s9072_s29 + $0x7a0] sm:$0xff] }
 0x260   : > { %5410 = vmatprep.subr.bf16.mxu0 %v5409_v48  ;;  %5442 = vmatprep.subr.bf16.mxu1 %v5441_v27  ;;  %v1649_v48 = vld [vmem:[%s9072_s29 + $0x608] sm:$0xff]  ;;  %v1666_v27 = vld [vmem:[%s9072_s29 + $0x690] sm:$0xff]  ;;  %v1652_v8 = vld [vmem:[%s9072_s29 + $0x620] sm:$0xff] }
 0x261   : > { %2007 = vmatmul.mubr.f32.gmra.mrb[44].mxu0 %v7274_v55  ;;  %2107 = vmatmul.mubr.f32.gmra.mrb[44].mxu1 %v7279_v12  ;;  %v5451_v56 = vpack.c.bf16 %v1649_v48, %v1648_v0  ;;  %v1701_v62 = vld [vmem:[%s9072_s29 + $0x7a8] sm:$0xff]  ;;  %v1703_v0 = vld [vmem:[%s9072_s29 + $0x7b8] sm:$0xff]  ;;  %v1654_v48 = vld [vmem:[%s9072_s29 + $0x630] sm:$0xff] }
 0x262   : > { %2176 = vmatprep.mubr.f32.mxu0 %v7021_v7  ;;  %2276 = vmatprep.mubr.f32.mxu1 %v7024_v60  ;;  %v1680_v60 = vld [vmem:[%s9072_s29 + $0x700] sm:$0xff]  ;;  %v1681_v7 = vld [vmem:[%s9072_s29 + $0x708] sm:$0xff]  ;;  %v9193_v38 = vld [vmem:[#allocation41_spill] sm:$0xff] }
 0x263   : > { %5412 = vmatpush3.bf16.msra.mxu0 %v5411_v36  ;;  %5444 = vmatpush3.bf16.msra.mxu1 %v5443_v42  ;;  %v5483_v14 = vpack.c.bf16 %v1681_v7, %v1680_v60  ;;  %v1651_v36 = vld [vmem:[%s9072_s29 + $0x618] sm:$0xff]  ;;  %v5453_v42 = vpack.c.bf16 %v1667_v9, %v1666_v27  ;;  %v1672_v9 = vld [vmem:[%s9072_s29 + $0x6c0] sm:$0xff] }
 0x264   : > { %5414 = vmatprep.subr.bf16.mxu0 %v5413_v41  ;;  %5446 = vmatprep.subr.bf16.mxu1 %v5445_v54  ;;  %v1683_v41 = vld [vmem:[%s9072_s29 + $0x718] sm:$0xff]  ;;  %v1668_v54 = vld [vmem:[%s9072_s29 + $0x6a0] sm:$0xff] }
 0x265   : > { %v5457_v52 = vpack.c.bf16 %v1669_v22, %v1668_v54  ;;  %v1655_v60 = vld [vmem:[%s9072_s29 + $0x638] sm:$0xff]  ;;  %v1688_v22 = vld [vmem:[%s9072_s29 + $0x740] sm:$0xff] }
 0x267   : > { %5416 = vmatpush3.bf16.msra.mxu0 %v5415_v3  ;;  %5448 = vmatpush3.bf16.msra.mxu1 %v5447_v15  ;;  %v5489_v3 = vpack.c.bf16 %v1701_v62, %v1700_v59  ;;  %v1670_v15 = vld [vmem:[%s9072_s29 + $0x6b0] sm:$0xff]  ;;  %v1689_v59 = vld [vmem:[%s9072_s29 + $0x748] sm:$0xff] }
 0x268   : > { %5450 = vmatprep.subr.bf16.mxu0 %v5449_v26  ;;  %5482 = vmatprep.subr.bf16.mxu1 %v5481_v37  ;;  %v1671_v26 = vld [vmem:[%s9072_s29 + $0x6b8] sm:$0xff]  ;;  %v1702_v37 = vld [vmem:[%s9072_s29 + $0x7b0] sm:$0xff] }
 0x269   : > { %v5461_v7 = vpack.c.bf16 %v1671_v26, %v1670_v15  ;;  %v5493_v27 = vpack.c.bf16 %v1703_v0, %v1702_v37  ;;  %v1674_v62 = vld [vmem:[%s9072_s29 + $0x6d0] sm:$0xff]  ;;  %v5499_v15 = vpack.c.bf16 %v1689_v59, %v1688_v22  ;;  %v1659_v37 = vld [vmem:[%s9072_s29 + $0x658] sm:$0xff] }
 0x26a   : > { %2177 = vmatmul.mubr.f32.vlgmr.msra.gmra.mrb[46].mxu0 %v6969_v16  ;;  %2277 = vmatmul.mubr.f32.vlgmr.msra.gmra.mrb[46].mxu1 %v7033_v23  ;;  %v5455_v16 = vpack.c.bf16 %v1651_v36, %v1650_v61  ;;  %v5487_v23 = vpack.c.bf16 %v1683_v41, %v1682_v57  ;;  %v9194_v61 = vld [vmem:[#allocation43_spill] sm:$0xff]  ;;  %v9195_v36 = vld [vmem:[#allocation44_spill] sm:$0xff]  ;;  %v5465_v41 = vpack.c.bf16 %v1673_v53, %v1672_v9  ;;  %v9205_v22 = vld [vmem:[#allocation21_spill] sm:$0xff] }
 0x26b   : > { %2181 = vmatprep.mubr.f32.mxu0 %v7067_v43  ;;  %2281 = vmatprep.mubr.f32.mxu1 %v7070_v6  ;;  %v1684_v43 = vld [vmem:[%s9072_s29 + $0x720] sm:$0xff]  ;;  %v1685_v6 = vld [vmem:[%s9072_s29 + $0x728] sm:$0xff]  ;;  %v1658_v26 = vld [vmem:[%s9072_s29 + $0x650] sm:$0xff] }
 0x26c   : > { %5452 = vmatpush3.bf16.msra.mxu0 %v5451_v56  ;;  %5484 = vmatpush3.bf16.msra.mxu1 %v5483_v14  ;;  %v1704_v56 = vld [vmem:[%s9072_s29 + $0x7c0] sm:$0xff]  ;;  %v1705_v14 = vld [vmem:[%s9072_s29 + $0x7c8] sm:$0xff]  ;;  %v1679_v59 = vld [vmem:[%s9072_s29 + $0x6f8] sm:$0xff] }
 0x26d   : > { %5454 = vmatprep.subr.bf16.mxu0 %v5453_v42  ;;  %5486 = vmatprep.subr.bf16.mxu1 %v5485_v32  ;;  %v1656_v32 = vld [vmem:[%s9072_s29 + $0x640] sm:$0xff]  ;;  %v1657_v57 = vld [vmem:[%s9072_s29 + $0x648] sm:$0xff]  ;;  %v5497_v54 = vpack.c.bf16 %v1705_v14, %v1704_v56  ;;  %v5471_v56 = vpack.c.bf16 %v1659_v37, %v1658_v26 }
 0x26e   : > { %2182 = vmatmul.mubr.f32.gmra.mrb[48].mxu0 %v6994_v18  ;;  %2282 = vmatmul.mubr.f32.gmra.mrb[48].mxu1 %v7079_v28  ;;  %v5459_v18 = vpack.c.bf16 %v1653_v20, %v1652_v8  ;;  %v5491_v28 = vpack.c.bf16 %v1685_v6, %v1684_v43  ;;  %v1675_v8 = vld [vmem:[%s9072_s29 + $0x6d8] sm:$0xff]  ;;  %v1706_v20 = vld [vmem:[%s9072_s29 + $0x7d0] sm:$0xff]  ;;  %v9199_v43 = vld [vmem:[#allocation15_spill] sm:$0xff]  ;;  %v5467_v6 = vpack.c.bf16 %v1657_v57, %v1656_v32 }
 0x26f   : > { %2186 = vmatprep.mubr.f32.mxu0 %v7113_v33  ;;  %2286 = vmatprep.mubr.f32.mxu1 %v7116_v19  ;;  %v1686_v33 = vld [vmem:[%s9072_s29 + $0x730] sm:$0xff]  ;;  %v1687_v19 = vld [vmem:[%s9072_s29 + $0x738] sm:$0xff]  ;;  %v5469_v0 = vpack.c.bf16 %v1675_v8, %v1674_v62  ;;  %v1709_v9 = vld [vmem:[%s9072_s29 + $0x7e8] sm:$0xff] }
 0x270   : > { %5456 = vmatpush3.bf16.msra.mxu0 %v5455_v16  ;;  %5488 = vmatpush3.bf16.msra.mxu1 %v5487_v23  ;;  %v5495_v42 = vpack.c.bf16 %v1687_v19, %v1686_v33  ;;  %v9196_v16 = vld [vmem:[#allocation40_spill] sm:$0xff]  ;;  %v9197_v23 = vld [vmem:[#allocation45_spill] sm:$0xff]  ;;  %v1708_v19 = vld [vmem:[%s9072_s29 + $0x7e0] sm:$0xff] }
 0x271   : > { %5458 = vmatprep.subr.bf16.mxu0 %v5457_v52  ;;  %5490 = vmatprep.subr.bf16.mxu1 %v5489_v3  ;;  %v1707_v52 = vld [vmem:[%s9072_s29 + $0x7d8] sm:$0xff]  ;;  %v9198_v3 = vld [vmem:[#allocation16_spill] sm:$0xff]  ;;  %v9203_v53 = vld [vmem:[#allocation19_spill] sm:$0xff] }
 0x272   : > { %2187 = vmatmul.mubr.f32.gmra.mrb[50].mxu0 %v7035_v24  ;;  %2287 = vmatmul.mubr.f32.gmra.mrb[50].mxu1 %v9193_v38  ;;  %v5463_v24 = vpack.c.bf16 %v1655_v60, %v1654_v48  ;;  %v1691_v48 = vld [vmem:[%s9072_s29 + $0x758] sm:$0xff]  ;;  %v1676_v60 = vld [vmem:[%s9072_s29 + $0x6e0] sm:$0xff]  ;;  %v1677_v33 = vld [vmem:[%s9072_s29 + $0x6e8] sm:$0xff] }
 0x273   : > { %2191 = vmatprep.mubr.f32.mxu0 %v9194_v61  ;;  %2291 = vmatprep.mubr.f32.mxu1 %v9195_v36  ;;  %v9202_v38 = vld [vmem:[#allocation20_spill] sm:$0xff]  ;;  %v1660_v61 = vld [vmem:[%s9072_s29 + $0x660] sm:$0xff] }
 0x274   : > { %5460 = vmatpush3.bf16.msra.mxu0 %v5459_v18  ;;  %5492 = vmatpush3.bf16.msra.mxu1 %v5491_v28  ;;  %v5501_v18 = vpack.c.bf16 %v1707_v52, %v1706_v20  ;;  %v1690_v28 = vld [vmem:[%s9072_s29 + $0x750] sm:$0xff]  ;;  %v1661_v36 = vld [vmem:[%s9072_s29 + $0x668] sm:$0xff]  ;;  %v1692_v32 = vld [vmem:[%s9072_s29 + $0x760] sm:$0xff] }
 0x275   : > { %5462 = vmatprep.subr.bf16.mxu0 %v5461_v7  ;;  %5494 = vmatprep.subr.bf16.mxu1 %v5493_v27  ;;  %v9200_v7 = vld [vmem:[#allocation42_spill] sm:$0xff]  ;;  %v5503_v14 = vpack.c.bf16 %v1691_v48, %v1690_v28  ;;  %v1693_v57 = vld [vmem:[%s9072_s29 + $0x768] sm:$0xff]  ;;  %v1710_v62 = vld [vmem:[%s9072_s29 + $0x7f0] sm:$0xff] }
 0x276   : > { %2192 = vmatmul.mubr.f32.gmra.mrb[52].mxu0 %v9196_v16  ;;  %2292 = vmatmul.mubr.f32.gmra.mrb[52].mxu1 %v9197_v23  ;;  %v9201_v27 = vld [vmem:[#allocation18_spill] sm:$0xff]  ;;  %v5475_v23 = vpack.c.bf16 %v1661_v36, %v1660_v61  ;;  %v5507_v8 = vpack.c.bf16 %v1693_v57, %v1692_v32  ;;  %v1662_v20 = vld [vmem:[%s9072_s29 + $0x670] sm:$0xff] }
 0x277   : > { %2196 = vmatprep.mubr.f32.mxu0 %v9198_v3  ;;  %2296 = vmatprep.mubr.f32.mxu1 %v9199_v43  ;;  %v1711_v16 = vld [vmem:[%s9072_s29 + $0x7f8] sm:$0xff] }
 0x278   : > { %5464 = vmatpush3.bf16.msra.mxu0 %v5463_v24  ;;  %5496 = vmatpush3.bf16.msra.mxu1 %v5495_v42  ;;  %v5473_v24 = vpack.c.bf16 %v1677_v33, %v1676_v60  ;;  %v5505_v42 = vpack.c.bf16 %v1709_v9, %v1708_v19  ;;  %v5509_v3 = vpack.c.bf16 %v1711_v16, %v1710_v62  ;;  %v1663_v43 = vld [vmem:[%s9072_s29 + $0x678] sm:$0xff]  ;;  %v2742_v16 = vld [vmem:[%s8944_s7 + $0x80] sm:$0xff] }
 0x279   : > { %5466 = vmatprep.subr.bf16.mxu0 %v5465_v41  ;;  %5498 = vmatprep.subr.bf16.mxu1 %v5497_v54  ;;  %v1678_v41 = vld [vmem:[%s9072_s29 + $0x6f0] sm:$0xff]  ;;  %v9204_v54 = vld [vmem:[#allocation46_spill] sm:$0xff] }
 0x27a   : > { %2197 = vmatmul.mubr.f32.gmra.mrb[54].mxu0 %v9200_v7  ;;  %2297 = vmatmul.mubr.f32.gmra.mrb[54].mxu1 %v9201_v27  ;;  %v5477_v52 = vpack.c.bf16 %v1679_v59, %v1678_v41 }
 0x27b   : > { %2201 = vmatprep.mubr.f32.mxu0 %v9202_v38  ;;  %2301 = vmatprep.mubr.f32.mxu1 %v9203_v53 }
 0x27c   : > { %5468 = vmatpush3.bf16.msra.mxu0 %v5467_v6  ;;  %5500 = vmatpush3.bf16.msra.mxu1 %v5499_v15  ;;  %v9206_v6 = vld [vmem:[#allocation17_spill] sm:$0xff]  ;;  %v5479_v15 = vpack.c.bf16 %v1663_v43, %v1662_v20  ;;  %v2727_v43 = vld [vmem:[%s8944_s7 + $0x8] sm:$0xff] }
 0x27d   : > { %5470 = vmatprep.subr.bf16.mxu0 %v5469_v0  ;;  %5502 = vmatprep.subr.bf16.mxu1 %v5501_v18 }
 0x27e   : > { %2202 = vmatmul.mubr.f32.gmra.mrb[56].mxu0 %v9204_v54  ;;  %2302 = vmatmul.mubr.f32.gmra.mrb[56].mxu1 %v9205_v22 }
 0x27f   : > { %2206 = vmatprep.mubr.f32.mxu0 %v7296_v11  ;;  %2306 = vmatprep.mubr.f32.mxu1 %v7299_v31  ;;  %v1694_v11 = vld [vmem:[%s9072_s29 + $0x770] sm:$0xff]  ;;  %v1695_v31 = vld [vmem:[%s9072_s29 + $0x778] sm:$0xff] }
 0x280   : > { %5472 = vmatpush3.bf16.msra.mxu0 %v5471_v56  ;;  %5504 = vmatpush3.bf16.msra.mxu1 %v5503_v14  ;;  %v5511_v26 = vpack.c.bf16 %v1695_v31, %v1694_v11  ;;  %v9210_v14 = vmov 0.0   ;;  %v2744_v31 = vld [vmem:[%s8944_s7 + $0x90] sm:$0xff] }
 0x281   : > { %5474 = vmatprep.subr.bf16.mxu0 %v5473_v24  ;;  %5506 = vmatprep.subr.bf16.mxu1 %v5505_v42  ;;  %v7795_v36 = vsel %vm6201_vm3, 1.0, %v9210_v14  ;;  %vm9213_vm3 = vmmov %vm9132_vm4 }
 0x282   : > { %2207 = vmatmul.mubr.f32.gmra.mrb[58].mxu0 %v9206_v6  ;;  %2307 = vmatmul.mubr.f32.gmra.mrb[58].mxu1 %v7302_v39  ;;  %vm9214_vm14 = vmmov %vm9213_vm3 }
 0x283   : > { %2376 = vmatprep.mubr.f32.mxu0 %v7040_v4  ;;  %2476 = vmatprep.mubr.f32.mxu1 %v7043_v30  ;;  %v9207_v4 = vld [vmem:[#allocation23_spill] sm:$0xff]  ;;  %v9208_v30 = vld [vmem:[#allocation22_spill] sm:$0xff]  ;;  %vm9215_vm4 = vmmov %vm9213_vm3 }
 0x284   : > { %5476 = vmatpush3.bf16.msra.mxu0 %v5475_v23  ;;  %5508 = vmatpush3.bf16.msra.mxu1 %v5507_v8  ;;  %v2743_v23 = vld [vmem:[%s8944_s7 + $0x88] sm:$0xff]  ;;  %v2726_v8 = vld [vmem:[%s8944_s7] sm:$0xff]  ;;  %vm9216_vm6 = vmmov %vm9213_vm3 }
 0x285   : > { %5478 = vmatprep.subr.bf16.mxu0 %v5477_v52  ;;  %5510 = vmatprep.subr.bf16.mxu1 %v5509_v3  ;;  %v5525_v3 = vpack.c.bf16 %v2743_v23, %v2742_v16  ;;  %v5527_v11 = vpack.c.bf16 %v2727_v43, %v2726_v8  ;;  %v2736_v23 = vld [vmem:[%s8944_s7 + $0x50] sm:$0xff]  ;;  %v2754_v8 = vld [vmem:[%s8944_s7 + $0xe0] sm:$0xff]  ;;  %vm9217_vm13 = vmmov %vm9213_vm3 }
 0x286   : > { %vm9218_vm11 = vmmov %vm9213_vm3 }
 0x288   : > { %5480 = vmatpush3.bf16.msra.mxu0 %v5479_v15  ;;  %5512 = vmatpush3.bf16.msra.mxu1 %v5511_v26  ;;  %v2745_v15 = vld [vmem:[%s8944_s7 + $0x98] sm:$0xff]  ;;  %v2728_v26 = vld [vmem:[%s8944_s7 + $0x10] sm:$0xff] }
 0x289   : > { %5526 = vmatprep.subr.bf16.mxu1 %v5525_v3 }
 0x28b   : > { %2377 = vmatmul.mubr.f32.vlgmr.msra.gmra.mrb[60].mxu0 %v7046_v17  ;;  %2477 = vmatmul.mubr.f32.vlgmr.msra.gmra.mrb[60].mxu1 %v7054_v50  ;;  %v9209_v17 = vld [vmem:[#allocation25_spill] sm:$0xff] }
 0x28c   : > { %2381 = vmatprep.mubr.f32.mxu0 %v7086_v46  ;;  %2481 = vmatprep.mubr.f32.mxu1 %v7089_v13 }
 0x28d   : > { %5528 = vmatpush3.bf16.msra.mxu1 %v5527_v11 }
 0x28f   : > { %2382 = vmatmul.mubr.f32.gmra.mrb[62].mxu0 %v7092_v49  ;;  %2482 = vmatmul.mubr.f32.gmra.mrb[62].mxu1 %v7100_v2 }
 0x290   : > { %2386 = vmatprep.mubr.f32.mxu0 %v7132_v45  ;;  %2486 = vmatprep.mubr.f32.mxu1 %v7135_v25 }
 0x293   : > { %2387 = vmatmul.mubr.f32.gmra.mrb[64].mxu0 %v7138_v40  ;;  %2487 = vmatmul.mubr.f32.gmra.mrb[64].mxu1 %v7146_v47 }
 0x294   : > { %2391 = vmatprep.mubr.f32.mxu0 %v7178_v34  ;;  %2491 = vmatprep.mubr.f32.mxu1 %v7181_v35 }
 0x297   : > { %2392 = vmatmul.mubr.f32.gmra.mrb[66].mxu0 %v7184_v58  ;;  %2492 = vmatmul.mubr.f32.gmra.mrb[66].mxu1 %v7192_v63 }
 0x298   : > { %2396 = vmatprep.mubr.f32.mxu0 %v7224_v44  ;;  %2496 = vmatprep.mubr.f32.mxu1 %v7227_v29 }
 0x29b   : > { %2397 = vmatmul.mubr.f32.gmra.mrb[68].mxu0 %v7230_v51  ;;  %2497 = vmatmul.mubr.f32.gmra.mrb[68].mxu1 %v7238_v10 }
 0x29c   : > { %2401 = vmatprep.mubr.f32.mxu0 %v7268_v1  ;;  %2501 = vmatprep.mubr.f32.mxu1 %v7271_v5 }
 0x29f   : > { %2402 = vmatmul.mubr.f32.gmra.mrb[70].mxu0 %v7274_v55  ;;  %2502 = vmatmul.mubr.f32.gmra.mrb[70].mxu1 %v7279_v12 }
 0x2a0   : > { %2406 = vmatprep.mubr.f32.mxu0 %v9207_v4  ;;  %2506 = vmatprep.mubr.f32.mxu1 %v9208_v30  ;;  %v2729_v4 = vld [vmem:[%s8944_s7 + $0x18] sm:$0xff]  ;;  %v5529_v30 = vpack.c.bf16 %v2745_v15, %v2744_v31 }
 0x2a2   : > { %5530 = vmatprep.subr.bf16.mxu1 %v5529_v30 }
 0x2a3   : > { %2407 = vmatmul.mubr.f32.gmra.mrb[72].mxu0 %v9209_v17  ;;  %2507 = vmatmul.mubr.f32.gmra.mrb[72].mxu1 %v7338_v21  ;;  %v5531_v17 = vpack.c.bf16 %v2729_v4, %v2728_v26 }
 0x2a4   : > { %5087 = vmatprep.mubr.msk.f32.mxu0 %vm2581_vm2, %v7795_v36 }
 0x2a5   : > { %5532 = vmatpush3.bf16.msra.mxu1 %v5531_v17 }
 0x2f3   : > { %v4277_v50 = vpop.f32.mrb[18].mxu0  ;;  %v4330_v46 = vpop.f32.mrb[18].mxu1 }
 0x2f4   : > { %v4278_v13 = vpop.f32.mrb[19].mxu0  ;;  %v4331_v49 = vpop.f32.mrb[19].mxu1 }
 0x2f5   : > { %v4279_v2 = vadd.f32 %v4278_v13, %v4277_v50  ;;  %v4332_v45 = vadd.f32 %v4331_v49, %v4330_v46  ;;  %v2746_v50 = vld [vmem:[%s8944_s7 + $0xa0] sm:$0xff]  ;;  %v2747_v46 = vld [vmem:[%s8944_s7 + $0xa8] sm:$0xff] }
 0x2f6   : > { %v5533_v13 = vpack.c.bf16 %v2747_v46, %v2746_v50  ;;  %v2730_v49 = vld [vmem:[%s8944_s7 + $0x20] sm:$0xff]  ;;  %v2739_v46 = vld [vmem:[%s8944_s7 + $0x68] sm:$0xff] }
 0x2f7   : > { %v7782_v25 = vadd.f32 %v4332_v45, %v4279_v2  ;;  %v2731_v2 = vld [vmem:[%s8944_s7 + $0x28] sm:$0xff]  ;;  %v2738_v50 = vld [vmem:[%s8944_s7 + $0x60] sm:$0xff] }
 0x2f8   : > { %5534 = vmatprep.subr.bf16.mxu1 %v5533_v13 }
 0x2f9   : > { %v4280_v40 = vpop.f32.mrb[20].mxu0  ;;  %v4333_v47 = vpop.f32.mrb[20].mxu1 }
 0x2fa   : > { %v4281_v34 = vpop.f32.mrb[21].mxu0  ;;  %v4334_v35 = vpop.f32.mrb[21].mxu1 }
 0x2fb   : > { %v4282_v58 = vadd.f32 %v4281_v34, %v4280_v40  ;;  %v4335_v63 = vadd.f32 %v4334_v35, %v4333_v47  ;;  %v5535_v35 = vpack.c.bf16 %v2731_v2, %v2730_v49 }
 0x2fd   : > { %v7784_v44 = vadd.f32 %v4335_v63, %v4282_v58  ;;  %v4283_v29 = vpop.f32.mrb[22].mxu0  ;;  %v2748_v58 = vld [vmem:[%s8944_s7 + $0xb0] sm:$0xff]  ;;  %v2749_v63 = vld [vmem:[%s8944_s7 + $0xb8] sm:$0xff]  ;;  %5536 = vmatpush3.bf16.msra.mxu1 %v5535_v35 }
 0x2fe   : > { %v4336_v51 = vpop.f32.mrb[22].mxu1  ;;  %v4284_v10 = vpop.f32.mrb[23].mxu0 }
 0x2ff   : > { %v4337_v1 = vpop.f32.mrb[23].mxu1  ;;  %v4285_v5 = vadd.f32 %v4284_v10, %v4283_v29  ;;  %v5537_v10 = vpack.c.bf16 %v2749_v63, %v2748_v58 }
 0x300   : > { %v4338_v55 = vadd.f32 %v4337_v1, %v4336_v51  ;;  %v2732_v1 = vld [vmem:[%s8944_s7 + $0x30] sm:$0xff] }
 0x301   : > { %5538 = vmatprep.subr.bf16.mxu1 %v5537_v10 }
 0x302   : > { %v7786_v12 = vadd.f32 %v4338_v55, %v4285_v5  ;;  %v4286_v39 = vpop.f32.mrb[24].mxu0  ;;  %v4339_v21 = vpop.f32.mrb[24].mxu1  ;;  %v2733_v5 = vld [vmem:[%s8944_s7 + $0x38] sm:$0xff]  ;;  %v2750_v55 = vld [vmem:[%s8944_s7 + $0xc0] sm:$0xff] }
 0x303   : > { %v4287_v37 = vpop.f32.mrb[25].mxu0  ;;  %v4340_v0 = vpop.f32.mrb[25].mxu1 }
 0x304   : > { %v4288_v18 = vadd.f32 %v4287_v37, %v4286_v39  ;;  %v4341_v28 = vadd.f32 %v4340_v0, %v4339_v21  ;;  %v2751_v0 = vld [vmem:[%s8944_s7 + $0xc8] sm:$0xff] }
 0x306   : > { %v7788_v48 = vadd.f32 %v4341_v28, %v4288_v18 }
 0x307   : > { %v4289_v60 = vpop.f32.mrb[26].mxu0  ;;  %v4342_v7 = vpop.f32.mrb[26].mxu1 }
 0x308   : > { %v4290_v27 = vpop.f32.mrb[27].mxu0  ;;  %v4343_v33 = vpop.f32.mrb[27].mxu1 }
 0x309   : > { %v4291_v19 = vadd.f32 %v4290_v27, %v4289_v60  ;;  %v4344_v9 = vadd.f32 %v4343_v33, %v4342_v7  ;;  %v5539_v60 = vpack.c.bf16 %v2733_v5, %v2732_v1 }
 0x30b   : > { %v7790_v38 = vadd.f32 %v4344_v9, %v4291_v19  ;;  %v4292_v53 = vpop.f32.mrb[28].mxu0  ;;  %v5541_v19 = vpack.c.bf16 %v2751_v0, %v2750_v55  ;;  %v2735_v9 = vld [vmem:[%s8944_s7 + $0x48] sm:$0xff]  ;;  %5540 = vmatpush3.bf16.msra.mxu1 %v5539_v60 }
 0x30c   : > { %v4345_v56 = vpop.f32.mrb[28].mxu1  ;;  %v4293_v24 = vpop.f32.mrb[29].mxu0 }
 0x30d   : > { %v4346_v42 = vpop.f32.mrb[29].mxu1  ;;  %v4294_v32 = vadd.f32 %v4293_v24, %v4292_v53  ;;  %v2752_v53 = vld [vmem:[%s8944_s7 + $0xd0] sm:$0xff]  ;;  %5542 = vmatprep.subr.bf16.mxu1 %v5541_v19 }
 0x30e   : > { %v4347_v57 = vadd.f32 %v4346_v42, %v4345_v56  ;;  %v2753_v56 = vld [vmem:[%s8944_s7 + $0xd8] sm:$0xff] }
 0x30f   : > { %v5545_v16 = vpack.c.bf16 %v2753_v56, %v2752_v53 }
 0x310   : > { %v7799_v41 = vadd.f32 %v4347_v57, %v4294_v32  ;;  %v4295_v54 = vpop.f32.mrb[30].mxu0  ;;  %v4348_v22 = vpop.f32.mrb[30].mxu1 }
 0x311   : > { %v4296_v59 = vpop.f32.mrb[31].mxu0  ;;  %v4349_v62 = vpop.f32.mrb[31].mxu1 }
 0x312   : > { %v4297_v20 = vadd.f32 %v4296_v59, %v4295_v54  ;;  %v4350_v52 = vadd.f32 %v4349_v62, %v4348_v22 }
 0x314   : > { %v7816_v6 = vadd.f32 %v4350_v52, %v4297_v20  ;;  %v2755_v20 = vld [vmem:[%s8944_s7 + $0xe8] sm:$0xff] }
 0x315   : > { %v5549_v17 = vpack.c.bf16 %v2755_v20, %v2754_v8 }
 0x31c   : > { %v4383_v45 = vpop.f32.mrb[32].mxu0  ;;  %v4436_v40 = vpop.f32.mrb[32].mxu1 }
 0x31d   : > { %v4384_v47 = vpop.f32.mrb[33].mxu0  ;;  %v4437_v34 = vpop.f32.mrb[33].mxu1 }
 0x31e   : > { %v4385_v29 = vadd.f32 %v4384_v47, %v4383_v45  ;;  %v4438_v51 = vadd.f32 %v4437_v34, %v4436_v40  ;;  %v5551_v40 = vpack.c.bf16 %v2739_v46, %v2738_v50 }
 0x320   : > { %v1979_v39 = vadd.f32 %v4385_v29, %v7782_v25  ;;  %v4386_v21 = vpop.f32.mrb[34].mxu0  ;;  %v4439_v37 = vpop.f32.mrb[34].mxu1  ;;  %v2734_v25 = vld [vmem:[%s8944_s7 + $0x40] sm:$0xff] }
 0x321   : > { %v4387_v18 = vpop.f32.mrb[35].mxu0  ;;  %v4440_v28 = vpop.f32.mrb[35].mxu1  ;;  %v5543_v54 = vpack.c.bf16 %v2735_v9, %v2734_v25 }
 0x322   : > { %v7858_v7 = vadd.f32 %v4438_v51, %v1979_v39  ;;  %v4388_v27 = vadd.f32 %v4387_v18, %v4386_v21  ;;  %v4441_v33 = vadd.f32 %v4440_v28, %v4439_v37 }
 0x323   : > { %5544 = vmatpush3.bf16.msra.mxu1 %v5543_v54 }
 0x324   : > { %v1984_v61 = vadd.f32 %v4388_v27, %v7784_v44  ;;  %v4389_v24 = vpop.f32.mrb[36].mxu0  ;;  %v4442_v42 = vpop.f32.mrb[36].mxu1  ;;  %v2737_v44 = vld [vmem:[%s8944_s7 + $0x58] sm:$0xff]  ;;  %5546 = vmatprep.subr.bf16.mxu1 %v5545_v16 }
 0x325   : > { %v4390_v32 = vpop.f32.mrb[37].mxu0  ;;  %v4443_v57 = vpop.f32.mrb[37].mxu1  ;;  %v5547_v15 = vpack.c.bf16 %v2737_v44, %v2736_v23 }
 0x326   : > { %v7873_v22 = vadd.f32 %v4441_v33, %v1984_v61  ;;  %v4391_v59 = vadd.f32 %v4390_v32, %v4389_v24  ;;  %v4444_v62 = vadd.f32 %v4443_v57, %v4442_v42 }
 0x327   : > { %5548 = vmatpush3.bf16.msra.mxu1 %v5547_v15 }
 0x328   : > { %v1989_v52 = vadd.f32 %v4391_v59, %v7786_v12  ;;  %v4392_v3 = vpop.f32.mrb[38].mxu0  ;;  %v4445_v43 = vpop.f32.mrb[38].mxu1  ;;  %5550 = vmatprep.subr.bf16.mxu1 %v5549_v17 }
 0x329   : > { %v4393_v11 = vpop.f32.mrb[39].mxu0  ;;  %v4446_v31 = vpop.f32.mrb[39].mxu1 }
 0x32a   : > { %v2089_v26 = vadd.f32 %v4444_v62, %v1989_v52  ;;  %v4394_v4 = vadd.f32 %v4393_v11, %v4392_v3  ;;  %v4447_v30 = vadd.f32 %v4446_v31, %v4445_v43 }
 0x32b   : > { %5552 = vmatpush3.bf16.msra.mxu1 %v5551_v40 }
 0x32c   : > { %v1994_v12 = vadd.f32 %v4394_v4, %v7788_v48  ;;  %v4395_v13 = vpop.f32.mrb[40].mxu0  ;;  %v4448_v49 = vpop.f32.mrb[40].mxu1 }
 0x32d   : > { %v4396_v2 = vpop.f32.mrb[41].mxu0  ;;  %v4449_v45 = vpop.f32.mrb[41].mxu1 }
 0x32e   : > { %v2094_v47 = vadd.f32 %v4447_v30, %v1994_v12  ;;  %v4397_v34 = vadd.f32 %v4396_v2, %v4395_v13  ;;  %v4450_v35 = vadd.f32 %v4449_v45, %v4448_v49 }
 0x330   : > { %v1999_v58 = vadd.f32 %v4397_v34, %v7790_v38  ;;  %v4398_v63 = vpop.f32.mrb[42].mxu0  ;;  %v4451_v29 = vpop.f32.mrb[42].mxu1 }
 0x331   : > { %v4399_v51 = vpop.f32.mrb[43].mxu0  ;;  %v4452_v10 = vpop.f32.mrb[43].mxu1 }
 0x332   : > { %v2099_v1 = vadd.f32 %v4450_v35, %v1999_v58  ;;  %v4400_v5 = vadd.f32 %v4399_v51, %v4398_v63  ;;  %v4453_v48 = vadd.f32 %v4452_v10, %v4451_v29 }
 0x334   : > { %v2004_v55 = vadd.f32 %v4400_v5, %v7799_v41  ;;  %v4401_v39 = vpop.f32.mrb[44].mxu0  ;;  %v4454_v21 = vpop.f32.mrb[44].mxu1 }
 0x335   : > { %v4402_v37 = vpop.f32.mrb[45].mxu0  ;;  %v4455_v0 = vpop.f32.mrb[45].mxu1 }
 0x336   : > { %v2104_v18 = vadd.f32 %v4453_v48, %v2004_v55  ;;  %v4403_v28 = vadd.f32 %v4402_v37, %v4401_v39  ;;  %v4456_v60 = vadd.f32 %v4455_v0, %v4454_v21 }
 0x338   : > { %v2009_v27 = vadd.f32 %v4403_v28, %v7816_v6 }
 0x33a   : > { %v2109_v38 = vadd.f32 %v4456_v60, %v2009_v27 }
 0x33d   : > { %v4489_v33 = vpop.f32.mrb[46].mxu0  ;;  %v4542_v19 = vpop.f32.mrb[46].mxu1 }
 0x33e   : > { %v4490_v25 = vpop.f32.mrb[47].mxu0  ;;  %v4543_v9 = vpop.f32.mrb[47].mxu1 }
 0x33f   : > { %v4491_v53 = vadd.f32 %v4490_v25, %v4489_v33  ;;  %v4544_v56 = vadd.f32 %v4543_v9, %v4542_v19 }
 0x341   : > { %v2179_v61 = vadd.f32 %v4491_v53, %v7858_v7  ;;  %v4492_v24 = vpop.f32.mrb[48].mxu0  ;;  %v4545_v41 = vpop.f32.mrb[48].mxu1  ;;  %v7909_v53 = vld [vmem:[%s9212_s24] ss:$0 sm:$0xff]  ;;  %s5906_s24 = sshll.u32 %s5971_s3, 4  ;;  %s5907_s24 = int_to_ptr.vmem [resolvable:$false] %s5906_s24 }
 0x342   : > { %v4493_v42 = vpop.f32.mrb[49].mxu0  ;;  %v4546_v32 = vpop.f32.mrb[49].mxu1  ;;  %p5909_p0 = scmp.lt.s32.totalorder %s8897_s4, %s5907_s24 }
 0x343   : > { %v2279_v57 = vadd.f32 %v4544_v56, %v2179_v61  ;;  %v4494_v54 = vadd.f32 %v4493_v42, %v4492_v24  ;;  %v4547_v59 = vadd.f32 %v4546_v32, %v4545_v41  ;;  %v7914_v42 = vld [vmem:[%s8943_s6] ss:$0 sm:$0xff] }
 0x345   : > { %v2184_v62 = vadd.f32 %v4494_v54, %v7873_v22  ;;  %v4495_v16 = vpop.f32.mrb[50].mxu0  ;;  %v4548_v6 = vpop.f32.mrb[50].mxu1 }
 0x346   : > { %v4496_v23 = vpop.f32.mrb[51].mxu0  ;;  %v4549_v44 = vpop.f32.mrb[51].mxu1 }
 0x347   : > { %v2284_v8 = vadd.f32 %v4547_v59, %v2184_v62  ;;  %v4497_v20 = vadd.f32 %v4496_v23, %v4495_v16  ;;  %v4550_v52 = vadd.f32 %v4549_v44, %v4548_v6 }
 0x349   : > { %v2189_v3 = vadd.f32 %v4497_v20, %v2089_v26  ;;  %v4498_v43 = vpop.f32.mrb[52].mxu0  ;;  %v4551_v11 = vpop.f32.mrb[52].mxu1 }
 0x34a   : > { %v4499_v7 = vpop.f32.mrb[53].mxu0  ;;  %v4552_v31 = vpop.f32.mrb[53].mxu1 }
 0x34b   : > { %v2289_v15 = vadd.f32 %v4550_v52, %v2189_v3  ;;  %v4500_v4 = vadd.f32 %v4499_v7, %v4498_v43  ;;  %v4553_v30 = vadd.f32 %v4552_v31, %v4551_v11 }
 0x34d   : > { %v2194_v17 = vadd.f32 %v4500_v4, %v2094_v47  ;;  %v4501_v50 = vpop.f32.mrb[54].mxu0  ;;  %v4554_v46 = vpop.f32.mrb[54].mxu1 }
 0x34e   : > { %v4502_v12 = vpop.f32.mrb[55].mxu0  ;;  %v4555_v22 = vpop.f32.mrb[55].mxu1 }
 0x34f   : > { %v2294_v13 = vadd.f32 %v4553_v30, %v2194_v17  ;;  %v4503_v49 = vadd.f32 %v4502_v12, %v4501_v50  ;;  %v4556_v2 = vadd.f32 %v4555_v22, %v4554_v46 }
 0x351   : > { %v2199_v45 = vadd.f32 %v4503_v49, %v2099_v1  ;;  %v4504_v40 = vpop.f32.mrb[56].mxu0  ;;  %v4557_v34 = vpop.f32.mrb[56].mxu1 }
 0x352   : > { %v4505_v35 = vpop.f32.mrb[57].mxu0  ;;  %v4558_v26 = vpop.f32.mrb[57].mxu1 }
 0x353   : > { %v7900_v58 = vadd.f32 %v4556_v2, %v2199_v45  ;;  %v4506_v63 = vadd.f32 %v4505_v35, %v4504_v40  ;;  %v4559_v29 = vadd.f32 %v4558_v26, %v4557_v34 }
 0x355   : > { %v2204_v51 = vadd.f32 %v4506_v63, %v2104_v18  ;;  %v4507_v10 = vpop.f32.mrb[58].mxu0  ;;  %v4560_v5 = vpop.f32.mrb[58].mxu1 }
 0x356   : > { %v4508_v47 = vpop.f32.mrb[59].mxu0  ;;  %v4561_v48 = vpop.f32.mrb[59].mxu1 }
 0x357   : > { %v7902_v55 = vadd.f32 %v4559_v29, %v2204_v51  ;;  %v4509_v39 = vadd.f32 %v4508_v47, %v4507_v10  ;;  %v4562_v21 = vadd.f32 %v4561_v48, %v4560_v5 }
 0x359   : > { %v2209_v37 = vadd.f32 %v4509_v39, %v2109_v38 }
 0x35b   : > { %v7904_v0 = vadd.f32 %v4562_v21, %v2209_v37 }
 0x35e   : > { %v4595_v1 = vpop.f32.mrb[60].mxu0  ;;  %v4648_v28 = vpop.f32.mrb[60].mxu1 }
 0x35f   : > { %v4596_v60 = vpop.f32.mrb[61].mxu0  ;;  %v4649_v27 = vpop.f32.mrb[61].mxu1 }
 0x360   : > { %v4597_v33 = vadd.f32 %v4596_v60, %v4595_v1  ;;  %v4650_v19 = vadd.f32 %v4649_v27, %v4648_v28 }
 0x362   : > { %v2379_v25 = vadd.f32 %v4597_v33, %v2279_v57  ;;  %v4598_v9 = vpop.f32.mrb[62].mxu0  ;;  %v4651_v18 = vpop.f32.mrb[62].mxu1 }
 0x363   : > { %v4599_v56 = vpop.f32.mrb[63].mxu0  ;;  %v4652_v61 = vpop.f32.mrb[63].mxu1 }
 0x364   : > { %v2479_v24 = vadd.f32 %v4650_v19, %v2379_v25  ;;  %v4600_v38 = vadd.f32 %v4599_v56, %v4598_v9  ;;  %v4653_v41 = vadd.f32 %v4652_v61, %v4651_v18 }
 0x366   : > { %v2519_v32 = vmul.f32 %v7909_v53, %v2479_v24  ;;  %v2384_v57 = vadd.f32 %v4600_v38, %v2284_v8  ;;  %v4601_v54 = vpop.f32.mrb[64].mxu0  ;;  %v4654_v59 = vpop.f32.mrb[64].mxu1 }
 0x367   : > { %v4602_v62 = vpop.f32.mrb[65].mxu0  ;;  %v4655_v16 = vpop.f32.mrb[65].mxu1 }
 0x368   : > { %v2533_v6 = vadd.f32 %v7914_v42, %v2519_v32  ;;  %v2484_v23 = vadd.f32 %v4653_v41, %v2384_v57  ;;  %v4603_v44 = vadd.f32 %v4602_v62, %v4601_v54  ;;  %v4656_v20 = vadd.f32 %v4655_v16, %v4654_v59 }
 0x36a   : > { %v2520_v52 = vmul.f32 %v7909_v53, %v2484_v23  ;;  %v2389_v3 = vadd.f32 %v4603_v44, %v2289_v15  ;;  %v4604_v43 = vpop.f32.mrb[66].mxu0  ;;  %v4657_v11 = vpop.f32.mrb[66].mxu1  ;;  %v2540_v7 = vmax.f32 %v2533_v6, 0.0 }
 0x36b   : > { %v4605_v31 = vpop.f32.mrb[67].mxu0  ;;  %v4658_v4 = vpop.f32.mrb[67].mxu1 }
 0x36c   : > { %v2534_v30 = vadd.f32 %v7914_v42, %v2520_v52  ;;  %v2489_v8 = vadd.f32 %v4656_v20, %v2389_v3  ;;  %v4606_v17 = vadd.f32 %v4605_v31, %v4604_v43  ;;  %v4659_v50 = vadd.f32 %v4658_v4, %v4657_v11 }
 0x36d   : > { %v2554_v45 = vrot.slane %v2540_v7, 1 }
 0x36e   : > { %v2541_v46 = vmax.f32 %v2534_v30, 0.0  ;;  %v2521_v12 = vmul.f32 %v7909_v53, %v2489_v8  ;;  %v2394_v22 = vadd.f32 %v4606_v17, %v2294_v13  ;;  %v4607_v49 = vpop.f32.mrb[68].mxu0  ;;  %v4660_v2 = vpop.f32.mrb[68].mxu1 }
 0x36f   : > { %v4608_v40 = vpop.f32.mrb[69].mxu0  ;;  %v4661_v34 = vpop.f32.mrb[69].mxu1 }
 0x370   : > { %v2555_v15 = vrot.slane %v2541_v46, 1  ;;  %v2535_v35 = vadd.f32 %v7914_v42, %v2521_v12  ;;  %v2494_v26 = vadd.f32 %v4659_v50, %v2394_v22  ;;  %v4609_v63 = vadd.f32 %v4608_v40, %v4607_v49  ;;  %v2759_v40 = vld [vmem:[%s8944_s7 + $0x108] sm:$0xff] }
 0x371   : > { %v4662_v29 = vadd.f32 %v4661_v34, %v4660_v2  ;;  %v2776_v34 = vld [vmem:[%s8944_s7 + $0x190] sm:$0xff] }
 0x372   : > { %v2542_v51 = vmax.f32 %v2535_v35, 0.0  ;;  %v2522_v10 = vmul.f32 %v7909_v53, %v2494_v26  ;;  %v2399_v5 = vadd.f32 %v4609_v63, %v7900_v58  ;;  %v4610_v47 = vpop.f32.mrb[70].mxu0  ;;  %v4663_v48 = vpop.f32.mrb[70].mxu1  ;;  %v2556_v13 = vsel %vm9213_vm3, %v2554_v45, %v2555_v15  ;;  %v2758_v45 = vld [vmem:[%s8944_s7 + $0x100] sm:$0xff] }
 0x373   : > { %v4611_v39 = vpop.f32.mrb[71].mxu0  ;;  %v4664_v21 = vpop.f32.mrb[71].mxu1  ;;  %v2574_v37 = vmax.f32 %v2540_v7, %v2556_v13  ;;  %v7961_v63 = vsel %vm6211_vm5, 1.0, %v9210_v14  ;;  %v2778_v13 = vld [vmem:[%s8944_s7 + $0x1a0] sm:$0xff]  ;;  %vm9224_vm5 = vmmov %vm9213_vm3 }
 0x374   : > { %v2557_v1 = vrot.slane %v2542_v51, 1  ;;  %v2536_v28 = vadd.f32 %v7914_v42, %v2522_v10  ;;  %v2499_v60 = vadd.f32 %v4662_v29, %v2399_v5  ;;  %v4612_v27 = vadd.f32 %v4611_v39, %v4610_v47  ;;  %v2760_v47 = vld [vmem:[%s8944_s7 + $0x110] sm:$0xff]  ;;  %v2779_v39 = vld [vmem:[%s8944_s7 + $0x1a8] sm:$0xff] }
 0x375   : > { %v4665_v33 = vadd.f32 %v4664_v21, %v4663_v48  ;;  %v5559_v29 = vpack.c.bf16 %v2759_v40, %v2758_v45  ;;  %v1111_v10 = vsel %vm6219_vm7, 1.0, %v9210_v14  ;;  %v2761_v48 = vld [vmem:[%s8944_s7 + $0x118] sm:$0xff]  ;;  %v2792_v21 = vld [vmem:[%s8944_s7 + $0x210] sm:$0xff]  ;;  %vm9225_vm7 = vmmov %vm9213_vm3 }
 0x376   : > { %v2543_v19 = vmax.f32 %v2536_v28, 0.0  ;;  %v2523_v25 = vmul.f32 %v7909_v53, %v2499_v60  ;;  %v2404_v9 = vadd.f32 %v4612_v27, %v7902_v55  ;;  %v4613_v18 = vpop.f32.mrb[72].mxu0  ;;  %v4666_v58 = vpop.f32.mrb[72].mxu1  ;;  %v2558_v56 = vsel %vm9214_vm14, %v2555_v15, %v2557_v1  ;;  %v2777_v15 = vld [vmem:[%s8944_s7 + $0x198] sm:$0xff]  ;;  %vm9221_vm14 = vmmov %vm9213_vm3  ;;  %v2762_v60 = vld [vmem:[%s8944_s7 + $0x120] sm:$0xff] }
 0x377   : > { %v4614_v61 = vpop.f32.mrb[73].mxu0  ;;  %v4667_v24 = vpop.f32.mrb[73].mxu1  ;;  %v2575_v38 = vmax.f32 %v2541_v46, %v2558_v56  ;;  %v5561_v5 = vpack.c.bf16 %v2777_v15, %v2776_v34  ;;  %v5565_v28 = vpack.c.bf16 %v2779_v39, %v2778_v13  ;;  %v2763_v27 = vld [vmem:[%s8944_s7 + $0x128] sm:$0xff]  ;;  %v2782_v56 = vld [vmem:[%s8944_s7 + $0x1c0] sm:$0xff] }
 0x378   : > { %v2559_v41 = vrot.slane %v2543_v19, 1  ;;  %v2537_v32 = vadd.f32 %v7914_v42, %v2523_v25  ;;  %v2504_v57 = vadd.f32 %v4665_v33, %v2404_v9  ;;  %v4615_v54 = vadd.f32 %v4614_v61, %v4613_v18  ;;  %v2780_v33 = vld [vmem:[%s8944_s7 + $0x1b0] sm:$0xff]  ;;  %v2783_v61 = vld [vmem:[%s8944_s7 + $0x1c8] sm:$0xff] }
 0x379   : > { %v4668_v59 = vadd.f32 %v4667_v24, %v4666_v58  ;;  %v5513_v62 = vpack.c.bf16 %v2575_v38, %v2574_v37  ;;  %v1113_v37 = vsel %vm6227_vm9, 1.0, %v9210_v14  ;;  %v5567_v25 = vpack.c.bf16 %v2763_v27, %v2762_v60  ;;  %v2764_v18 = vld [vmem:[%s8944_s7 + $0x130] sm:$0xff]  ;;  %v2765_v58 = vld [vmem:[%s8944_s7 + $0x138] sm:$0xff]  ;;  %vm9226_vm9 = vmmov %vm9213_vm3 }
 0x37a   : > { %v2544_v16 = vmax.f32 %v2537_v32, 0.0  ;;  %v2524_v6 = vmul.f32 %v7909_v53, %v2504_v57  ;;  %v2409_v23 = vadd.f32 %v4615_v54, %v7904_v0  ;;  %v2560_v55 = vsel %vm9215_vm4, %v2557_v1, %v2559_v41  ;;  %v2767_v32 = vld [vmem:[%s8944_s7 + $0x148] sm:$0xff]  ;;  %v2784_v57 = vld [vmem:[%s8944_s7 + $0x1d0] sm:$0xff]  ;;  %v2785_v54 = vld [vmem:[%s8944_s7 + $0x1d8] sm:$0xff] }
 0x37b   : > { %5514 = vmatprep.subr.bf16.mxu0 %v5513_v62  ;;  %v2576_v44 = vmax.f32 %v2542_v51, %v2560_v55  ;;  %v5563_v1 = vpack.c.bf16 %v2761_v48, %v2760_v47  ;;  %v5571_v24 = vpack.c.bf16 %v2765_v58, %v2764_v18  ;;  %v5573_v38 = vpack.c.bf16 %v2783_v61, %v2782_v56  ;;  %v2787_v55 = vld [vmem:[%s8944_s7 + $0x1e8] sm:$0xff] }
 0x37c   : > { %v2561_v20 = vrot.slane %v2544_v16, 1  ;;  %v2538_v52 = vadd.f32 %v7914_v42, %v2524_v6  ;;  %v2509_v3 = vadd.f32 %v4668_v59, %v2409_v23  ;;  %5516 = vmatpush3.bf16.msra.mxu0 %v5513_v62  ;;  %v5577_v62 = vpack.c.bf16 %v2785_v54, %v2784_v57  ;;  %v2769_v6 = vld [vmem:[%s8944_s7 + $0x158] sm:$0xff]  ;;  %v2786_v23 = vld [vmem:[%s8944_s7 + $0x1e0] sm:$0xff] }
 0x37d   : > { %vm3083_vm4 = vcmask 187392  }
 0x37e   : > { %v2545_v43 = vmax.f32 %v2538_v52, 0.0  ;;  %v2525_v11 = vmul.f32 %v7909_v53, %v2509_v3  ;;  %v2562_v7 = vsel %vm9216_vm6, %v2559_v41, %v2561_v20  ;;  %v2774_v53 = vld [vmem:[%s8944_s7 + $0x180] sm:$0xff]  ;;  %v2771_v3 = vld [vmem:[%s8944_s7 + $0x168] sm:$0xff]  ;;  %vm9227_vm6 = vmmov %vm9213_vm3 }
 0x37f   : > { %v2577_v31 = vmax.f32 %v2543_v19, %v2562_v7  ;;  %v2781_v19 = vld [vmem:[%s8944_s7 + $0x1b8] sm:$0xff]  ;;  %v2766_v41 = vld [vmem:[%s8944_s7 + $0x140] sm:$0xff] }
 0x380   : > { %v2563_v4 = vrot.slane %v2545_v43, 1  ;;  %v2539_v30 = vadd.f32 %v7914_v42, %v2525_v11  ;;  %v2775_v42 = vld [vmem:[%s8944_s7 + $0x188] sm:$0xff]  ;;  %v5569_v9 = vpack.c.bf16 %v2781_v19, %v2780_v33  ;;  %v5575_v59 = vpack.c.bf16 %v2767_v32, %v2766_v41  ;;  %v2770_v52 = vld [vmem:[%s8944_s7 + $0x160] sm:$0xff]  ;;  %v2756_v11 = vld [vmem:[%s8944_s7 + $0xf0] sm:$0xff] }
 0x381   : > { %v5517_v8 = vpack.c.bf16 %v2577_v31, %v2576_v44  ;;  %v5557_v35 = vpack.c.bf16 %v2775_v42, %v2774_v53  ;;  %v2757_v7 = vld [vmem:[%s8944_s7 + $0xf8] sm:$0xff]  ;;  %v2790_v42 = vld [vmem:[%s8944_s7 + $0x200] sm:$0xff]  ;;  %v2795_v32 = vld [vmem:[%s8944_s7 + $0x228] sm:$0xff] }
 0x382   : > { %v2546_v0 = vmax.f32 %v2539_v30, 0.0  ;;  %v2564_v17 = vsel %vm9217_vm13, %v2561_v20, %v2563_v4  ;;  %v5581_v20 = vpack.c.bf16 %v2787_v55, %v2786_v23  ;;  %v5553_v31 = vpack.c.bf16 %v2757_v7, %v2756_v11  ;;  %v2741_v30 = vld [vmem:[%s8944_s7 + $0x78] sm:$0xff]  ;;  %v2794_v41 = vld [vmem:[%s8944_s7 + $0x220] sm:$0xff]  ;;  %v2796_v23 = vld [vmem:[%s8944_s7 + $0x230] sm:$0xff] }
 0x383   : > { %5518 = vmatprep.subr.bf16.mxu0 %v5517_v8  ;;  %v2578_v50 = vmax.f32 %v2544_v16, %v2564_v17  ;;  %v2768_v16 = vld [vmem:[%s8944_s7 + $0x150] sm:$0xff]  ;;  %v2789_v17 = vld [vmem:[%s8944_s7 + $0x1f8] sm:$0xff]  ;;  %vm9228_vm13 = vmmov %vm9213_vm3 }
 0x384   : > { %v2565_v46 = vrot.slane %v2546_v0, 1  ;;  %5520 = vmatpush3.bf16.msra.mxu0 %v5517_v8  ;;  %v5579_v44 = vpack.c.bf16 %v2769_v6, %v2768_v16  ;;  %v2788_v8 = vld [vmem:[%s8944_s7 + $0x1f0] sm:$0xff]  ;;  %5554 = vmatprep.subr.bf16.mxu1 %v5553_v31  ;;  %v5596_v6 = vpack.c.bf16 %v2795_v32, %v2794_v41  ;;  %v2797_v55 = vld [vmem:[%s8944_s7 + $0x238] sm:$0xff]  ;;  %v2802_v31 = vld [vmem:[%s8944_s7 + $0x260] sm:$0xff] }
 0x385   : > { %v2801_v11 = vld [vmem:[%s8944_s7 + $0x258] sm:$0xff] }
 0x386   : > { %v2566_v12 = vsel %vm9218_vm11, %v2563_v4, %v2565_v46  ;;  %v2580_v2 = vmax.f32 %v2546_v0, %v2565_v46  ;;  %v2740_v4 = vld [vmem:[%s8944_s7 + $0x70] sm:$0xff]  ;;  %v2773_v46 = vld [vmem:[%s8944_s7 + $0x178] sm:$0xff]  ;;  %vm9229_vm11 = vmmov %vm9213_vm3 }
 0x387   : > { %v2579_v22 = vmax.f32 %v2545_v43, %v2566_v12  ;;  %v5583_v43 = vpack.c.bf16 %v2771_v3, %v2770_v52  ;;  %v5555_v0 = vpack.c.bf16 %v2741_v30, %v2740_v4  ;;  %v5585_v12 = vpack.c.bf16 %v2789_v17, %v2788_v8  ;;  %v2799_v52 = vld [vmem:[%s8944_s7 + $0x248] sm:$0xff]  ;;  %v2804_v8 = vld [vmem:[%s8944_s7 + $0x270] sm:$0xff] }
 0x388   : > { %v2803_v4 = vld [vmem:[%s8944_s7 + $0x268] sm:$0xff] }
 0x389   : > { %v5521_v49 = vpack.c.bf16 %v2579_v22, %v2578_v50  ;;  %v2772_v50 = vld [vmem:[%s8944_s7 + $0x170] sm:$0xff]  ;;  %5556 = vmatpush3.bf16.msra.mxu1 %v5555_v0  ;;  %v5608_v30 = vpack.c.bf16 %v2803_v4, %v2802_v31  ;;  %v2805_v0 = vld [vmem:[%s8944_s7 + $0x278] sm:$0xff] }
 0x38a   : > { %v5587_v22 = vpack.c.bf16 %v2773_v46, %v2772_v50  ;;  %v5611_v17 = vpack.c.bf16 %v2805_v0, %v2804_v8  ;;  %v3232_v50 = vld [vmem:[%s8947_s10 + $0x180] sm:$0xff]  ;;  %v3233_v46 = vld [vmem:[%s8947_s10 + $0x188] sm:$0xff] }
 0x38b   : > { %5522 = vmatprep.subr.bf16.mxu0 %v5521_v49  ;;  %v4209_v8 = vld [vmem:[%s8945_s8] ss:$0 sm:$0xff] }
 0x38c   : > { %5524 = vmatpush3.bf16.msra.mxu0 %v5521_v49  ;;  %v9223_v49 = vmov 0.0|0.0  }
 0x38d   : > { %5085 = vmatprep.subr.msk.mxu0 %vm9213_vm3, %v2580_v2  ;;  %5589 = vmatprep.subr.bf16.mxu1 %v9223_v49 }
 0x390   : > { %5086 = vmatpush3.msk.msra.mxu0 %vm9221_vm14, %v2580_v2  ;;  %v2791_v2 = vld [vmem:[%s8944_s7 + $0x208] sm:$0xff]  ;;  %vm9230_vm14 = vmmov %vm9213_vm3 }
 0x391   : > { %5088 = vmatmul.mubr.msk.f32.vlgmr.msra.gmra.mrb[74].mxu0 %vm2581_vm2, %v7961_v63  ;;  %5558 = vmatprep.subr.bf16.mxu0 %v5557_v35 }
 0x392   : > { %5090 = vmatprep.mubr.msk.f32.mxu0 %vm2581_vm2, %v1111_v10  ;;  %5560 = vmatpush3.bf16.msra.mxu0 %v5559_v29 }
 0x393   : > { %5562 = vmatprep.subr.bf16.mxu0 %v5561_v5  ;;  %v5590_v5 = vpack.c.bf16 %v2791_v2, %v2790_v42  ;;  %v3235_v2 = vld [vmem:[%s8947_s10 + $0x198] sm:$0xff] }
 0x395   : > { %5091 = vmatmul.mubr.msk.f32.gmra.mrb[76].mxu0 %vm2581_vm2, %v1113_v37  ;;  %v2793_v37 = vld [vmem:[%s8944_s7 + $0x218] sm:$0xff]  ;;  %vm5970_vm2 = vmmov 0  }
 0x396   : > { %5564 = vmatpush3.bf16.msra.mxu0 %v5563_v1  ;;  %v5593_v56 = vpack.c.bf16 %v2793_v37, %v2792_v21  ;;  %v3223_v21 = vld [vmem:[%s8947_s10 + $0x138] sm:$0xff] }
 0x397   : > { %5566 = vmatprep.subr.bf16.mxu0 %v5565_v28 }
 0x39a   : > { %5568 = vmatpush3.bf16.msra.mxu0 %v5567_v25 }
 0x39b   : > { %5570 = vmatprep.subr.bf16.mxu0 %v5569_v9 }
 0x39e   : > { %5572 = vmatpush3.bf16.msra.mxu0 %v5571_v24 }
 0x39f   : > { %5574 = vmatprep.subr.bf16.mxu0 %v5573_v38 }
 0x3a2   : > { %5576 = vmatpush3.bf16.msra.mxu0 %v5575_v59 }
 0x3a3   : > { %5578 = vmatprep.subr.bf16.mxu0 %v5577_v62 }
 0x3a6   : > { %5580 = vmatpush3.bf16.msra.mxu0 %v5579_v44  ;;  %v5599_v44 = vpack.c.bf16 %v2797_v55, %v2796_v23 }
 0x3a7   : > { %5582 = vmatprep.subr.bf16.mxu0 %v5581_v20  ;;  %v2798_v20 = vld [vmem:[%s8944_s7 + $0x240] sm:$0xff] }
 0x3a8   : > { %v5602_v3 = vpack.c.bf16 %v2799_v52, %v2798_v20 }
 0x3aa   : > { %5584 = vmatpush3.bf16.msra.mxu0 %v5583_v43  ;;  %v2800_v43 = vld [vmem:[%s8944_s7 + $0x250] sm:$0xff] }
 0x3ab   : > { %5586 = vmatprep.subr.bf16.mxu0 %v5585_v12  ;;  %v5605_v7 = vpack.c.bf16 %v2801_v11, %v2800_v43  ;;  %v5649_v12 = vpack.c.bf16 %v3233_v46, %v3232_v50  ;;  %v4210_v50 = vld [vmem:[%s8946_s9] ss:$0 sm:$0xff] }
 0x3ae   : > { %5588 = vmatpush3.bf16.msra.mxu0 %v5587_v22  ;;  %v3216_v22 = vld [vmem:[%s8947_s10 + $0x100] sm:$0xff] }
 0x464   : > { %v5089_v53 = vpop.f32.mrb[74].mxu0 }
 0x465   : > { %v2697_v45 = vrot.slane %v5089_v53, 2  ;;  %v2717_v40 = vrot.slane %v5089_v53, 4  ;;  %v2663_v34 = vpop.f32.mrb[75].mxu0  ;;  %v2687_v15 = vrot.slane %v5089_v53, 1  ;;  %v2707_v35 = vrot.slane %v5089_v53, 3 }
 0x466   : > { %v2696_v26 = vrot.slane %v2663_v34, 2  ;;  %v2716_v29 = vrot.slane %v2663_v34, 4  ;;  %v2686_v51 = vrot.slane %v2663_v34, 1  ;;  %v2706_v10 = vrot.slane %v2663_v34, 3 }
 0x468   : > { %v5092_v47 = vpop.f32.mrb[76].mxu0  ;;  %v2688_v48 = vsel %vm9224_vm5, %v2686_v51, %v2687_v15  ;;  %v2708_v13 = vsel %vm1153_vm1, %v2706_v10, %v2707_v35  ;;  %v2698_v39 = vsel %vm1297_vm15, %v2696_v26, %v2697_v45  ;;  %v8081_v1 = vsel %vm1342_vm10, %v2716_v29, %v2717_v40  ;;  %v3237_v26 = vld [vmem:[%s8947_s10 + $0x1a8] sm:$0xff]  ;;  %v3220_v51 = vld [vmem:[%s8947_s10 + $0x120] sm:$0xff] }
 0x469   : > { %v2691_v28 = vrot.slane %v5092_v47, 1  ;;  %v2701_v60 = vrot.slane %v5092_v47, 2  ;;  %v2711_v27 = vrot.slane %v5092_v47, 3  ;;  %v2721_v33 = vrot.slane %v5092_v47, 4  ;;  %v2673_v19 = vpop.f32.mrb[77].mxu0  ;;  %2870 = vmatprep.mubr.f32.mxu1 %v2688_v48  ;;  %2950 = vmatprep.mubr.f32.mxu0 %v2708_v13  ;;  %v3221_v10 = vld [vmem:[%s8947_s10 + $0x128] sm:$0xff] }
 0x46a   : > { %2871 = vmatmul.mubr.f32.vlgmr.msra.gmra.mrb[74].mxu1 %v2663_v34  ;;  %2951 = vmatmul.mubr.f32.vlgmr.msra.gmra.mrb[78].mxu0 %v2698_v39  ;;  %v2689_v25 = vrot.slane %v2673_v19, 1  ;;  %v2709_v9 = vrot.slane %v2673_v19, 3  ;;  %v2699_v18 = vrot.slane %v2673_v19, 2  ;;  %v2719_v58 = vrot.slane %v2673_v19, 4  ;;  %v3219_v34 = vld [vmem:[%s8947_s10 + $0x118] sm:$0xff]  ;;  %v3238_v47 = vld [vmem:[%s8947_s10 + $0x1b0] sm:$0xff] }
 0x46b   : > { %5591 = vmatpush3.bf16.msra.mxu1 %v5590_v5  ;;  %v5659_v5 = vpack.c.bf16 %v3221_v10, %v3220_v51  ;;  %v3239_v48 = vld [vmem:[%s8947_s10 + $0x1b8] sm:$0xff]  ;;  %v3222_v39 = vld [vmem:[%s8947_s10 + $0x130] sm:$0xff] }
 0x46c   : > { %v2690_v61 = vsel %vm9225_vm7, %v2687_v15, %v2689_v25  ;;  %v2710_v24 = vsel %vm1153_vm1, %v2707_v35, %v2709_v9  ;;  %5592 = vmatprep.subr.bf16.mxu1 %v9223_v49  ;;  %v2700_v38 = vsel %vm1297_vm15, %v2697_v45, %v2699_v18  ;;  %v2692_v57 = vsel %vm9226_vm9, %v2689_v25, %v2691_v28  ;;  %v3236_v35 = vld [vmem:[%s8947_s10 + $0x1a0] sm:$0xff]  ;;  %v3241_v28 = vld [vmem:[%s8947_s10 + $0x1c8] sm:$0xff]  ;;  %v3242_v25 = vld [vmem:[%s8947_s10 + $0x1d0] sm:$0xff] }
 0x46d   : > { %2875 = vmatprep.mubr.f32.mxu1 %v2690_v61  ;;  %2955 = vmatprep.mubr.f32.mxu0 %v2710_v24  ;;  %v2712_v54 = vsel %vm1153_vm1, %v2709_v9, %v2711_v27  ;;  %v2702_v59 = vsel %vm1297_vm15, %v2699_v18, %v2701_v60  ;;  %v2720_v62 = vsel %vm1342_vm10, %v2717_v40, %v2719_v58  ;;  %v3218_v40 = vld [vmem:[%s8947_s10 + $0x110] sm:$0xff]  ;;  %v3224_v27 = vld [vmem:[%s8947_s10 + $0x140] sm:$0xff]  ;;  %v3243_v9 = vld [vmem:[%s8947_s10 + $0x1d8] sm:$0xff] }
 0x46e   : > { %2876 = vmatmul.mubr.f32.gmra.mrb[76].mxu1 %v5089_v53  ;;  %2956 = vmatmul.mubr.f32.gmra.mrb[80].mxu0 %v2700_v38  ;;  %v2722_v16 = vsel %vm1342_vm10, %v2719_v58, %v2721_v33  ;;  %v3217_v53 = vld [vmem:[%s8947_s10 + $0x108] sm:$0xff]  ;;  %v5655_v15 = vpack.c.bf16 %v3219_v34, %v3218_v40  ;;  %v5657_v29 = vpack.c.bf16 %v3237_v26, %v3236_v35  ;;  %v3226_v58 = vld [vmem:[%s8947_s10 + $0x150] sm:$0xff] }
 0x46f   : > { %5594 = vmatpush3.bf16.msra.mxu1 %v5593_v56  ;;  %2880 = vmatprep.mubr.f32.mxu1 %v2692_v57  ;;  %v5651_v42 = vpack.c.bf16 %v3217_v53, %v3216_v22  ;;  %v5661_v13 = vpack.c.bf16 %v3239_v48, %v3238_v47  ;;  %v5663_v37 = vpack.c.bf16 %v3223_v21, %v3222_v39  ;;  %v3225_v33 = vld [vmem:[%s8947_s10 + $0x148] sm:$0xff]  ;;  %v3227_v56 = vld [vmem:[%s8947_s10 + $0x158] sm:$0xff] }
 0x470   : > { %5595 = vmatprep.subr.bf16.mxu1 %v9223_v49  ;;  %2960 = vmatprep.mubr.f32.mxu0 %v2712_v54  ;;  %v5669_v18 = vpack.c.bf16 %v3243_v9, %v3242_v25  ;;  %v5671_v61 = vpack.c.bf16 %v3227_v56, %v3226_v58  ;;  %v3203_v25 = vld [vmem:[%s8947_s10 + $0x98] sm:$0xff]  ;;  %v3186_v56 = vld [vmem:[%s8947_s10 + $0x10] sm:$0xff] }
 0x472   : > { %2881 = vmatmul.mubr.f32.gmra.mrb[78].mxu1 %v2673_v19  ;;  %2961 = vmatmul.mubr.f32.gmra.mrb[82].mxu0 %v2702_v59  ;;  %v5667_v19 = vpack.c.bf16 %v3225_v33, %v3224_v27  ;;  %v3184_v27 = vld [vmem:[%s8947_s10] sm:$0xff]  ;;  %v3185_v33 = vld [vmem:[%s8947_s10 + $0x8] sm:$0xff] }
 0x473   : > { %5597 = vmatpush3.bf16.msra.mxu1 %v5596_v6  ;;  %5125 = vmatprep.mubr.msk.f32.mxu1 %vm5970_vm2, %v9210_v14 }
 0x474   : > { %5598 = vmatprep.subr.bf16.mxu1 %v9223_v49  ;;  %5140 = vmatprep.mubr.msk.f32.mxu0 %vm3083_vm4, %v7795_v36  ;;  %v3234_v36 = vld [vmem:[%s8947_s10 + $0x190] sm:$0xff] }
 0x475   : > { %v5653_v45 = vpack.c.bf16 %v3235_v2, %v3234_v36 }
 0x477   : > { %5600 = vmatpush3.bf16.msra.mxu1 %v5599_v44 }
 0x478   : > { %5601 = vmatprep.subr.bf16.mxu1 %v9223_v49 }
 0x47b   : > { %5603 = vmatpush3.bf16.msra.mxu1 %v5602_v3 }
 0x47c   : > { %5604 = vmatprep.subr.bf16.mxu1 %v9223_v49 }
 0x47f   : > { %5606 = vmatpush3.bf16.msra.mxu1 %v5605_v7 }
 0x480   : > { %5607 = vmatprep.subr.bf16.mxu1 %v9223_v49 }
 0x483   : > { %5609 = vmatpush3.bf16.msra.mxu1 %v5608_v30 }
 0x484   : > { %5610 = vmatprep.subr.bf16.mxu1 %v9223_v49 }
 0x487   : > { %5612 = vmatpush3.bf16.msra.mxu1 %v5611_v17 }
 0x488   : > { %5650 = vmatprep.subr.bf16.mxu1 %v5649_v12 }
 0x48a   : > { %5126 = vmatmul.mubr.f32.vlgmr.msra.gmra.mrb[80].mxu1 %v8081_v1  ;;  %v3240_v1 = vld [vmem:[%s8947_s10 + $0x1c0] sm:$0xff] }
 0x48b   : > { %5128 = vmatprep.mubr.msk.f32.mxu1 %vm5970_vm2, %v9210_v14  ;;  %5652 = vmatpush3.bf16.msra.mxu1 %v5651_v42  ;;  %v5665_v60 = vpack.c.bf16 %v3241_v28, %v3240_v1  ;;  %v3200_v1 = vld [vmem:[%s8947_s10 + $0x80] sm:$0xff]  ;;  %v3201_v28 = vld [vmem:[%s8947_s10 + $0x88] sm:$0xff] }
 0x48c   : > { %5654 = vmatprep.subr.bf16.mxu1 %v5653_v45  ;;  %v5617_v9 = vpack.c.bf16 %v3201_v28, %v3200_v1  ;;  %v3248_v1 = vld [vmem:[%s8947_s10 + $0x200] sm:$0xff]  ;;  %v3249_v28 = vld [vmem:[%s8947_s10 + $0x208] sm:$0xff] }
 0x48e   : > { %5129 = vmatmul.mubr.f32.gmra.mrb[82].mxu1 %v2720_v62 }
 0x48f   : > { %5131 = vmatprep.mubr.msk.f32.mxu1 %vm5970_vm2, %v9210_v14  ;;  %5656 = vmatpush3.bf16.msra.mxu1 %v5655_v15 }
 0x490   : > { %5658 = vmatprep.subr.bf16.mxu1 %v5657_v29 }
 0x492   : > { %5132 = vmatmul.mubr.f32.gmra.mrb[84].mxu1 %v2722_v16 }
 0x493   : > { %5660 = vmatpush3.bf16.msra.mxu1 %v5659_v5 }
 0x494   : > { %5662 = vmatprep.subr.bf16.mxu1 %v5661_v13 }
 0x497   : > { %5664 = vmatpush3.bf16.msra.mxu1 %v5663_v37 }
 0x498   : > { %5666 = vmatprep.subr.bf16.mxu1 %v5665_v60 }
 0x49b   : > { %5668 = vmatpush3.bf16.msra.mxu1 %v5667_v19  ;;  %v3202_v19 = vld [vmem:[%s8947_s10 + $0x90] sm:$0xff] }
 0x49c   : > { %5670 = vmatprep.subr.bf16.mxu1 %v5669_v18  ;;  %v5619_v18 = vpack.c.bf16 %v3185_v33, %v3184_v27  ;;  %v5621_v58 = vpack.c.bf16 %v3203_v25, %v3202_v19 }
 0x49f   : > { %5672 = vmatpush3.bf16.msra.mxu1 %v5671_v61  ;;  %v3187_v61 = vld [vmem:[%s8947_s10 + $0x18] sm:$0xff] }
 0x53d   : > { %v4712_v24 = vpop.f32.mrb[74].mxu1  ;;  %v4753_v38 = vpop.f32.mrb[78].mxu0 }
 0x53e   : > { %v4713_v41 = vpop.f32.mrb[75].mxu1  ;;  %v4754_v32 = vpop.f32.mrb[79].mxu0 }
 0x53f   : > { %v4714_v57 = vadd.f32 %v4713_v41, %v4712_v24  ;;  %v4755_v54 = vadd.f32 %v4754_v32, %v4753_v38  ;;  %v3204_v24 = vld [vmem:[%s8947_s10 + $0xa0] sm:$0xff]  ;;  %v3205_v38 = vld [vmem:[%s8947_s10 + $0xa8] sm:$0xff]  ;;  %v5623_v41 = vpack.c.bf16 %v3187_v61, %v3186_v56  ;;  %v5682_v61 = vpack.c.bf16 %v3249_v28, %v3248_v1 }
 0x540   : > { %v5625_v32 = vpack.c.bf16 %v3205_v38, %v3204_v24  ;;  %v3554_v1 = vld [vmem:[%s8950_s13 + $0xa8] sm:$0xff]  ;;  %v3585_v28 = vld [vmem:[%s8950_s13 + $0x1a0] sm:$0xff] }
 0x541   : > { %v4715_v59 = vpop.f32.mrb[76].mxu1  ;;  %v4756_v62 = vpop.f32.mrb[80].mxu0  ;;  %v2953_v16 = vadd.f32 %v4755_v54, %v4714_v57  ;;  %v3188_v57 = vld [vmem:[%s8947_s10 + $0x20] sm:$0xff]  ;;  %v3189_v54 = vld [vmem:[%s8947_s10 + $0x28] sm:$0xff] }
 0x542   : > { %v4716_v6 = vpop.f32.mrb[77].mxu1  ;;  %v4757_v23 = vpop.f32.mrb[81].mxu0 }
 0x543   : > { %v4717_v55 = vadd.f32 %v4716_v6, %v4715_v59  ;;  %v4758_v44 = vadd.f32 %v4757_v23, %v4756_v62  ;;  %v3206_v59 = vld [vmem:[%s8947_s10 + $0xb0] sm:$0xff]  ;;  %v5627_v62 = vpack.c.bf16 %v3189_v54, %v3188_v57  ;;  %v3191_v23 = vld [vmem:[%s8947_s10 + $0x38] sm:$0xff] }
 0x544   : > { %v3190_v6 = vld [vmem:[%s8947_s10 + $0x30] sm:$0xff]  ;;  %v3251_v57 = vld [vmem:[%s8947_s10 + $0x218] sm:$0xff] }
 0x545   : > { %v4718_v20 = vpop.f32.mrb[78].mxu1  ;;  %v4759_v52 = vpop.f32.mrb[82].mxu0  ;;  %v2958_v3 = vadd.f32 %v4758_v44, %v4717_v55  ;;  %v3208_v55 = vld [vmem:[%s8947_s10 + $0xc0] sm:$0xff]  ;;  %v3209_v44 = vld [vmem:[%s8947_s10 + $0xc8] sm:$0xff] }
 0x546   : > { %v4719_v43 = vpop.f32.mrb[79].mxu1  ;;  %v4760_v11 = vpop.f32.mrb[83].mxu0 }
 0x547   : > { %v4720_v7 = vadd.f32 %v4719_v43, %v4718_v20  ;;  %v4761_v31 = vadd.f32 %v4760_v11, %v4759_v52  ;;  %v5631_v20 = vpack.c.bf16 %v3191_v23, %v3190_v6  ;;  %v5633_v52 = vpack.c.bf16 %v3209_v44, %v3208_v55  ;;  %v3193_v43 = vld [vmem:[%s8947_s10 + $0x48] sm:$0xff]  ;;  %v3210_v11 = vld [vmem:[%s8947_s10 + $0xd0] sm:$0xff]  ;;  %v3255_v23 = vld [vmem:[%s8947_s10 + $0x238] sm:$0xff] }
 0x548   : > { %v3254_v6 = vld [vmem:[%s8947_s10 + $0x230] sm:$0xff]  ;;  %v3256_v44 = vld [vmem:[%s8947_s10 + $0x240] sm:$0xff] }
 0x549   : > { %v2963_v4 = vadd.f32 %v4761_v31, %v4720_v7  ;;  %v3211_v7 = vld [vmem:[%s8947_s10 + $0xd8] sm:$0xff]  ;;  %v5691_v55 = vpack.c.bf16 %v3255_v23, %v3254_v6  ;;  %v3557_v23 = vld [vmem:[%s8950_s13 + $0xc0] sm:$0xff] }
 0x55d   : > { %v3032_v30 = vpop.f32.mrb[80].mxu1 }
 0x55e   : > { %v3033_v0 = vadd.f32 %v3032_v30, %v2953_v16  ;;  %v5127_v17 = vpop.f32.mrb[81].mxu1  ;;  %v3194_v30 = vld [vmem:[%s8947_s10 + $0x50] sm:$0xff] }
 0x55f   : > { %v3213_v17 = vld [vmem:[%s8947_s10 + $0xe8] sm:$0xff] }
 0x560   : > { %v3053_v46 = vmul.f32 %v4209_v8, %v3033_v0  ;;  %v3212_v0 = vld [vmem:[%s8947_s10 + $0xe0] sm:$0xff] }
 0x561   : > { %v3037_v12 = vpop.f32.mrb[82].mxu1 }
 0x562   : > { %v3063_v22 = vadd.f32 %v4210_v50, %v3053_v46  ;;  %v3038_v53 = vadd.f32 %v3037_v12, %v2958_v3  ;;  %v5130_v42 = vpop.f32.mrb[83].mxu1  ;;  %v3192_v3 = vld [vmem:[%s8947_s10 + $0x40] sm:$0xff]  ;;  %v5641_v46 = vpack.c.bf16 %v3213_v17, %v3212_v0 }
 0x563   : > { %v5635_v31 = vpack.c.bf16 %v3193_v43, %v3192_v3  ;;  %v3196_v12 = vld [vmem:[%s8947_s10 + $0x60] sm:$0xff]  ;;  %v3258_v3 = vld [vmem:[%s8947_s10 + $0x250] sm:$0xff]  ;;  %v3259_v43 = vld [vmem:[%s8947_s10 + $0x258] sm:$0xff] }
 0x564   : > { %v3054_v36 = vmul.f32 %v4209_v8, %v3038_v53  ;;  %v3066_v45 = vmax.f32 %v3063_v22, 0.0  ;;  %v3197_v22 = vld [vmem:[%s8947_s10 + $0x68] sm:$0xff]  ;;  %v3244_v42 = vld [vmem:[%s8947_s10 + $0x1e0] sm:$0xff] }
 0x565   : > { %v3042_v2 = vpop.f32.mrb[84].mxu1  ;;  %v5643_v53 = vpack.c.bf16 %v3197_v22, %v3196_v12  ;;  %v3549_v17 = vld [vmem:[%s8950_s13 + $0x80] sm:$0xff]  ;;  %v3582_v22 = vld [vmem:[%s8950_s13 + $0x188] sm:$0xff] }
 0x566   : > { %v3064_v40 = vadd.f32 %v4210_v50, %v3054_v36  ;;  %v3043_v34 = vadd.f32 %v3042_v2, %v2963_v4  ;;  %v5133_v15 = vpop.f32.mrb[85].mxu1  ;;  %v3072_v29 = vrot.slane %v3066_v45, 1  ;;  %v5637_v4 = vpack.c.bf16 %v3211_v7, %v3210_v11  ;;  %v3245_v36 = vld [vmem:[%s8947_s10 + $0x1e8] sm:$0xff]  ;;  %v3260_v7 = vld [vmem:[%s8947_s10 + $0x260] sm:$0xff] }
 0x567   : > { %v5673_v2 = vpack.c.bf16 %v3245_v36, %v3244_v42  ;;  %v3214_v15 = vld [vmem:[%s8947_s10 + $0xf0] sm:$0xff]  ;;  %v5697_v11 = vpack.c.bf16 %v3259_v43, %v3258_v3  ;;  %v3534_v42 = vld [vmem:[%s8950_s13 + $0x8] sm:$0xff]  ;;  %v3541_v3 = vld [vmem:[%s8950_s13 + $0x40] sm:$0xff] }
 0x568   : > { %v3067_v35 = vmax.f32 %v3064_v40, 0.0  ;;  %v3055_v26 = vmul.f32 %v4209_v8, %v3043_v34  ;;  %v3195_v8 = vld [vmem:[%s8947_s10 + $0x58] sm:$0xff]  ;;  %v3229_v40 = vld [vmem:[%s8947_s10 + $0x168] sm:$0xff] }
 0x569   : > { %5674 = vmatprep.subr.bf16.mxu1 %v5673_v2  ;;  %v3542_v43 = vld [vmem:[%s8950_s13 + $0x48] sm:$0xff] }
 0x56a   : > { %v3073_v51 = vrot.slane %v3067_v35, 1  ;;  %v3065_v10 = vadd.f32 %v4210_v50, %v3055_v26  ;;  %v5639_v50 = vpack.c.bf16 %v3195_v8, %v3194_v30  ;;  %v3262_v30 = vld [vmem:[%s8947_s10 + $0x270] sm:$0xff]  ;;  %v3263_v8 = vld [vmem:[%s8947_s10 + $0x278] sm:$0xff] }
 0x56b   : > { %v5703_v0 = vpack.c.bf16 %v3263_v8, %v3262_v30  ;;  %v3559_v8 = vld [vmem:[%s8950_s13 + $0xd0] sm:$0xff] }
 0x56c   : > { %v3068_v5 = vmax.f32 %v3065_v10, 0.0  ;;  %v3074_v47 = vsel %vm9227_vm6, %v3072_v29, %v3073_v51  ;;  %v3198_v29 = vld [vmem:[%s8947_s10 + $0x70] sm:$0xff] }
 0x56d   : > { %v3080_v48 = vmax.f32 %v3066_v45, %v3074_v47  ;;  %v3228_v45 = vld [vmem:[%s8947_s10 + $0x160] sm:$0xff]  ;;  %v3246_v10 = vld [vmem:[%s8947_s10 + $0x1f0] sm:$0xff]  ;;  %v3247_v47 = vld [vmem:[%s8947_s10 + $0x1f8] sm:$0xff] }
 0x56e   : > { %v3075_v13 = vrot.slane %v3068_v5, 1  ;;  %v5675_v34 = vpack.c.bf16 %v3229_v40, %v3228_v45  ;;  %v3565_v45 = vld [vmem:[%s8950_s13 + $0x100] sm:$0xff]  ;;  %v3566_v40 = vld [vmem:[%s8950_s13 + $0x108] sm:$0xff] }
 0x570   : > { %v3076_v39 = vsel %vm9228_vm13, %v3073_v51, %v3075_v13  ;;  %v3082_v60 = vmax.f32 %v3068_v5, %v3075_v13  ;;  %v3199_v51 = vld [vmem:[%s8947_s10 + $0x78] sm:$0xff]  ;;  %5676 = vmatpush3.bf16.msra.mxu1 %v5675_v34  ;;  %v3551_v34 = vld [vmem:[%s8950_s13 + $0x90] sm:$0xff] }
 0x571   : > { %v3081_v21 = vmax.f32 %v3067_v35, %v3076_v39  ;;  %v3215_v35 = vld [vmem:[%s8947_s10 + $0xf8] sm:$0xff]  ;;  %v5647_v5 = vpack.c.bf16 %v3199_v51, %v3198_v29  ;;  %v5677_v39 = vpack.c.bf16 %v3247_v47, %v3246_v10 }
 0x572   : > { %v5645_v26 = vpack.c.bf16 %v3215_v35, %v3214_v15  ;;  %v3231_v13 = vld [vmem:[%s8947_s10 + $0x178] sm:$0xff]  ;;  %v5739_v15 = vpack.c.bf16 %v3566_v40, %v3565_v45  ;;  %v3561_v40 = vld [vmem:[%s8950_s13 + $0xe0] sm:$0xff] }
 0x573   : > { %v5613_v37 = vpack.c.bf16 %v3081_v21, %v3080_v48  ;;  %v3230_v48 = vld [vmem:[%s8947_s10 + $0x170] sm:$0xff]  ;;  %5678 = vmatprep.subr.bf16.mxu1 %v5677_v39  ;;  %v3552_v35 = vld [vmem:[%s8950_s13 + $0x98] sm:$0xff] }
 0x574   : > { %v5679_v21 = vpack.c.bf16 %v3231_v13, %v3230_v48  ;;  %v3584_v29 = vld [vmem:[%s8950_s13 + $0x198] sm:$0xff]  ;;  %v5709_v51 = vpack.c.bf16 %v3552_v35, %v3551_v34  ;;  %v3567_v48 = vld [vmem:[%s8950_s13 + $0x110] sm:$0xff]  ;;  %v3562_v34 = vld [vmem:[%s8950_s13 + $0xe8] sm:$0xff] }
 0x575   : > { %5614 = vmatprep.subr.bf16.mxu0 %v5613_v37  ;;  %v3536_v47 = vld [vmem:[%s8950_s13 + $0x18] sm:$0xff]  ;;  %v5729_v35 = vpack.c.bf16 %v3562_v34, %v3561_v40 }
 0x576   : > { %5616 = vmatpush3.bf16.msra.mxu0 %v5613_v37  ;;  %5680 = vmatpush3.bf16.msra.mxu1 %v5679_v21  ;;  %v3568_v39 = vld [vmem:[%s8950_s13 + $0x118] sm:$0xff] }
 0x577   : > { %5138 = vmatprep.subr.msk.mxu0 %vm9229_vm11, %v3082_v60  ;;  %v5743_v21 = vpack.c.bf16 %v3568_v39, %v3567_v48  ;;  %v3578_v48 = vld [vmem:[%s8950_s13 + $0x168] sm:$0xff]  ;;  %v3563_v39 = vld [vmem:[%s8950_s13 + $0xf0] sm:$0xff] }
 0x57a   : > { %5139 = vmatpush3.msk.msra.mxu0 %vm9213_vm3, %v3082_v60 }
 0x57b   : > { %5141 = vmatmul.mubr.msk.f32.vlgmr.msra.gmra.mrb[84].mxu0 %vm3083_vm4, %v7961_v63  ;;  %5618 = vmatprep.subr.bf16.mxu0 %v5617_v9  ;;  %v3207_v63 = vld [vmem:[%s8947_s10 + $0xb8] sm:$0xff] }
 0x57c   : > { %5620 = vmatpush3.bf16.msra.mxu0 %v5619_v18  ;;  %v5629_v16 = vpack.c.bf16 %v3207_v63, %v3206_v59  ;;  %v3252_v63 = vld [vmem:[%s8947_s10 + $0x220] sm:$0xff] }
 0x57d   : > { %5622 = vmatprep.subr.bf16.mxu0 %v5621_v58 }
 0x580   : > { %5624 = vmatpush3.bf16.msra.mxu0 %v5623_v41 }
 0x581   : > { %5626 = vmatprep.subr.bf16.mxu0 %v5625_v32  ;;  %v3250_v32 = vld [vmem:[%s8947_s10 + $0x210] sm:$0xff] }
 0x582   : > { %v5685_v59 = vpack.c.bf16 %v3251_v57, %v3250_v32  ;;  %v3588_v32 = vld [vmem:[%s8950_s13 + $0x1b8] sm:$0xff]  ;;  %v3539_v57 = vld [vmem:[%s8950_s13 + $0x30] sm:$0xff] }
 0x584   : > { %5628 = vmatpush3.bf16.msra.mxu0 %v5627_v62  ;;  %v3253_v62 = vld [vmem:[%s8947_s10 + $0x228] sm:$0xff] }
 0x585   : > { %5630 = vmatprep.subr.bf16.mxu0 %v5629_v16  ;;  %v5688_v16 = vpack.c.bf16 %v3253_v62, %v3252_v63  ;;  %v3571_v62 = vld [vmem:[%s8950_s13 + $0x130] sm:$0xff] }
 0x588   : > { %5632 = vmatpush3.bf16.msra.mxu0 %v5631_v20  ;;  %v3257_v20 = vld [vmem:[%s8947_s10 + $0x248] sm:$0xff] }
 0x589   : > { %5634 = vmatprep.subr.bf16.mxu0 %v5633_v52  ;;  %v5694_v52 = vpack.c.bf16 %v3257_v20, %v3256_v44  ;;  %v3589_v44 = vld [vmem:[%s8950_s13 + $0x1c0] sm:$0xff] }
 0x58c   : > { %5636 = vmatpush3.bf16.msra.mxu0 %v5635_v31  ;;  %v3261_v31 = vld [vmem:[%s8947_s10 + $0x268] sm:$0xff] }
 0x58d   : > { %5638 = vmatprep.subr.bf16.mxu0 %v5637_v4  ;;  %v5700_v4 = vpack.c.bf16 %v3261_v31, %v3260_v7  ;;  %v5723_v7 = vpack.c.bf16 %v3542_v43, %v3541_v3  ;;  %v3573_v31 = vld [vmem:[%s8950_s13 + $0x140] sm:$0xff] }
 0x590   : > { %5640 = vmatpush3.bf16.msra.mxu0 %v5639_v50  ;;  %v3550_v50 = vld [vmem:[%s8950_s13 + $0x88] sm:$0xff] }
 0x591   : > { %5642 = vmatprep.subr.bf16.mxu0 %v5641_v46  ;;  %v3581_v46 = vld [vmem:[%s8950_s13 + $0x180] sm:$0xff]  ;;  %v5705_v12 = vpack.c.bf16 %v3550_v50, %v3549_v17  ;;  %v3591_v17 = vld [vmem:[%s8950_s13 + $0x1d0] sm:$0xff] }
 0x592   : > { %v5737_v36 = vpack.c.bf16 %v3582_v22, %v3581_v46  ;;  %v3592_v46 = vld [vmem:[%s8950_s13 + $0x1d8] sm:$0xff] }
 0x593   : > { %5706 = vmatprep.subr.bf16.mxu1 %v5705_v12  ;;  %v3543_v12 = vld [vmem:[%s8950_s13 + $0x50] sm:$0xff]  ;;  %v3544_v22 = vld [vmem:[%s8950_s13 + $0x58] sm:$0xff] }
 0x594   : > { %5644 = vmatpush3.bf16.msra.mxu0 %v5643_v53  ;;  %v3533_v53 = vld [vmem:[%s8950_s13] sm:$0xff] }
 0x595   : > { %5646 = vmatprep.subr.bf16.mxu0 %v5645_v26  ;;  %v5707_v2 = vpack.c.bf16 %v3534_v42, %v3533_v53  ;;  %v3583_v26 = vld [vmem:[%s8950_s13 + $0x190] sm:$0xff]  ;;  %v5757_v53 = vpack.c.bf16 %v3592_v46, %v3591_v17  ;;  %v5727_v42 = vpack.c.bf16 %v3544_v22, %v3543_v12 }
 0x596   : > { %v5741_v10 = vpack.c.bf16 %v3584_v29, %v3583_v26  ;;  %v3594_v26 = vld [vmem:[%s8950_s13 + $0x1e8] sm:$0xff]  ;;  %v3545_v29 = vld [vmem:[%s8950_s13 + $0x60] sm:$0xff] }
 0x598   : > { %5648 = vmatpush3.bf16.msra.mxu0 %v5647_v5  ;;  %v3535_v5 = vld [vmem:[%s8950_s13 + $0x10] sm:$0xff] }
 0x599   : > { %5681 = vmatprep.subr.bf16.mxu0 %v9223_v49  ;;  %v5711_v13 = vpack.c.bf16 %v3536_v47, %v3535_v5  ;;  %v3577_v47 = vld [vmem:[%s8950_s13 + $0x160] sm:$0xff] }
 0x64e   : > { %v5142_v37 = vpop.f32.mrb[84].mxu0 }
 0x64f   : > { %v3169_v60 = vrot.slane %v5142_v37, 1  ;;  %v3173_v27 = vrot.slane %v5142_v37, 2  ;;  %v3177_v33 = vrot.slane %v5142_v37, 3  ;;  %v3181_v19 = vrot.slane %v5142_v37, 4  ;;  %v3157_v25 = vpop.f32.mrb[85].mxu0  ;;  %v3553_v37 = vld [vmem:[%s8950_s13 + $0xa0] sm:$0xff] }
 0x650   : > { %v3172_v9 = vrot.slane %v3157_v25, 2  ;;  %v3168_v18 = vrot.slane %v3157_v25, 1  ;;  %v3176_v58 = vrot.slane %v3157_v25, 3  ;;  %v3180_v56 = vrot.slane %v3157_v25, 4 }
 0x652   : > { %v3170_v24 = vsel %vm9230_vm14, %v3168_v18, %v3169_v60  ;;  %v3178_v38 = vsel %vm1153_vm1, %v3176_v58, %v3177_v33  ;;  %v3174_v41 = vsel %vm1297_vm15, %v3172_v9, %v3173_v27  ;;  %v3182_v54 = vsel %vm1342_vm10, %v3180_v56, %v3181_v19  ;;  %v3586_v27 = vld [vmem:[%s8950_s13 + $0x1a8] sm:$0xff]  ;;  %v3537_v33 = vld [vmem:[%s8950_s13 + $0x20] sm:$0xff] }
 0x653   : > { %3328 = vmatprep.mubr.f32.mxu0 %v3170_v24  ;;  %3398 = vmatprep.mubr.f32.mxu1 %v3178_v38  ;;  %v5713_v60 = vpack.c.bf16 %v3554_v1, %v3553_v37  ;;  %v5745_v19 = vpack.c.bf16 %v3586_v27, %v3585_v28  ;;  %v3569_v9 = vld [vmem:[%s8950_s13 + $0x120] sm:$0xff]  ;;  %v3570_v18 = vld [vmem:[%s8950_s13 + $0x128] sm:$0xff]  ;;  %v3556_v24 = vld [vmem:[%s8950_s13 + $0xb8] sm:$0xff]  ;;  %vm3498_vm1 = vcmask 1043458   ;;  %vm3506_vm15 = vcmask 1045508  }
 0x654   : > { %3329 = vmatmul.mubr.f32.vlgmr.msra.gmra.mrb[86].mxu0 %v3157_v25  ;;  %3399 = vmatmul.mubr.f32.vlgmr.msra.gmra.mrb[86].mxu1 %v3174_v41  ;;  %v3538_v25 = vld [vmem:[%s8950_s13 + $0x28] sm:$0xff]  ;;  %v5747_v56 = vpack.c.bf16 %v3570_v18, %v3569_v9  ;;  %v3587_v38 = vld [vmem:[%s8950_s13 + $0x1b0] sm:$0xff]  ;;  %v3596_v28 = vld [vmem:[%s8950_s13 + $0x1f8] sm:$0xff]  ;;  %vm3514_vm10 = vcmask 1047558  }
 0x655   : > { %5683 = vmatpush3.bf16.msra.mxu0 %v5682_v61  ;;  %5175 = vmatprep.mubr.msk.f32.mxu0 %vm5970_vm2, %v9210_v14  ;;  %v5715_v58 = vpack.c.bf16 %v3538_v25, %v3537_v33  ;;  %v3555_v61 = vld [vmem:[%s8950_s13 + $0xb0] sm:$0xff]  ;;  %v3548_v27 = vld [vmem:[%s8950_s13 + $0x78] sm:$0xff] }
 0x656   : > { %5684 = vmatprep.subr.bf16.mxu0 %v9223_v49  ;;  %5708 = vmatpush3.bf16.msra.mxu1 %v5707_v2  ;;  %v5717_v41 = vpack.c.bf16 %v3556_v24, %v3555_v61  ;;  %v3576_v2 = vld [vmem:[%s8950_s13 + $0x158] sm:$0xff]  ;;  %v3595_v37 = vld [vmem:[%s8950_s13 + $0x1f0] sm:$0xff]  ;;  %v3787_v61 = vld [vmem:[%s8952_s15 + $0x180] sm:$0xff] }
 0x657   : > { %5710 = vmatprep.subr.bf16.mxu1 %v5709_v51  ;;  %v3546_v51 = vld [vmem:[%s8950_s13 + $0x68] sm:$0xff]  ;;  %v5765_v33 = vpack.c.bf16 %v3596_v28, %v3595_v37  ;;  %v3579_v25 = vld [vmem:[%s8950_s13 + $0x170] sm:$0xff]  ;;  %v3580_v9 = vld [vmem:[%s8950_s13 + $0x178] sm:$0xff] }
 0x658   : > { %v5731_v5 = vpack.c.bf16 %v3546_v51, %v3545_v29  ;;  %v5767_v18 = vpack.c.bf16 %v3580_v9, %v3579_v25  ;;  %v3771_v37 = vld [vmem:[%s8952_s15 + $0x100] sm:$0xff]  ;;  %v3789_v25 = vld [vmem:[%s8952_s15 + $0x190] sm:$0xff]  ;;  %v3790_v9 = vld [vmem:[%s8952_s15 + $0x198] sm:$0xff] }
 0x659   : > { %5686 = vmatpush3.bf16.msra.mxu0 %v5685_v59  ;;  %v5749_v59 = vpack.c.bf16 %v3588_v32, %v3587_v38  ;;  %v3788_v38 = vld [vmem:[%s8952_s15 + $0x188] sm:$0xff] }
 0x65a   : > { %5687 = vmatprep.subr.bf16.mxu0 %v9223_v49  ;;  %5712 = vmatpush3.bf16.msra.mxu1 %v5711_v13  ;;  %v5763_v13 = vpack.c.bf16 %v3578_v48, %v3577_v47  ;;  %v3739_v48 = vld [vmem:[%s8952_s15] sm:$0xff] }
 0x65b   : > { %5714 = vmatprep.subr.bf16.mxu1 %v5713_v60  ;;  %v3547_v60 = vld [vmem:[%s8950_s13 + $0x70] sm:$0xff] }
 0x65d   : > { %5689 = vmatpush3.bf16.msra.mxu0 %v5688_v16  ;;  %v3572_v16 = vld [vmem:[%s8950_s13 + $0x138] sm:$0xff] }
 0x65e   : > { %5690 = vmatprep.subr.bf16.mxu0 %v9223_v49  ;;  %5716 = vmatpush3.bf16.msra.mxu1 %v5715_v58  ;;  %v5751_v6 = vpack.c.bf16 %v3572_v16, %v3571_v62  ;;  %v3755_v58 = vld [vmem:[%s8952_s15 + $0x80] sm:$0xff] }
 0x65f   : > { %5718 = vmatprep.subr.bf16.mxu1 %v5717_v41  ;;  %v5801_v41 = vpack.c.bf16 %v3788_v38, %v3787_v61  ;;  %v3742_v38 = vld [vmem:[%s8952_s15 + $0x18] sm:$0xff] }
 0x661   : > { %5692 = vmatpush3.bf16.msra.mxu0 %v5691_v55  ;;  %v3558_v55 = vld [vmem:[%s8950_s13 + $0xc8] sm:$0xff] }
 0x662   : > { %5693 = vmatprep.subr.bf16.mxu0 %v9223_v49  ;;  %v5721_v20 = vpack.c.bf16 %v3558_v55, %v3557_v23  ;;  %v4214_v23 = vld [vmem:[%s8948_s11] ss:$0 sm:$0xff] }
 0x665   : > { %5695 = vmatpush3.bf16.msra.mxu0 %v5694_v52  ;;  %v3590_v52 = vld [vmem:[%s8950_s13 + $0x1c8] sm:$0xff] }
 0x666   : > { %5696 = vmatprep.subr.bf16.mxu0 %v9223_v49 }
 0x669   : > { %5698 = vmatpush3.bf16.msra.mxu0 %v5697_v11  ;;  %v5753_v11 = vpack.c.bf16 %v3590_v52, %v3589_v44 }
 0x66a   : > { %5699 = vmatprep.subr.bf16.mxu0 %v9223_v49 }
 0x66d   : > { %5701 = vmatpush3.bf16.msra.mxu0 %v5700_v4  ;;  %v3574_v4 = vld [vmem:[%s8950_s13 + $0x148] sm:$0xff] }
 0x66e   : > { %5702 = vmatprep.subr.bf16.mxu0 %v9223_v49  ;;  %v5755_v30 = vpack.c.bf16 %v3574_v4, %v3573_v31 }
 0x671   : > { %5704 = vmatpush3.bf16.msra.mxu0 %v5703_v0  ;;  %v3560_v0 = vld [vmem:[%s8950_s13 + $0xd8] sm:$0xff] }
 0x672   : > { %5738 = vmatprep.subr.bf16.mxu0 %v5737_v36  ;;  %v5725_v50 = vpack.c.bf16 %v3560_v0, %v3559_v8  ;;  %v3575_v36 = vld [vmem:[%s8950_s13 + $0x150] sm:$0xff] }
 0x673   : > { %v5759_v45 = vpack.c.bf16 %v3576_v2, %v3575_v36 }
 0x674   : > { %5176 = vmatmul.mubr.f32.vlgmr.msra.gmra.mrb[88].mxu0 %v3182_v54  ;;  %v3540_v54 = vld [vmem:[%s8950_s13 + $0x38] sm:$0xff] }
 0x675   : > { %5740 = vmatpush3.bf16.msra.mxu0 %v5739_v15  ;;  %v5719_v63 = vpack.c.bf16 %v3540_v54, %v3539_v57  ;;  %v3593_v15 = vld [vmem:[%s8950_s13 + $0x1e0] sm:$0xff] }
 0x676   : > { %5742 = vmatprep.subr.bf16.mxu0 %v5741_v10  ;;  %v5761_v10 = vpack.c.bf16 %v3594_v26, %v3593_v15 }
 0x677   : > { %5720 = vmatpush3.bf16.msra.mxu1 %v5719_v63 }
 0x678   : > { %5722 = vmatprep.subr.bf16.mxu1 %v5721_v20  ;;  %v4215_v20 = vld [vmem:[%s8949_s12] ss:$0 sm:$0xff] }
 0x679   : > { %5744 = vmatpush3.bf16.msra.mxu0 %v5743_v21  ;;  %v3564_v21 = vld [vmem:[%s8950_s13 + $0xf8] sm:$0xff] }
 0x67a   : > { %5746 = vmatprep.subr.bf16.mxu0 %v5745_v19  ;;  %v5733_v1 = vpack.c.bf16 %v3564_v21, %v3563_v39  ;;  %v5735_v19 = vpack.c.bf16 %v3548_v27, %v3547_v60  ;;  %v3757_v60 = vld [vmem:[%s8952_s15 + $0x90] sm:$0xff] }
 0x67b   : > { %5724 = vmatpush3.bf16.msra.mxu1 %v5723_v7 }
 0x67c   : > { %5726 = vmatprep.subr.bf16.mxu1 %v5725_v50 }
 0x67d   : > { %5748 = vmatpush3.bf16.msra.mxu0 %v5747_v56  ;;  %v3756_v56 = vld [vmem:[%s8952_s15 + $0x88] sm:$0xff] }
 0x67e   : > { %5750 = vmatprep.subr.bf16.mxu0 %v5749_v59  ;;  %v5769_v24 = vpack.c.bf16 %v3756_v56, %v3755_v58 }
 0x67f   : > { %5728 = vmatpush3.bf16.msra.mxu1 %v5727_v42 }
 0x680   : > { %5730 = vmatprep.subr.bf16.mxu1 %v5729_v35 }
 0x681   : > { %5752 = vmatpush3.bf16.msra.mxu0 %v5751_v6 }
 0x682   : > { %5754 = vmatprep.subr.bf16.mxu0 %v5753_v11 }
 0x683   : > { %5732 = vmatpush3.bf16.msra.mxu1 %v5731_v5 }
 0x684   : > { %5734 = vmatprep.subr.bf16.mxu1 %v5733_v1  ;;  %v3772_v1 = vld [vmem:[%s8952_s15 + $0x108] sm:$0xff] }
 0x685   : > { %5756 = vmatpush3.bf16.msra.mxu0 %v5755_v30  ;;  %v5803_v61 = vpack.c.bf16 %v3772_v1, %v3771_v37  ;;  %v3750_v37 = vld [vmem:[%s8952_s15 + $0x58] sm:$0xff] }
 0x686   : > { %5758 = vmatprep.subr.bf16.mxu0 %v5757_v53 }
 0x687   : > { %5736 = vmatpush3.bf16.msra.mxu1 %v5735_v19  ;;  %v3758_v19 = vld [vmem:[%s8952_s15 + $0x98] sm:$0xff] }
 0x688   : > { %5770 = vmatprep.subr.bf16.mxu1 %v5769_v24  ;;  %v3741_v24 = vld [vmem:[%s8952_s15 + $0x10] sm:$0xff] }
 0x689   : > { %5760 = vmatpush3.bf16.msra.mxu0 %v5759_v45 }
 0x68a   : > { %5762 = vmatprep.subr.bf16.mxu0 %v5761_v10 }
 0x68d   : > { %5764 = vmatpush3.bf16.msra.mxu0 %v5763_v13  ;;  %v3740_v13 = vld [vmem:[%s8952_s15 + $0x8] sm:$0xff] }
 0x68e   : > { %5766 = vmatprep.subr.bf16.mxu0 %v5765_v33  ;;  %v5771_v33 = vpack.c.bf16 %v3740_v13, %v3739_v48  ;;  %v3798_v48 = vld [vmem:[%s8952_s15 + $0x1d8] sm:$0xff] }
 0x691   : > { %5768 = vmatpush3.bf16.msra.mxu0 %v5767_v18 }
 0x692   : > { %5802 = vmatprep.subr.bf16.mxu0 %v5801_v41  ;;  %v3773_v41 = vld [vmem:[%s8952_s15 + $0x110] sm:$0xff] }
 0x727   : > { %v4818_v32 = vpop.f32.mrb[86].mxu0  ;;  %v4853_v57 = vpop.f32.mrb[86].mxu1 }
 0x728   : > { %v4819_v54 = vpop.f32.mrb[87].mxu0  ;;  %v4854_v59 = vpop.f32.mrb[87].mxu1 }
 0x729   : > { %v4820_v63 = vadd.f32 %v4819_v54, %v4818_v32  ;;  %v4855_v62 = vadd.f32 %v4854_v59, %v4853_v57  ;;  %v3774_v32 = vld [vmem:[%s8952_s15 + $0x118] sm:$0xff]  ;;  %v3759_v57 = vld [vmem:[%s8952_s15 + $0xa0] sm:$0xff]  ;;  %v5773_v54 = vpack.c.bf16 %v3758_v19, %v3757_v60  ;;  %v5805_v59 = vpack.c.bf16 %v3790_v9, %v3789_v25  ;;  %v3781_v60 = vld [vmem:[%s8952_s15 + $0x150] sm:$0xff] }
 0x72a   : > { %v3767_v19 = vld [vmem:[%s8952_s15 + $0xe0] sm:$0xff]  ;;  %v3768_v25 = vld [vmem:[%s8952_s15 + $0xe8] sm:$0xff] }
 0x72b   : > { %v3401_v16 = vadd.f32 %v4855_v62, %v4820_v63  ;;  %v3760_v63 = vld [vmem:[%s8952_s15 + $0xa8] sm:$0xff]  ;;  %v3791_v62 = vld [vmem:[%s8952_s15 + $0x1a0] sm:$0xff] }
 0x72c   : > { %v3799_v9 = vld [vmem:[%s8952_s15 + $0x1e0] sm:$0xff] }
 0x747   : > { %v3470_v6 = vpop.f32.mrb[88].mxu0 }
 0x748   : > { %v3471_v55 = vadd.f32 %v3470_v6, %v3401_v16  ;;  %v5177_v44 = vpop.f32.mrb[89].mxu0  ;;  %v3792_v16 = vld [vmem:[%s8952_s15 + $0x1a8] sm:$0xff]  ;;  %v5775_v6 = vpack.c.bf16 %v3742_v38, %v3741_v24  ;;  %v3751_v24 = vld [vmem:[%s8952_s15 + $0x60] sm:$0xff] }
 0x749   : > { %v3744_v44 = vld [vmem:[%s8952_s15 + $0x28] sm:$0xff] }
 0x74a   : > { %v3481_v52 = vmul.f32 %v4214_v23, %v3471_v55  ;;  %v5807_v23 = vpack.c.bf16 %v3774_v32, %v3773_v41  ;;  %v3743_v55 = vld [vmem:[%s8952_s15 + $0x20] sm:$0xff]  ;;  %v3752_v38 = vld [vmem:[%s8952_s15 + $0x68] sm:$0xff]  ;;  %v5793_v41 = vpack.c.bf16 %v3768_v25, %v3767_v19 }
 0x74c   : > { %v3489_v3 = vadd.f32 %v4215_v20, %v3481_v52  ;;  %v5777_v20 = vpack.c.bf16 %v3760_v63, %v3759_v57  ;;  %v5809_v52 = vpack.c.bf16 %v3792_v16, %v3791_v62  ;;  %v3783_v57 = vld [vmem:[%s8952_s15 + $0x160] sm:$0xff]  ;;  %v3770_v63 = vld [vmem:[%s8952_s15 + $0xf8] sm:$0xff]  ;;  %v3801_v62 = vld [vmem:[%s8952_s15 + $0x1f0] sm:$0xff] }
 0x74d   : > { %v3802_v16 = vld [vmem:[%s8952_s15 + $0x1f8] sm:$0xff] }
 0x74e   : > { %v3490_v43 = vmax.f32 %v3489_v3, 0.0  ;;  %v3775_v3 = vld [vmem:[%s8952_s15 + $0x120] sm:$0xff] }
 0x750   : > { %v3491_v11 = vsel %vm1388_vm12, %v3490_v43, -inf  ;;  %v3499_v7 = vsel %vm3498_vm1, %v3490_v43, -inf  ;;  %v3507_v31 = vsel %vm3506_vm15, %v3490_v43, -inf  ;;  %v3515_v4 = vsel %vm3514_vm10, %v3490_v43, -inf  ;;  %v3776_v43 = vld [vmem:[%s8952_s15 + $0x128] sm:$0xff] }
 0x751   : > { %v3492_v30 = vrot.slane %v3491_v11, 4  ;;  %v3500_v8 = vrot.slane %v3499_v7, 4  ;;  %v3508_v0 = vrot.slane %v3507_v31, 4  ;;  %v3516_v17 = vrot.slane %v3515_v4, 4 }
 0x753   : > { %v3493_v50 = vmax.f32 %v3491_v11, %v3492_v30  ;;  %v3501_v46 = vmax.f32 %v3499_v7, %v3500_v8  ;;  %v3509_v12 = vmax.f32 %v3507_v31, %v3508_v0  ;;  %v3517_v22 = vmax.f32 %v3515_v4, %v3516_v17  ;;  %v3761_v11 = vld [vmem:[%s8952_s15 + $0xb0] sm:$0xff]  ;;  %v3762_v7 = vld [vmem:[%s8952_s15 + $0xb8] sm:$0xff] }
 0x754   : > { %v3793_v31 = vld [vmem:[%s8952_s15 + $0x1b0] sm:$0xff]  ;;  %v3794_v4 = vld [vmem:[%s8952_s15 + $0x1b8] sm:$0xff]  ;;  %v5779_v30 = vpack.c.bf16 %v3744_v44, %v3743_v55  ;;  %v5811_v8 = vpack.c.bf16 %v3776_v43, %v3775_v3 }
 0x755   : > { %v3494_v53 = vrot.slane %v3493_v50, 2  ;;  %v3502_v42 = vrot.slane %v3501_v46, 2  ;;  %v3510_v36 = vrot.slane %v3509_v12, 2  ;;  %v3518_v2 = vrot.slane %v3517_v22, 2  ;;  %v3745_v0 = vld [vmem:[%s8952_s15 + $0x30] sm:$0xff]  ;;  %v3746_v17 = vld [vmem:[%s8952_s15 + $0x38] sm:$0xff] }
 0x756   : > { %v3753_v55 = vld [vmem:[%s8952_s15 + $0x70] sm:$0xff]  ;;  %v3786_v43 = vld [vmem:[%s8952_s15 + $0x178] sm:$0xff] }
 0x757   : > { %v3495_v45 = vmax.f32 %v3493_v50, %v3494_v53  ;;  %v3503_v40 = vmax.f32 %v3501_v46, %v3502_v42  ;;  %v3511_v34 = vmax.f32 %v3509_v12, %v3510_v36  ;;  %v3519_v15 = vmax.f32 %v3517_v22, %v3518_v2  ;;  %v3777_v12 = vld [vmem:[%s8952_s15 + $0x130] sm:$0xff]  ;;  %v3778_v22 = vld [vmem:[%s8952_s15 + $0x138] sm:$0xff]  ;;  %v3763_v53 = vld [vmem:[%s8952_s15 + $0xc0] sm:$0xff] }
 0x758   : > { %v5781_v50 = vpack.c.bf16 %v3762_v7, %v3761_v11  ;;  %v5813_v46 = vpack.c.bf16 %v3794_v4, %v3793_v31  ;;  %v3764_v42 = vld [vmem:[%s8952_s15 + $0xc8] sm:$0xff]  ;;  %v3795_v36 = vld [vmem:[%s8952_s15 + $0x1c0] sm:$0xff]  ;;  %v3785_v3 = vld [vmem:[%s8952_s15 + $0x170] sm:$0xff] }
 0x759   : > { %v3496_v35 = vrot.slane %v3495_v45, 1  ;;  %v3504_v26 = vrot.slane %v3503_v40, 1  ;;  %v3512_v29 = vrot.slane %v3511_v34, 1  ;;  %v3520_v51 = vrot.slane %v3519_v15, 1  ;;  %v3796_v2 = vld [vmem:[%s8952_s15 + $0x1c8] sm:$0xff]  ;;  %v3945_v31 = vld [vmem:[%s8954_s17] sm:$0xff] }
 0x75a   : > { %v5831_v7 = vpack.c.bf16 %v3786_v43, %v3785_v3  ;;  %v3946_v4 = vld [vmem:[%s8954_s17 + $0x8] sm:$0xff] }
 0x75b   : > { %v3497_v10 = vmax.f32 %v3495_v45, %v3496_v35  ;;  %v3505_v5 = vmax.f32 %v3503_v40, %v3504_v26  ;;  %v3513_v47 = vmax.f32 %v3511_v34, %v3512_v29  ;;  %v3521_v39 = vmax.f32 %v3519_v15, %v3520_v51  ;;  %v3747_v34 = vld [vmem:[%s8952_s15 + $0x40] sm:$0xff]  ;;  %v3748_v15 = vld [vmem:[%s8952_s15 + $0x48] sm:$0xff] }
 0x75c   : > { %v5783_v45 = vpack.c.bf16 %v3746_v17, %v3745_v0  ;;  %v5815_v40 = vpack.c.bf16 %v3778_v22, %v3777_v12  ;;  %v5785_v35 = vpack.c.bf16 %v3764_v42, %v3763_v53  ;;  %v5817_v26 = vpack.c.bf16 %v3796_v2, %v3795_v36  ;;  %v3779_v29 = vld [vmem:[%s8952_s15 + $0x140] sm:$0xff]  ;;  %v3780_v51 = vld [vmem:[%s8952_s15 + $0x148] sm:$0xff]  ;;  %v3955_v36 = vld [vmem:[%s8954_s17 + $0x50] sm:$0xff] }
 0x75d   : > { %v3522_v21 = vsel %vm1411_vm8, %v3497_v10, %v3505_v5  ;;  %v3765_v10 = vld [vmem:[%s8952_s15 + $0xd0] sm:$0xff]  ;;  %v3766_v5 = vld [vmem:[%s8952_s15 + $0xd8] sm:$0xff]  ;;  %v5787_v13 = vpack.c.bf16 %v3748_v15, %v3747_v34  ;;  %v3950_v0 = vld [vmem:[%s8954_s17 + $0x28] sm:$0xff] }
 0x75e   : > { %v3523_v28 = vsel %vm1388_vm12, %v3522_v21, %v3513_v47  ;;  %v3797_v47 = vld [vmem:[%s8952_s15 + $0x1d0] sm:$0xff]  ;;  %v5789_v1 = vpack.c.bf16 %v3766_v5, %v3765_v10  ;;  %v3953_v22 = vld [vmem:[%s8954_s17 + $0x40] sm:$0xff]  ;;  %v3954_v53 = vld [vmem:[%s8954_s17 + $0x48] sm:$0xff] }
 0x75f   : > { %v8642_v27 = vsel %vm1365_vm0, %v3523_v28, %v3521_v39  ;;  %v5819_v39 = vpack.c.bf16 %v3780_v51, %v3779_v29  ;;  %v3749_v21 = vld [vmem:[%s8952_s15 + $0x50] sm:$0xff]  ;;  %v5821_v28 = vpack.c.bf16 %v3798_v48, %v3797_v47  ;;  %v5846_v42 = vpack.c.bf16 %v3954_v53, %v3953_v22  ;;  %v3956_v2 = vld [vmem:[%s8954_s17 + $0x58] sm:$0xff]  ;;  %v3958_v34 = vld [vmem:[%s8954_s17 + $0x68] sm:$0xff] }
 0x760   : > { %3525 = vst [vmem:[%s669_s27] sm:$0xf] %v8642_v27  ;;  %v3527_v18 = vrot.slane %v8642_v27, 1  ;;  %v3531_v58 = vrot.slane %v8642_v27, 3  ;;  %v3529_v56 = vrot.slane %v8642_v27, 2  ;;  %v3597_v5 = vld [vmem:[%s8951_s14] sm:$0x1] }
 0x762   : > { %3662 = vmatprep.mubr.f32.mxu1 %v3527_v18  ;;  %3732 = vmatprep.mubr.f32.mxu0 %v3531_v58 }
 0x763   : > { %3663 = vmatmul.mubr.f32.vlgmr.msra.gmra.mrb[88].mxu1 %v8642_v27  ;;  %3733 = vmatmul.mubr.f32.vlgmr.msra.gmra.mrb[90].mxu0 %v3529_v56 }
 0x764   : > { %5772 = vmatpush3.bf16.msra.mxu1 %v5771_v33  ;;  %5804 = vmatpush3.bf16.msra.mxu0 %v5803_v61  ;;  %v3782_v33 = vld [vmem:[%s8952_s15 + $0x158] sm:$0xff] }
 0x765   : > { %3868 = vmatprep.mubr.f32.mxu1 %v3527_v18  ;;  %3938 = vmatprep.mubr.f32.mxu0 %v3531_v58  ;;  %v3800_v18 = vld [vmem:[%s8952_s15 + $0x1e8] sm:$0xff]  ;;  %v5791_v58 = vpack.c.bf16 %v3750_v37, %v3749_v21  ;;  %v5823_v61 = vpack.c.bf16 %v3782_v33, %v3781_v60 }
 0x766   : > { %5774 = vmatprep.subr.bf16.mxu1 %v5773_v54  ;;  %5806 = vmatprep.subr.bf16.mxu0 %v5805_v59  ;;  %v5825_v32 = vpack.c.bf16 %v3800_v18, %v3799_v9  ;;  %v3784_v54 = vld [vmem:[%s8952_s15 + $0x168] sm:$0xff]  ;;  %v3769_v59 = vld [vmem:[%s8952_s15 + $0xf0] sm:$0xff] }
 0x767   : > { %v5797_v44 = vpack.c.bf16 %v3770_v63, %v3769_v59 }
 0x768   : > { %5776 = vmatpush3.bf16.msra.mxu1 %v5775_v6  ;;  %5808 = vmatpush3.bf16.msra.mxu0 %v5807_v23  ;;  %v5795_v6 = vpack.c.bf16 %v3752_v38, %v3751_v24  ;;  %v5827_v23 = vpack.c.bf16 %v3784_v54, %v3783_v57 }
 0x769   : > { %5778 = vmatprep.subr.bf16.mxu1 %v5777_v20  ;;  %5810 = vmatprep.subr.bf16.mxu0 %v5809_v52  ;;  %v5829_v20 = vpack.c.bf16 %v3802_v16, %v3801_v62  ;;  %v3754_v52 = vld [vmem:[%s8952_s15 + $0x78] sm:$0xff] }
 0x76a   : > { %v5799_v11 = vpack.c.bf16 %v3754_v52, %v3753_v55 }
 0x76c   : > { %5780 = vmatpush3.bf16.msra.mxu1 %v5779_v30  ;;  %5812 = vmatpush3.bf16.msra.mxu0 %v5811_v8  ;;  %v3947_v30 = vld [vmem:[%s8954_s17 + $0x10] sm:$0xff]  ;;  %v5834_v8 = vpack.c.bf16 %v3946_v4, %v3945_v31 }
 0x76d   : > { %5782 = vmatprep.subr.bf16.mxu1 %v5781_v50  ;;  %5814 = vmatprep.subr.bf16.mxu0 %v5813_v46  ;;  %v3951_v50 = vld [vmem:[%s8954_s17 + $0x30] sm:$0xff]  ;;  %v3952_v46 = vld [vmem:[%s8954_s17 + $0x38] sm:$0xff] }
 0x76e   : > { %v5843_v12 = vpack.c.bf16 %v3952_v46, %v3951_v50 }
 0x770   : > { %5784 = vmatpush3.bf16.msra.mxu1 %v5783_v45  ;;  %5816 = vmatpush3.bf16.msra.mxu0 %v5815_v40  ;;  %v5849_v45 = vpack.c.bf16 %v3956_v2, %v3955_v36  ;;  %v3957_v40 = vld [vmem:[%s8954_s17 + $0x60] sm:$0xff] }
 0x771   : > { %5786 = vmatprep.subr.bf16.mxu1 %v5785_v35  ;;  %5818 = vmatprep.subr.bf16.mxu0 %v5817_v26  ;;  %v5852_v15 = vpack.c.bf16 %v3958_v34, %v3957_v40  ;;  %v3959_v35 = vld [vmem:[%s8954_s17 + $0x70] sm:$0xff]  ;;  %v3960_v26 = vld [vmem:[%s8954_s17 + $0x78] sm:$0xff] }
 0x772   : > { %v5855_v29 = vpack.c.bf16 %v3960_v26, %v3959_v35 }
 0x774   : > { %5788 = vmatpush3.bf16.msra.mxu1 %v5787_v13  ;;  %5820 = vmatpush3.bf16.msra.mxu0 %v5819_v39 }
 0x775   : > { %5790 = vmatprep.subr.bf16.mxu1 %v5789_v1  ;;  %5822 = vmatprep.subr.bf16.mxu0 %v5821_v28  ;;  %v3803_v28 = vld [vmem:[%s8953_s16] sm:$0x1] }
 0x778   : > { %5792 = vmatpush3.bf16.msra.mxu1 %v5791_v58  ;;  %5824 = vmatpush3.bf16.msra.mxu0 %v5823_v61  ;;  %v3961_v61 = vld [vmem:[%s9231_s30] sm:$0x1]  ;;  %s5908_s30 = scalar_lea.vmem %s5907_s24, 32 }
 0x779   : > { %5794 = vmatprep.subr.bf16.mxu1 %v5793_v41  ;;  %5826 = vmatprep.subr.bf16.mxu0 %v5825_v32  ;;  %p5910_p1 = scmp.lt.s32.totalorder %s5908_s30, %s5902_s28 }
 0x77b   : > { %p5911_p2 = por %p5910_p1, %p5909_p0 }
 0x77c   : > { %5796 = vmatpush3.bf16.msra.mxu1 %v5795_v6  ;;  %5828 = vmatpush3.bf16.msra.mxu0 %v5827_v23 }
 0x77d   : > { %5798 = vmatprep.subr.bf16.mxu1 %v5797_v44  ;;  %5830 = vmatprep.subr.bf16.mxu0 %v5829_v20  ;;  %p5912_p3 = pnand %p5911_p2, %p5905_p13 }
 0x780   : > { %5800 = vmatpush3.bf16.msra.mxu1 %v5799_v11  ;;  %5832 = vmatpush3.bf16.msra.mxu0 %v5831_v7 }
 0x781   : > { %5833 = vmatprep.subr.bf16.mxu1 %v9223_v49 }
 0x783   : > { %3869 = vmatmul.mubr.f32.vlgmr.msra.gmra.mrb[90].mxu1 %v8642_v27  ;;  %3939 = vmatmul.mubr.f32.vlgmr.msra.gmra.mrb[92].mxu0 %v3529_v56  ;;  %v3948_v27 = vld [vmem:[%s8954_s17 + $0x18] sm:$0xff] }
 0x784   : > { %5210 = vmatprep.mubr.msk.f32.mxu1 %vm5970_vm2, %v9210_v14  ;;  %5835 = vmatpush3.bf16.msra.mxu1 %v5834_v8  ;;  %v5837_v56 = vpack.c.bf16 %v3948_v27, %v3947_v30  ;;  %v3949_v14 = vld [vmem:[%s8954_s17 + $0x20] sm:$0xff] }
 0x785   : > { %5836 = vmatprep.subr.bf16.mxu1 %v9223_v49  ;;  %v5840_v17 = vpack.c.bf16 %v3950_v0, %v3949_v14 }
 0x788   : > { %5838 = vmatpush3.bf16.msra.mxu1 %v5837_v56 }
 0x789   : > { %5839 = vmatprep.subr.bf16.mxu1 %v9223_v49 }
 0x78c   : > { %5841 = vmatpush3.bf16.msra.mxu1 %v5840_v17 }
 0x78d   : > { %5842 = vmatprep.subr.bf16.mxu1 %v9223_v49 }
 0x790   : > { %5844 = vmatpush3.bf16.msra.mxu1 %v5843_v12 }
 0x791   : > { %5845 = vmatprep.subr.bf16.mxu1 %v9223_v49 }
 0x794   : > { %5847 = vmatpush3.bf16.msra.mxu1 %v5846_v42 }
 0x795   : > { %5848 = vmatprep.subr.bf16.mxu1 %v9223_v49 }
 0x798   : > { %5850 = vmatpush3.bf16.msra.mxu1 %v5849_v45 }
 0x799   : > { %5851 = vmatprep.subr.bf16.mxu1 %v9223_v49 }
 0x79c   : > { %5853 = vmatpush3.bf16.msra.mxu1 %v5852_v15 }
 0x79d   : > { %5854 = vmatprep.subr.bf16.mxu1 %v9223_v49 }
 0x7a0   : > { %5856 = vmatpush3.bf16.msra.mxu1 %v5855_v29 }
 0x836   : > { %v4905_v51 = vpop.f32.mrb[88].mxu1  ;;  %v4940_v10 = vpop.f32.mrb[90].mxu0 }
 0x837   : > { %v4906_v47 = vpop.f32.mrb[89].mxu1  ;;  %v4941_v48 = vpop.f32.mrb[91].mxu0 }
 0x838   : > { %v4907_v13 = vadd.f32 %v4906_v47, %v4905_v51  ;;  %v4942_v49 = vadd.f32 %v4941_v48, %v4940_v10 }
 0x83a   : > { %v3665_v39 = vadd.f32 %v4907_v13, %v3597_v5 }
 0x83c   : > { %v3735_v21 = vadd.f32 %v4942_v49, %v3665_v39 }
 0x83e   : > { %3738 = vst [vmem:[%s672_s23] sm:$0x1] %v3735_v21  ;;  %s9233_s23 = smov %s9232_s2 }
 0x856   : > { %v4975_v37 = vpop.f32.mrb[90].mxu1  ;;  %v5010_v1 = vpop.f32.mrb[92].mxu0 }
 0x857   : > { %v4976_v60 = vpop.f32.mrb[91].mxu1  ;;  %v5011_v33 = vpop.f32.mrb[93].mxu0 }
 0x858   : > { %v4977_v19 = vadd.f32 %v4976_v60, %v4975_v37  ;;  %v5012_v25 = vadd.f32 %v5011_v33, %v5010_v1 }
 0x85a   : > { %v3871_v9 = vadd.f32 %v4977_v19, %v3803_v28 }
 0x85c   : > { %v3941_v18 = vadd.f32 %v5012_v25, %v3871_v9 }
 0x85e   : > { %v3944_v58 = vmax.f32 %v3941_v18, 0.0 }
 0x860   : > { %5211 = vmatmul.mubr.f32.vlgmr.msra.gmra.mrb[92].mxu1 %v3944_v58 }
 0x933   : > { %v4028_v24 = vpop.f32.mrb[92].mxu1 }
 0x934   : > { %v4029_v38 = vadd.f32 %v4028_v24, %v3961_v61  ;;  %v5212_v41 = vpop.f32.mrb[93].mxu1 }
 0x936   : > { %4032 = vst [vmem:[%s660_s22] sm:$0x1] %v4029_v38 }
 0x937   : > { %5915 = shalt.err (!%p5912_p3)
}
 0x938   : > { %s5916_s21 = scalar_lea.hbm %s8895_s18, 16  ;;  %s5920_s0 = scalar_lea.hbm %s9233_s23, 32 }
 0x939   : > { %p5917_p4 = scmp.ne.s32.totalorder %s8895_s18, %s5916_s21  ;;  %p5921_p9 = scmp.lt.u32.totalorder %s8895_s18, %s9233_s23 }
 0x93a   : > { %p5922_p10 = scmp.lt.u32.totalorder %s5920_s0, %s5916_s21  ;;  %p5924_p12 = scmp.lt.u32.totalorder %s5916_s21, %s8895_s18 }
 0x93b   : > { %p5918_p7 = pnand %p5917_p4, %p6120_p5 }
 0x93c   : > { %p5923_p11 = por %p5922_p10, %p5921_p9 }
 0x93d   : > { %p5919_p8 = pneg %p5918_p7 }
 0x93e   : > { %p5925_p13 = por %p5924_p12, %p5923_p11 }
 0x940   : > { %p5926_p0 = pnand %p5925_p13, %p5919_p8 }
 0x942   : > { %5929 = shalt.err (!%p5926_p0)
}
 0x943   : > { %5858 = dma.vmem_to_hbm [thread:$0]  (%p6120_p5), %s8897_s4, 16, %s8895_s18, %s4041_s1  }
 0x944 PF: > { %s9234_s28 = sld [smem:[#allocation7_spill]]  ;;  %s9235_s3 = sld [smem:[#allocation5_spill]] }
 0x94a   : > { %p5864_p1 = scmp.ge.s32.totalorder %s9234_s28, 2  ;;  %s4084_s30 = sand.u32 1, %s9235_s3  }
 0x94b   : > { %s4085_s26 = scalar_lea.sflag [#allocation3], %s4084_s30 }
 0x94c   : > { %p5861_p2 = pnand %p5864_p1, %p6124_p6 }
 0x94e   : > { %5947 = dma.done.wait (!%p5861_p2), %s4085_s26, 16  }
 0x94f   : > { %5949 = vsyncadd (!%p5861_p2), %s4085_s26, 4294967280  ;;  %s9237_s27 = sld [smem:[#allocation8_spill]]  ;;  %s9238_s21 = sld [smem:[#allocation6_spill]] }
 0x950   : > { %s9239_s26 = sld [smem:[#allocation9_spill]]  ;;  %s9240_s2 = smov %s5956_s25 }
 0x955   : > { %p32_p3 = scmp.ge.s32.totalorder %s9237_s27, 4   ;;  %s9241_s25 = smov %s9238_s21 }
 0x957   :  { %34 = sbr.rel (!%p32_p3) target bundleno = 12 (0xc), region = 155 }
 0x95e   :  { %4089 = vsyncpa [#allocation3], 1 }
 0x95f   :  { %4091 = vsyncpa [#allocation3 + $0x1], 1 }

</bundles_post_ra>
